<compile_context>
chip_gen: v7x
topology: tpu7x:2x2x1
jax: 0.10.0
libtpu: 0.0.40
codegen_flags: <defaults>
</compile_context>

<pallas_src>
import functools

import jax
import jax.numpy as jnp
from jax.experimental import pallas as pl
from jax.experimental.pallas import tpu as pltpu

EPS_BN = 1e-5


def _bn_relu(y, gamma, beta, inv_m):
    """Training-mode BatchNorm1d (biased variance) over rows of (M, C) + ReLU."""
    mean = jnp.sum(y, axis=0, keepdims=True) * inv_m
    d = y - mean
    var = jnp.sum(d * d, axis=0, keepdims=True) * inv_m          # two-pass, f32
    return jnp.maximum(d * (gamma * jax.lax.rsqrt(var + EPS_BN)) + beta, 0.0)


def stacked_attention_kernel(x_ref, w1t_ref, w2t_ref, bn_g_ref, bn_b_ref,
                             qkv_wt_ref, qkv_b_ref, t_wt_ref, t_b_ref,
                             sa_g_ref, sa_b_ref,
                             out_ref,
                             h_ref, t_ref, vf_ref, kf_ref,
                             *, batch, seq):
    f32 = jnp.float32
    bf16 = jnp.bfloat16
    M, C = h_ref.shape
    inv_m = 1.0 / M
    layer = pl.program_id(0)

    # ---- stem (grid step 0 only): NCW -> (M, C) on-chip, conv1/bn1, conv2/bn2
    @pl.when(layer == 0)
    def _stem():
        for b in range(batch):                       # static: layout staging (XLU)
            t_ref[pl.ds(b * seq, seq), :] = x_ref[b].T           # (N, C) rows
        y = jnp.dot(t_ref[...].astype(bf16), w1t_ref[...],
                    preferred_element_type=f32)
        h = _bn_relu(y, bn_g_ref[0], bn_b_ref[0], inv_m)
        y = jnp.dot(h.astype(bf16), w2t_ref[...], preferred_element_type=f32)
        h_ref[...] = _bn_relu(y, bn_g_ref[1], bn_b_ref[1], inv_m)

    # ---- SA layer `layer` (this layer's weights arrive via blocked in_specs)
    qkv_w = qkv_wt_ref[0]                            # (C, C + C/4) bf16
    qkv_b = qkv_b_ref[0]                             # (1, C + C/4) f32
    t_w = t_wt_ref[0]                                # (C, C)       bf16
    t_b = t_b_ref[0]                                 # (1, C)       f32

    # Hoisted full-M projection: fused v|qk weights -> one MXU pass per layer.
    h_bf = h_ref[...].astype(bf16)
    vfkf = jnp.dot(h_bf, qkv_w, preferred_element_type=f32) + qkv_b
    vf_ref[...] = vfkf[:, :C].astype(bf16)           # lane-tile aligned slices
    kf_ref[...] = vfkf[:, C:].astype(bf16)

    def batch_body(b, carry):
        row = pl.multiple_of(b * seq, seq)
        kf_b = kf_ref[pl.ds(row, seq), :]            # (seq, C/4) bf16
        # q/k weights are tied -> energy = kf kf^T
        energy = jax.lax.dot_general(kf_b, kf_b, (((1,), (1,)), ((), ())),
                                     preferred_element_type=f32)   # (seq, seq)
        # softmax(dim=-1), f32, exact division (approx reciprocal error gets
        # chaotically amplified through the 4 chained layers)
        e = jnp.exp(energy - jnp.max(energy, axis=-1, keepdims=True))
        att = e / jnp.sum(e, axis=-1, keepdims=True)
        # torch: attention / (1e-9 + attention.sum(dim=1)) -> per-column rescale
        att = att / (1e-9 + jnp.sum(att, axis=0, keepdims=True))
        # channels-last x_r: xr[j, c] = sum_i att[i, j] * vf[i, c]
        xr = jax.lax.dot_general(att.astype(bf16), vf_ref[pl.ds(row, seq), :],
                                 (((0,), (0,)), ((), ())),
                                 preferred_element_type=f32)        # (seq, C)
        t_ref[pl.ds(row, seq), :] = h_ref[pl.ds(row, seq), :] - xr
        return carry

    # unrolled: overlaps batch b+1 MXU work with batch b EUP exp / XLU reductions
    jax.lax.fori_loop(0, batch, batch_body, 0, unroll=True)

    # Single full-M trans_conv projection + full-tensor BN stats (no loop carry).
    t = jnp.dot(t_ref[...].astype(bf16), t_w, preferred_element_type=f32) + t_b
    cur = h_ref[...] + _bn_relu(t, sa_g_ref[0], sa_b_ref[0], inv_m)
    h_ref[...] = cur                                 # residual input of next layer

    # (M, C) -> per-batch (C, N) slabs; kernel emits (B, 4, C, N) directly.
    for b in range(batch):                           # static: store transposes (XLU)
        out_ref[b, 0] = cur[b * seq:(b + 1) * seq, :].T.astype(out_ref.dtype)


def prepare_params(p):
    """One-time weight prep: transposes, layer stacking, bf16 casts, v|qk fusion."""
    bf16 = jnp.bfloat16
    C = p['conv1_w'].shape[0]
    qkv_w, qkv_b = [], []
    for l in range(4):
        sa = p['sa'][l]
        # fused (C, C + C/4): v_conv in lanes [0:C] (tile-aligned), tied q/k after
        qkv_w.append(jnp.concatenate([sa['v_w'].T, sa['qk_w'].T], axis=1))
        qkv_b.append(jnp.concatenate([sa['v_b'], jnp.zeros((C // 4,), jnp.float32)]))
    return {
        'w1t': p['conv1_w'].T.astype(bf16),
        'w2t': p['conv2_w'].T.astype(bf16),
        'bn_g': jnp.stack([p['bn1_g'], p['bn2_g']])[:, None, :],     # (2, 1, C)
        'bn_b': jnp.stack([p['bn1_b'], p['bn2_b']])[:, None, :],
        'qkv_wt': jnp.stack(qkv_w).astype(bf16),                     # (4, C, C+C/4)
        'qkv_b': jnp.stack(qkv_b)[:, None, :],                       # (4, 1, C+C/4)
        't_wt': jnp.stack([p['sa'][l]['t_w'].T for l in range(4)]).astype(bf16),
        't_b': jnp.stack([p['sa'][l]['t_b'] for l in range(4)])[:, None, :],
        'sa_g': jnp.stack([p['sa'][l]['g'] for l in range(4)])[:, None, :],
        'sa_b': jnp.stack([p['sa'][l]['b'] for l in range(4)])[:, None, :],
    }


@jax.jit
def stacked_attention_forward(x, pp):
    """x: (B, C, N) float32, PyTorch Conv1d (NCW) layout.  Returns (B, 4C, N)."""
    B, C, N = x.shape
    M = B * N
    Cq = C // 4
    kernel = functools.partial(stacked_attention_kernel, batch=B, seq=N)
    out = pl.pallas_call(
        kernel,
        out_shape=jax.ShapeDtypeStruct((B, 4, C, N), jnp.float32),
        grid=(4,),                                                   # SA layers
        in_specs=[
            pl.BlockSpec((B, C, N), lambda l: (0, 0, 0)),            # x (stem only)
            pl.BlockSpec((C, C), lambda l: (0, 0)),                  # conv1 W^T
            pl.BlockSpec((C, C), lambda l: (0, 0)),                  # conv2 W^T
            pl.BlockSpec((2, 1, C), lambda l: (0, 0, 0)),            # bn1/bn2 gamma
            pl.BlockSpec((2, 1, C), lambda l: (0, 0, 0)),            # bn1/bn2 beta
            pl.BlockSpec((1, C, C + Cq), lambda l: (l, 0, 0)),       # fused v|qk W^T
            pl.BlockSpec((1, 1, C + Cq), lambda l: (l, 0, 0)),       # fused v|qk bias
            pl.BlockSpec((1, C, C), lambda l: (l, 0, 0)),            # trans_conv W^T
            pl.BlockSpec((1, 1, C), lambda l: (l, 0, 0)),            # trans_conv bias
            pl.BlockSpec((1, 1, C), lambda l: (l, 0, 0)),            # after_norm gamma
            pl.BlockSpec((1, 1, C), lambda l: (l, 0, 0)),            # after_norm beta
        ],
        out_specs=pl.BlockSpec((B, 1, C, N), lambda l: (0, l, 0, 0)),
        scratch_shapes=[
            pltpu.VMEM((M, C), jnp.float32),     # h: residual chain across layers
            pltpu.VMEM((M, C), jnp.float32),     # staging: x_cl / (h - x_r)
            pltpu.VMEM((M, C), jnp.bfloat16),    # vf (v_conv output)
            pltpu.VMEM((M, Cq), jnp.bfloat16),   # kf (tied q/k conv output)
        ],
        compiler_params=pltpu.CompilerParams(
            dimension_semantics=("arbitrary",),  # layers chain via h scratch
            vmem_limit_bytes=32 * 1024 * 1024),  # raise for larger shapes (v5e/v6e)
    )(x, pp['w1t'], pp['w2t'], pp['bn_g'], pp['bn_b'],
      pp['qkv_wt'], pp['qkv_b'], pp['t_wt'], pp['t_b'], pp['sa_g'], pp['sa_b'])
    # (B, 4, C, N) -> (B, 4C, N): contiguous reshape == torch.cat((x1..x4), dim=1)
    return out.reshape(B, 4 * C, N)


# ----------------------------- pure-JAX reference -----------------------------
# Mirrors the torch module exactly; matmul operands are cast to bf16 with f32
# accumulation (same precision model as the kernel), BN stats / softmax in f32.
def reference_forward(x, p):
    f32, bf16 = jnp.float32, jnp.bfloat16

    def conv(w, x, b=None):                          # 1x1 Conv1d, NCW layout
        y = jnp.einsum('oc,bcn->bon', w.astype(bf16), x.astype(bf16),
                       preferred_element_type=f32)
        return y if b is None else y + b[None, :, None]

    def bn(y, g, b):                                 # training mode, biased variance
        mean = jnp.mean(y, axis=(0, 2), keepdims=True)
        var = jnp.mean((y - mean) ** 2, axis=(0, 2), keepdims=True)
        return (y - mean) * (g[None, :, None] * jax.lax.rsqrt(var + EPS_BN)) \
            + b[None, :, None]

    def sa(x, q):
        xk = conv(q['qk_w'], x)                      # (B, C/4, N)
        xq = jnp.transpose(xk, (0, 2, 1))            # tied q/k weights
        xv = conv(q['v_w'], x, q['v_b'])
        energy = jnp.einsum('bnc,bcm->bnm', xq.astype(bf16), xk.astype(bf16),
                            preferred_element_type=f32)
        att = jax.nn.softmax(energy, axis=-1)
        att = att / (1e-9 + jnp.sum(att, axis=1, keepdims=True))
        xr = jnp.einsum('bcn,bnm->bcm', xv.astype(bf16), att.astype(bf16),
                        preferred_element_type=f32)
        t = conv(q['t_w'], x - xr, q['t_b'])
        return x + jnp.maximum(bn(t, q['g'], q['b']), 0.0)

    h = jnp.maximum(bn(conv(p['conv1_w'], x), p['bn1_g'], p['bn1_b']), 0.0)
    h = jnp.maximum(bn(conv(p['conv2_w'], h), p['bn2_g'], p['bn2_b']), 0.0)
    outs, cur = [], h
    for l in range(4):
        cur = sa(cur, p['sa'][l])
        outs.append(cur)
    return jnp.concatenate(outs, axis=1)


# ----------------------------- deterministic init -----------------------------
def init_params(key, C):
    C4 = C // 4
    keys = iter(jax.random.split(key, 40))

    def w(shape, scale=0.05):
        return jax.random.normal(next(keys), shape, jnp.float32) * scale

    p = {
        'conv1_w': w((C, C)), 'conv2_w': w((C, C)),
        'bn1_g': 1.0 + w((C,)), 'bn1_b': w((C,)),
        'bn2_g': 1.0 + w((C,)), 'bn2_b': w((C,)),
        'sa': [],
    }
    for _ in range(4):
        p['sa'].append({
            'qk_w': w((C4, C)),                      # shared by q_conv and k_conv
            'v_w': w((C, C)), 'v_b': w((C,)),
            't_w': w((C, C)), 't_b': w((C,)),
            'g': 1.0 + w((C,)), 'b': w((C,)),
        })
    return p


if __name__ == "__main__":
    B, C, N = 2, 128, 128                            # lane-aligned channels / length
    kx, kp = jax.random.split(jax.random.PRNGKey(0))
    x = jax.random.normal(kx, (B, C, N), jnp.float32)
    params = init_params(kp, C)
    prepped = prepare_params(params)                 # one-time weight preprocessing

    out = jax.block_until_ready(stacked_attention_forward(x, prepped))
    assert out.shape == (B, 4 * C, N), out.shape

    ref = jax.block_until_ready(reference_forward(x, params))
    max_err = float(jnp.max(jnp.abs(out - ref)))
    assert jnp.allclose(out, ref, atol=2e-2, rtol=2e-2), f"max abs err {max_err}"

    print("KERNEL_OK")
</pallas_src>

<mosaic_0001>
module attributes {stable_mosaic.version = 11 : i64} {
  func.func @stacked_attention_kernel(%arg0: i32, %arg1: memref<2x128x128xf32, #tpu.memory_space<vmem>>, %arg2: memref<128x128xbf16, #tpu.memory_space<vmem>>, %arg3: memref<128x128xbf16, #tpu.memory_space<vmem>>, %arg4: memref<2x1x128xf32, #tpu.memory_space<vmem>>, %arg5: memref<2x1x128xf32, #tpu.memory_space<vmem>>, %arg6: memref<1x128x160xbf16, #tpu.memory_space<vmem>>, %arg7: memref<1x1x160xf32, #tpu.memory_space<vmem>>, %arg8: memref<1x128x128xbf16, #tpu.memory_space<vmem>>, %arg9: memref<1x1x128xf32, #tpu.memory_space<vmem>>, %arg10: memref<1x1x128xf32, #tpu.memory_space<vmem>>, %arg11: memref<1x1x128xf32, #tpu.memory_space<vmem>>, %arg12: memref<2x1x128x128xf32, #tpu.memory_space<vmem>>, %arg13: memref<256x128xf32, #tpu.memory_space<vmem>>, %arg14: memref<256x128xf32, #tpu.memory_space<vmem>>, %arg15: memref<256x128xbf16, #tpu.memory_space<vmem>>, %arg16: memref<256x32xbf16, #tpu.memory_space<vmem>>) attributes {dimension_semantics = [#tpu.dimension_semantics<arbitrary>], iteration_bounds = array<i64: 4>, scalar_prefetch = 0 : i64, scratch_operands = 4 : i64, tpu.core_type = #tpu.core_type<tc>, window_params = [{pipeline_mode = #tpu.pipeline_mode<synchronous>, transform_indices = @transform_0, window_bounds = array<i64: 2, 128, 128>}, {pipeline_mode = #tpu.pipeline_mode<synchronous>, transform_indices = @transform_1, window_bounds = array<i64: 128, 128>}, {pipeline_mode = #tpu.pipeline_mode<synchronous>, transform_indices = @transform_2, window_bounds = array<i64: 128, 128>}, {pipeline_mode = #tpu.pipeline_mode<synchronous>, transform_indices = @transform_3, window_bounds = array<i64: 2, 1, 128>}, {pipeline_mode = #tpu.pipeline_mode<synchronous>, transform_indices = @transform_4, window_bounds = array<i64: 2, 1, 128>}, {transform_indices = @transform_5, window_bounds = array<i64: 1, 128, 160>}, {transform_indices = @transform_6, window_bounds = array<i64: 1, 1, 160>}, {transform_indices = @transform_7, window_bounds = array<i64: 1, 128, 128>}, {transform_indices = @transform_8, window_bounds = array<i64: 1, 1, 128>}, {transform_indices = @transform_9, window_bounds = array<i64: 1, 1, 128>}, {transform_indices = @transform_10, window_bounds = array<i64: 1, 1, 128>}, {transform_indices = @transform_11, window_bounds = array<i64: 2, 1, 128, 128>}]} {
    %c0_i32 = arith.constant 0 : i32
    %0 = arith.cmpi eq, %arg0, %c0_i32 : i32
    %1 = arith.extui %0 : i1 to i32
    %c0_i32_0 = arith.constant 0 : i32
    %2 = arith.cmpi ne, %1, %c0_i32_0 : i32
    scf.if %2 {
      %c0_66 = arith.constant 0 : index
      %c0_67 = arith.constant 0 : index
      %c0_68 = arith.constant 0 : index
      %123 = vector.load %arg1[%c0_66, %c0_67, %c0_68] : memref<2x128x128xf32, #tpu.memory_space<vmem>>, vector<1x128x128xf32>
      %124 = vector.shape_cast %123 : vector<1x128x128xf32> to vector<128x128xf32>
      %125 = tpu.transpose %124, [1, 0] : vector<128x128xf32> -> vector<128x128xf32>
      %c0_69 = arith.constant 0 : index
      %c0_70 = arith.constant 0 : index
      %126 = vector.load %arg14[%c0_69, %c0_70] : memref<256x128xf32, #tpu.memory_space<vmem>>, vector<128x128xf32>
      tpu.vector_store %arg14[%c0_69, %c0_70], %125 {strides = array<i32>} : memref<256x128xf32, #tpu.memory_space<vmem>>, vector<128x128xf32>,
      %c1_71 = arith.constant 1 : index
      %c0_72 = arith.constant 0 : index
      %c0_73 = arith.constant 0 : index
      %127 = vector.load %arg1[%c1_71, %c0_72, %c0_73] : memref<2x128x128xf32, #tpu.memory_space<vmem>>, vector<1x128x128xf32>
      %128 = vector.shape_cast %127 : vector<1x128x128xf32> to vector<128x128xf32>
      %129 = tpu.transpose %128, [1, 0] : vector<128x128xf32> -> vector<128x128xf32>
      %c128 = arith.constant 128 : index
      %c0_74 = arith.constant 0 : index
      %130 = vector.load %arg14[%c128, %c0_74] : memref<256x128xf32, #tpu.memory_space<vmem>>, vector<128x128xf32>
      tpu.vector_store %arg14[%c128, %c0_74], %129 {strides = array<i32>} : memref<256x128xf32, #tpu.memory_space<vmem>>, vector<128x128xf32>,
      %c0_75 = arith.constant 0 : index
      %c0_76 = arith.constant 0 : index
      %131 = vector.load %arg14[%c0_75, %c0_76] : memref<256x128xf32, #tpu.memory_space<vmem>>, vector<256x128xf32>
      %132 = arith.truncf %131 : vector<256x128xf32> to vector<256x128xbf16>
      %c0_77 = arith.constant 0 : index
      %c0_78 = arith.constant 0 : index
      %133 = vector.load %arg2[%c0_77, %c0_78] : memref<128x128xbf16, #tpu.memory_space<vmem>>, vector<128x128xbf16>
      %cst_79 = arith.constant dense<0.000000e+00> : vector<256x128xf32>
      %134 = tpu.matmul %132, %133, %cst_79 {dimension_numbers = #tpu.dot_dimension_numbers<[1], [0], [0], [1], [0, 0, 1, 1], [], []>} : vector<256x128xbf16>, vector<128x128xbf16>, vector<256x128xf32> -> vector<256x128xf32>
      %c0_80 = arith.constant 0 : index
      %c0_81 = arith.constant 0 : index
      %c0_82 = arith.constant 0 : index
      %135 = vector.load %arg4[%c0_80, %c0_81, %c0_82] : memref<2x1x128xf32, #tpu.memory_space<vmem>>, vector<1x1x128xf32>
      %136 = vector.shape_cast %135 : vector<1x1x128xf32> to vector<1x128xf32>
      %c0_83 = arith.constant 0 : index
      %c0_84 = arith.constant 0 : index
      %c0_85 = arith.constant 0 : index
      %137 = vector.load %arg5[%c0_83, %c0_84, %c0_85] : memref<2x1x128xf32, #tpu.memory_space<vmem>>, vector<1x1x128xf32>
      %138 = vector.shape_cast %137 : vector<1x1x128xf32> to vector<1x128xf32>
      %cst_86 = arith.constant dense<0.000000e+00> : vector<128xf32>
      %139 = vector.multi_reduction <add>, %134, %cst_86 [0] : vector<256x128xf32> to vector<128xf32>
      %140 = vector.shape_cast %139 : vector<128xf32> to vector<1x128xf32>
      %cst_87 = arith.constant 3.906250e-03 : f32
      %141 = vector.broadcast %cst_87 : f32 to vector<1x128xf32>
      %142 = arith.mulf %140, %141 : vector<1x128xf32>
      %143 = vector.broadcast %142 : vector<1x128xf32> to vector<256x128xf32>
      %144 = arith.subf %134, %143 : vector<256x128xf32>
      %145 = arith.mulf %144, %144 : vector<256x128xf32>
      %cst_88 = arith.constant dense<0.000000e+00> : vector<128xf32>
      %146 = vector.multi_reduction <add>, %145, %cst_88 [0] : vector<256x128xf32> to vector<128xf32>
      %147 = vector.shape_cast %146 : vector<128xf32> to vector<1x128xf32>
      %cst_89 = arith.constant 3.906250e-03 : f32
      %148 = vector.broadcast %cst_89 : f32 to vector<1x128xf32>
      %149 = arith.mulf %147, %148 : vector<1x128xf32>
      %cst_90 = arith.constant 9.99999974E-6 : f32
      %150 = vector.broadcast %cst_90 : f32 to vector<1x128xf32>
      %151 = arith.addf %149, %150 : vector<1x128xf32>
      %152 = math.rsqrt %151 : vector<1x128xf32>
      %153 = arith.mulf %136, %152 : vector<1x128xf32>
      %154 = vector.broadcast %153 : vector<1x128xf32> to vector<256x128xf32>
      %155 = arith.mulf %144, %154 : vector<256x128xf32>
      %156 = vector.broadcast %138 : vector<1x128xf32> to vector<256x128xf32>
      %157 = arith.addf %155, %156 : vector<256x128xf32>
      %cst_91 = arith.constant 0.000000e+00 : f32
      %158 = vector.broadcast %cst_91 : f32 to vector<256x128xf32>
      %159 = arith.maximumf %157, %158 : vector<256x128xf32>
      %160 = arith.truncf %159 : vector<256x128xf32> to vector<256x128xbf16>
      %c0_92 = arith.constant 0 : index
      %c0_93 = arith.constant 0 : index
      %161 = vector.load %arg3[%c0_92, %c0_93] : memref<128x128xbf16, #tpu.memory_space<vmem>>, vector<128x128xbf16>
      %cst_94 = arith.constant dense<0.000000e+00> : vector<256x128xf32>
      %162 = tpu.matmul %160, %161, %cst_94 {dimension_numbers = #tpu.dot_dimension_numbers<[1], [0], [0], [1], [0, 0, 1, 1], [], []>} : vector<256x128xbf16>, vector<128x128xbf16>, vector<256x128xf32> -> vector<256x128xf32>
      %c1_95 = arith.constant 1 : index
      %c0_96 = arith.constant 0 : index
      %c0_97 = arith.constant 0 : index
      %163 = vector.load %arg4[%c1_95, %c0_96, %c0_97] : memref<2x1x128xf32, #tpu.memory_space<vmem>>, vector<1x1x128xf32>
      %164 = vector.shape_cast %163 : vector<1x1x128xf32> to vector<1x128xf32>
      %c1_98 = arith.constant 1 : index
      %c0_99 = arith.constant 0 : index
      %c0_100 = arith.constant 0 : index
      %165 = vector.load %arg5[%c1_98, %c0_99, %c0_100] : memref<2x1x128xf32, #tpu.memory_space<vmem>>, vector<1x1x128xf32>
      %166 = vector.shape_cast %165 : vector<1x1x128xf32> to vector<1x128xf32>
      %cst_101 = arith.constant dense<0.000000e+00> : vector<128xf32>
      %167 = vector.multi_reduction <add>, %162, %cst_101 [0] : vector<256x128xf32> to vector<128xf32>
      %168 = vector.shape_cast %167 : vector<128xf32> to vector<1x128xf32>
      %cst_102 = arith.constant 3.906250e-03 : f32
      %169 = vector.broadcast %cst_102 : f32 to vector<1x128xf32>
      %170 = arith.mulf %168, %169 : vector<1x128xf32>
      %171 = vector.broadcast %170 : vector<1x128xf32> to vector<256x128xf32>
      %172 = arith.subf %162, %171 : vector<256x128xf32>
      %173 = arith.mulf %172, %172 : vector<256x128xf32>
      %cst_103 = arith.constant dense<0.000000e+00> : vector<128xf32>
      %174 = vector.multi_reduction <add>, %173, %cst_103 [0] : vector<256x128xf32> to vector<128xf32>
      %175 = vector.shape_cast %174 : vector<128xf32> to vector<1x128xf32>
      %cst_104 = arith.constant 3.906250e-03 : f32
      %176 = vector.broadcast %cst_104 : f32 to vector<1x128xf32>
      %177 = arith.mulf %175, %176 : vector<1x128xf32>
      %cst_105 = arith.constant 9.99999974E-6 : f32
      %178 = vector.broadcast %cst_105 : f32 to vector<1x128xf32>
      %179 = arith.addf %177, %178 : vector<1x128xf32>
      %180 = math.rsqrt %179 : vector<1x128xf32>
      %181 = arith.mulf %164, %180 : vector<1x128xf32>
      %182 = vector.broadcast %181 : vector<1x128xf32> to vector<256x128xf32>
      %183 = arith.mulf %172, %182 : vector<256x128xf32>
      %184 = vector.broadcast %166 : vector<1x128xf32> to vector<256x128xf32>
      %185 = arith.addf %183, %184 : vector<256x128xf32>
      %cst_106 = arith.constant 0.000000e+00 : f32
      %186 = vector.broadcast %cst_106 : f32 to vector<256x128xf32>
      %187 = arith.maximumf %185, %186 : vector<256x128xf32>
      %c0_107 = arith.constant 0 : index
      %c0_108 = arith.constant 0 : index
      %188 = vector.load %arg13[%c0_107, %c0_108] : memref<256x128xf32, #tpu.memory_space<vmem>>, vector<256x128xf32>
      tpu.vector_store %arg13[%c0_107, %c0_108], %187 {strides = array<i32>} : memref<256x128xf32, #tpu.memory_space<vmem>>, vector<256x128xf32>,
    } else {
    }
    %c0 = arith.constant 0 : index
    %c0_1 = arith.constant 0 : index
    %c0_2 = arith.constant 0 : index
    %3 = vector.load %arg6[%c0, %c0_1, %c0_2] : memref<1x128x160xbf16, #tpu.memory_space<vmem>>, vector<1x128x160xbf16>
    %4 = vector.shape_cast %3 : vector<1x128x160xbf16> to vector<128x160xbf16>
    %c0_3 = arith.constant 0 : index
    %c0_4 = arith.constant 0 : index
    %c0_5 = arith.constant 0 : index
    %5 = vector.load %arg7[%c0_3, %c0_4, %c0_5] : memref<1x1x160xf32, #tpu.memory_space<vmem>>, vector<1x1x160xf32>
    %6 = vector.shape_cast %5 : vector<1x1x160xf32> to vector<1x160xf32>
    %c0_6 = arith.constant 0 : index
    %c0_7 = arith.constant 0 : index
    %c0_8 = arith.constant 0 : index
    %7 = vector.load %arg8[%c0_6, %c0_7, %c0_8] : memref<1x128x128xbf16, #tpu.memory_space<vmem>>, vector<1x128x128xbf16>
    %8 = vector.shape_cast %7 : vector<1x128x128xbf16> to vector<128x128xbf16>
    %c0_9 = arith.constant 0 : index
    %c0_10 = arith.constant 0 : index
    %c0_11 = arith.constant 0 : index
    %9 = vector.load %arg9[%c0_9, %c0_10, %c0_11] : memref<1x1x128xf32, #tpu.memory_space<vmem>>, vector<1x1x128xf32>
    %10 = vector.shape_cast %9 : vector<1x1x128xf32> to vector<1x128xf32>
    %c0_12 = arith.constant 0 : index
    %c0_13 = arith.constant 0 : index
    %11 = vector.load %arg13[%c0_12, %c0_13] : memref<256x128xf32, #tpu.memory_space<vmem>>, vector<256x128xf32>
    %12 = arith.truncf %11 : vector<256x128xf32> to vector<256x128xbf16>
    %cst = arith.constant dense<0.000000e+00> : vector<256x160xf32>
    %13 = tpu.matmul %12, %4, %cst {dimension_numbers = #tpu.dot_dimension_numbers<[1], [0], [0], [1], [0, 0, 1, 1], [], []>} : vector<256x128xbf16>, vector<128x160xbf16>, vector<256x160xf32> -> vector<256x160xf32>
    %14 = vector.broadcast %6 : vector<1x160xf32> to vector<256x160xf32>
    %15 = arith.addf %13, %14 : vector<256x160xf32>
    %16 = vector.extract_strided_slice %15 {offsets = [0, 0], sizes = [256, 128], strides = [1, 1]} : vector<256x160xf32> to vector<256x128xf32>
    %17 = arith.truncf %16 : vector<256x128xf32> to vector<256x128xbf16>
    %c0_14 = arith.constant 0 : index
    %c0_15 = arith.constant 0 : index
    %18 = vector.load %arg15[%c0_14, %c0_15] : memref<256x128xbf16, #tpu.memory_space<vmem>>, vector<256x128xbf16>
    tpu.vector_store %arg15[%c0_14, %c0_15], %17 {strides = array<i32>} : memref<256x128xbf16, #tpu.memory_space<vmem>>, vector<256x128xbf16>,
    %19 = vector.extract_strided_slice %15 {offsets = [0, 128], sizes = [256, 32], strides = [1, 1]} : vector<256x160xf32> to vector<256x32xf32>
    %20 = arith.truncf %19 : vector<256x32xf32> to vector<256x32xbf16>
    %c0_16 = arith.constant 0 : index
    %c0_17 = arith.constant 0 : index
    %21 = vector.load %arg16[%c0_16, %c0_17] : memref<256x32xbf16, #tpu.memory_space<vmem>>, vector<256x32xbf16>
    tpu.vector_store %arg16[%c0_16, %c0_17], %20 {strides = array<i32>} : memref<256x32xbf16, #tpu.memory_space<vmem>>, vector<256x32xbf16>,
    %c0_i32_18 = arith.constant 0 : i32
    %c128_i32 = arith.constant 128 : i32
    %22 = arith.muli %c0_i32_18, %c128_i32 : i32
    %23 = tpu.assume_multiple %22, 128 : i32
    %24 = arith.index_cast %23 : i32 to index
    %c0_19 = arith.constant 0 : index
    %25 = vector.load %arg16[%24, %c0_19] : memref<256x32xbf16, #tpu.memory_space<vmem>>, vector<128x32xbf16>
    %cst_20 = arith.constant dense<0.000000e+00> : vector<128x128xf32>
    %26 = tpu.matmul %25, %25, %cst_20 {dimension_numbers = #tpu.dot_dimension_numbers<[1], [1], [0], [0], [0, 0, 1, 0], [], []>} : vector<128x32xbf16>, vector<128x32xbf16>, vector<128x128xf32> -> vector<128x128xf32>
    %cst_21 = arith.constant dense<0xFF800000> : vector<128xf32>
    %27 = vector.multi_reduction <maximumf>, %26, %cst_21 [1] : vector<128x128xf32> to vector<128xf32>
    %28 = vector.shape_cast %27 : vector<128xf32> to vector<128x1xf32>
    %29 = vector.broadcast %28 : vector<128x1xf32> to vector<128x128xf32>
    %30 = arith.subf %26, %29 : vector<128x128xf32>
    %31 = math.exp %30 : vector<128x128xf32>
    %cst_22 = arith.constant dense<0.000000e+00> : vector<128xf32>
    %32 = vector.multi_reduction <add>, %31, %cst_22 [1] : vector<128x128xf32> to vector<128xf32>
    %33 = vector.shape_cast %32 : vector<128xf32> to vector<128x1xf32>
    %34 = vector.broadcast %33 : vector<128x1xf32> to vector<128x128xf32>
    %35 = arith.divf %31, %34 : vector<128x128xf32>
    %cst_23 = arith.constant dense<0.000000e+00> : vector<128xf32>
    %36 = vector.multi_reduction <add>, %35, %cst_23 [0] : vector<128x128xf32> to vector<128xf32>
    %37 = vector.shape_cast %36 : vector<128xf32> to vector<1x128xf32>
    %cst_24 = arith.constant 9.99999971E-10 : f32
    %38 = vector.broadcast %cst_24 : f32 to vector<1x128xf32>
    %39 = arith.addf %38, %37 : vector<1x128xf32>
    %40 = vector.broadcast %39 : vector<1x128xf32> to vector<128x128xf32>
    %41 = arith.divf %35, %40 : vector<128x128xf32>
    %42 = arith.truncf %41 : vector<128x128xf32> to vector<128x128xbf16>
    %43 = arith.index_cast %23 : i32 to index
    %c0_25 = arith.constant 0 : index
    %44 = vector.load %arg15[%43, %c0_25] : memref<256x128xbf16, #tpu.memory_space<vmem>>, vector<128x128xbf16>
    %cst_26 = arith.constant dense<0.000000e+00> : vector<128x128xf32>
    %45 = tpu.matmul %42, %44, %cst_26 {dimension_numbers = #tpu.dot_dimension_numbers<[0], [0], [1], [1], [0, 1, 1, 1], [], []>} : vector<128x128xbf16>, vector<128x128xbf16>, vector<128x128xf32> -> vector<128x128xf32>
    %46 = arith.index_cast %23 : i32 to index
    %c0_27 = arith.constant 0 : index
    %47 = vector.load %arg13[%46, %c0_27] : memref<256x128xf32, #tpu.memory_space<vmem>>, vector<128x128xf32>
    %48 = arith.subf %47, %45 : vector<128x128xf32>
    %49 = arith.index_cast %23 : i32 to index
    %c0_28 = arith.constant 0 : index
    %50 = vector.load %arg14[%49, %c0_28] : memref<256x128xf32, #tpu.memory_space<vmem>>, vector<128x128xf32>
    tpu.vector_store %arg14[%49, %c0_28], %48 {strides = array<i32>} : memref<256x128xf32, #tpu.memory_space<vmem>>, vector<128x128xf32>,
    %c1_i32 = arith.constant 1 : i32
    %c128_i32_29 = arith.constant 128 : i32
    %51 = arith.muli %c1_i32, %c128_i32_29 : i32
    %52 = tpu.assume_multiple %51, 128 : i32
    %53 = arith.index_cast %52 : i32 to index
    %c0_30 = arith.constant 0 : index
    %54 = vector.load %arg16[%53, %c0_30] : memref<256x32xbf16, #tpu.memory_space<vmem>>, vector<128x32xbf16>
    %cst_31 = arith.constant dense<0.000000e+00> : vector<128x128xf32>
    %55 = tpu.matmul %54, %54, %cst_31 {dimension_numbers = #tpu.dot_dimension_numbers<[1], [1], [0], [0], [0, 0, 1, 0], [], []>} : vector<128x32xbf16>, vector<128x32xbf16>, vector<128x128xf32> -> vector<128x128xf32>
    %cst_32 = arith.constant dense<0xFF800000> : vector<128xf32>
    %56 = vector.multi_reduction <maximumf>, %55, %cst_32 [1] : vector<128x128xf32> to vector<128xf32>
    %57 = vector.shape_cast %56 : vector<128xf32> to vector<128x1xf32>
    %58 = vector.broadcast %57 : vector<128x1xf32> to vector<128x128xf32>
    %59 = arith.subf %55, %58 : vector<128x128xf32>
    %60 = math.exp %59 : vector<128x128xf32>
    %cst_33 = arith.constant dense<0.000000e+00> : vector<128xf32>
    %61 = vector.multi_reduction <add>, %60, %cst_33 [1] : vector<128x128xf32> to vector<128xf32>
    %62 = vector.shape_cast %61 : vector<128xf32> to vector<128x1xf32>
    %63 = vector.broadcast %62 : vector<128x1xf32> to vector<128x128xf32>
    %64 = arith.divf %60, %63 : vector<128x128xf32>
    %cst_34 = arith.constant dense<0.000000e+00> : vector<128xf32>
    %65 = vector.multi_reduction <add>, %64, %cst_34 [0] : vector<128x128xf32> to vector<128xf32>
    %66 = vector.shape_cast %65 : vector<128xf32> to vector<1x128xf32>
    %cst_35 = arith.constant 9.99999971E-10 : f32
    %67 = vector.broadcast %cst_35 : f32 to vector<1x128xf32>
    %68 = arith.addf %67, %66 : vector<1x128xf32>
    %69 = vector.broadcast %68 : vector<1x128xf32> to vector<128x128xf32>
    %70 = arith.divf %64, %69 : vector<128x128xf32>
    %71 = arith.truncf %70 : vector<128x128xf32> to vector<128x128xbf16>
    %72 = arith.index_cast %52 : i32 to index
    %c0_36 = arith.constant 0 : index
    %73 = vector.load %arg15[%72, %c0_36] : memref<256x128xbf16, #tpu.memory_space<vmem>>, vector<128x128xbf16>
    %cst_37 = arith.constant dense<0.000000e+00> : vector<128x128xf32>
    %74 = tpu.matmul %71, %73, %cst_37 {dimension_numbers = #tpu.dot_dimension_numbers<[0], [0], [1], [1], [0, 1, 1, 1], [], []>} : vector<128x128xbf16>, vector<128x128xbf16>, vector<128x128xf32> -> vector<128x128xf32>
    %75 = arith.index_cast %52 : i32 to index
    %c0_38 = arith.constant 0 : index
    %76 = vector.load %arg13[%75, %c0_38] : memref<256x128xf32, #tpu.memory_space<vmem>>, vector<128x128xf32>
    %77 = arith.subf %76, %74 : vector<128x128xf32>
    %78 = arith.index_cast %52 : i32 to index
    %c0_39 = arith.constant 0 : index
    %79 = vector.load %arg14[%78, %c0_39] : memref<256x128xf32, #tpu.memory_space<vmem>>, vector<128x128xf32>
    tpu.vector_store %arg14[%78, %c0_39], %77 {strides = array<i32>} : memref<256x128xf32, #tpu.memory_space<vmem>>, vector<128x128xf32>,
    %c2_i32 = arith.constant 2 : i32
    %c0_40 = arith.constant 0 : index
    %c0_41 = arith.constant 0 : index
    %80 = vector.load %arg14[%c0_40, %c0_41] : memref<256x128xf32, #tpu.memory_space<vmem>>, vector<256x128xf32>
    %81 = arith.truncf %80 : vector<256x128xf32> to vector<256x128xbf16>
    %cst_42 = arith.constant dense<0.000000e+00> : vector<256x128xf32>
    %82 = tpu.matmul %81, %8, %cst_42 {dimension_numbers = #tpu.dot_dimension_numbers<[1], [0], [0], [1], [0, 0, 1, 1], [], []>} : vector<256x128xbf16>, vector<128x128xbf16>, vector<256x128xf32> -> vector<256x128xf32>
    %83 = vector.broadcast %10 : vector<1x128xf32> to vector<256x128xf32>
    %84 = arith.addf %82, %83 : vector<256x128xf32>
    %c0_43 = arith.constant 0 : index
    %c0_44 = arith.constant 0 : index
    %85 = vector.load %arg13[%c0_43, %c0_44] : memref<256x128xf32, #tpu.memory_space<vmem>>, vector<256x128xf32>
    %c0_45 = arith.constant 0 : index
    %c0_46 = arith.constant 0 : index
    %c0_47 = arith.constant 0 : index
    %86 = vector.load %arg10[%c0_45, %c0_46, %c0_47] : memref<1x1x128xf32, #tpu.memory_space<vmem>>, vector<1x1x128xf32>
    %87 = vector.shape_cast %86 : vector<1x1x128xf32> to vector<1x128xf32>
    %c0_48 = arith.constant 0 : index
    %c0_49 = arith.constant 0 : index
    %c0_50 = arith.constant 0 : index
    %88 = vector.load %arg11[%c0_48, %c0_49, %c0_50] : memref<1x1x128xf32, #tpu.memory_space<vmem>>, vector<1x1x128xf32>
    %89 = vector.shape_cast %88 : vector<1x1x128xf32> to vector<1x128xf32>
    %cst_51 = arith.constant dense<0.000000e+00> : vector<128xf32>
    %90 = vector.multi_reduction <add>, %84, %cst_51 [0] : vector<256x128xf32> to vector<128xf32>
    %91 = vector.shape_cast %90 : vector<128xf32> to vector<1x128xf32>
    %cst_52 = arith.constant 3.906250e-03 : f32
    %92 = vector.broadcast %cst_52 : f32 to vector<1x128xf32>
    %93 = arith.mulf %91, %92 : vector<1x128xf32>
    %94 = vector.broadcast %93 : vector<1x128xf32> to vector<256x128xf32>
    %95 = arith.subf %84, %94 : vector<256x128xf32>
    %96 = arith.mulf %95, %95 : vector<256x128xf32>
    %cst_53 = arith.constant dense<0.000000e+00> : vector<128xf32>
    %97 = vector.multi_reduction <add>, %96, %cst_53 [0] : vector<256x128xf32> to vector<128xf32>
    %98 = vector.shape_cast %97 : vector<128xf32> to vector<1x128xf32>
    %cst_54 = arith.constant 3.906250e-03 : f32
    %99 = vector.broadcast %cst_54 : f32 to vector<1x128xf32>
    %100 = arith.mulf %98, %99 : vector<1x128xf32>
    %cst_55 = arith.constant 9.99999974E-6 : f32
    %101 = vector.broadcast %cst_55 : f32 to vector<1x128xf32>
    %102 = arith.addf %100, %101 : vector<1x128xf32>
    %103 = math.rsqrt %102 : vector<1x128xf32>
    %104 = arith.mulf %87, %103 : vector<1x128xf32>
    %105 = vector.broadcast %104 : vector<1x128xf32> to vector<256x128xf32>
    %106 = arith.mulf %95, %105 : vector<256x128xf32>
    %107 = vector.broadcast %89 : vector<1x128xf32> to vector<256x128xf32>
    %108 = arith.addf %106, %107 : vector<256x128xf32>
    %cst_56 = arith.constant 0.000000e+00 : f32
    %109 = vector.broadcast %cst_56 : f32 to vector<256x128xf32>
    %110 = arith.maximumf %108, %109 : vector<256x128xf32>
    %111 = arith.addf %85, %110 : vector<256x128xf32>
    %c0_57 = arith.constant 0 : index
    %c0_58 = arith.constant 0 : index
    %112 = vector.load %arg13[%c0_57, %c0_58] : memref<256x128xf32, #tpu.memory_space<vmem>>, vector<256x128xf32>
    tpu.vector_store %arg13[%c0_57, %c0_58], %111 {strides = array<i32>} : memref<256x128xf32, #tpu.memory_space<vmem>>, vector<256x128xf32>,
    %113 = vector.extract_strided_slice %111 {offsets = [0, 0], sizes = [128, 128], strides = [1, 1]} : vector<256x128xf32> to vector<128x128xf32>
    %114 = tpu.transpose %113, [1, 0] : vector<128x128xf32> -> vector<128x128xf32>
    %c0_59 = arith.constant 0 : index
    %c0_60 = arith.constant 0 : index
    %c0_61 = arith.constant 0 : index
    %c0_62 = arith.constant 0 : index
    %115 = vector.load %arg12[%c0_59, %c0_60, %c0_61, %c0_62] : memref<2x1x128x128xf32, #tpu.memory_space<vmem>>, vector<1x1x128x128xf32>
    %116 = vector.shape_cast %115 : vector<1x1x128x128xf32> to vector<128x128xf32>
    %117 = vector.shape_cast %114 : vector<128x128xf32> to vector<1x1x128x128xf32>
    tpu.vector_store %arg12[%c0_59, %c0_60, %c0_61, %c0_62], %117 {strides = array<i32>} : memref<2x1x128x128xf32, #tpu.memory_space<vmem>>, vector<1x1x128x128xf32>,
    %118 = vector.extract_strided_slice %111 {offsets = [128, 0], sizes = [128, 128], strides = [1, 1]} : vector<256x128xf32> to vector<128x128xf32>
    %119 = tpu.transpose %118, [1, 0] : vector<128x128xf32> -> vector<128x128xf32>
    %c1 = arith.constant 1 : index
    %c0_63 = arith.constant 0 : index
    %c0_64 = arith.constant 0 : index
    %c0_65 = arith.constant 0 : index
    %120 = vector.load %arg12[%c1, %c0_63, %c0_64, %c0_65] : memref<2x1x128x128xf32, #tpu.memory_space<vmem>>, vector<1x1x128x128xf32>
    %121 = vector.shape_cast %120 : vector<1x1x128x128xf32> to vector<128x128xf32>
    %122 = vector.shape_cast %119 : vector<128x128xf32> to vector<1x1x128x128xf32>
    tpu.vector_store %arg12[%c1, %c0_63, %c0_64, %c0_65], %122 {strides = array<i32>} : memref<2x1x128x128xf32, #tpu.memory_space<vmem>>, vector<1x1x128x128xf32>,
    return
  }
  func.func @transform_0(%arg0: i32) -> (i32, i32, i32) {
    %c0_i32 = arith.constant 0 : i32
    %c0_i32_0 = arith.constant 0 : i32
    %c0_i32_1 = arith.constant 0 : i32
    %c0_i32_2 = arith.constant 0 : i32
    return %c0_i32, %c0_i32_0, %c0_i32_1 : i32, i32, i32
  }
  func.func @transform_1(%arg0: i32) -> (i32, i32) {
    %c0_i32 = arith.constant 0 : i32
    %c0_i32_0 = arith.constant 0 : i32
    %c0_i32_1 = arith.constant 0 : i32
    return %c0_i32, %c0_i32_0 : i32, i32
  }
  func.func @transform_2(%arg0: i32) -> (i32, i32) {
    %c0_i32 = arith.constant 0 : i32
    %c0_i32_0 = arith.constant 0 : i32
    %c0_i32_1 = arith.constant 0 : i32
    return %c0_i32, %c0_i32_0 : i32, i32
  }
  func.func @transform_3(%arg0: i32) -> (i32, i32, i32) {
    %c0_i32 = arith.constant 0 : i32
    %c0_i32_0 = arith.constant 0 : i32
    %c0_i32_1 = arith.constant 0 : i32
    %c0_i32_2 = arith.constant 0 : i32
    return %c0_i32, %c0_i32_0, %c0_i32_1 : i32, i32, i32
  }
  func.func @transform_4(%arg0: i32) -> (i32, i32, i32) {
    %c0_i32 = arith.constant 0 : i32
    %c0_i32_0 = arith.constant 0 : i32
    %c0_i32_1 = arith.constant 0 : i32
    %c0_i32_2 = arith.constant 0 : i32
    return %c0_i32, %c0_i32_0, %c0_i32_1 : i32, i32, i32
  }
  func.func @transform_5(%arg0: i32) -> (i32, i32, i32) {
    %c0_i32 = arith.constant 0 : i32
    %c0_i32_0 = arith.constant 0 : i32
    %c0_i32_1 = arith.constant 0 : i32
    return %arg0, %c0_i32, %c0_i32_0 : i32, i32, i32
  }
  func.func @transform_6(%arg0: i32) -> (i32, i32, i32) {
    %c0_i32 = arith.constant 0 : i32
    %c0_i32_0 = arith.constant 0 : i32
    %c0_i32_1 = arith.constant 0 : i32
    return %arg0, %c0_i32, %c0_i32_0 : i32, i32, i32
  }
  func.func @transform_7(%arg0: i32) -> (i32, i32, i32) {
    %c0_i32 = arith.constant 0 : i32
    %c0_i32_0 = arith.constant 0 : i32
    %c0_i32_1 = arith.constant 0 : i32
    return %arg0, %c0_i32, %c0_i32_0 : i32, i32, i32
  }
  func.func @transform_8(%arg0: i32) -> (i32, i32, i32) {
    %c0_i32 = arith.constant 0 : i32
    %c0_i32_0 = arith.constant 0 : i32
    %c0_i32_1 = arith.constant 0 : i32
    return %arg0, %c0_i32, %c0_i32_0 : i32, i32, i32
  }
  func.func @transform_9(%arg0: i32) -> (i32, i32, i32) {
    %c0_i32 = arith.constant 0 : i32
    %c0_i32_0 = arith.constant 0 : i32
    %c0_i32_1 = arith.constant 0 : i32
    return %arg0, %c0_i32, %c0_i32_0 : i32, i32, i32
  }
  func.func @transform_10(%arg0: i32) -> (i32, i32, i32) {
    %c0_i32 = arith.constant 0 : i32
    %c0_i32_0 = arith.constant 0 : i32
    %c0_i32_1 = arith.constant 0 : i32
    return %arg0, %c0_i32, %c0_i32_0 : i32, i32, i32
  }
  func.func @transform_11(%arg0: i32) -> (i32, i32, i32, i32) {
    %c0_i32 = arith.constant 0 : i32
    %c0_i32_0 = arith.constant 0 : i32
    %c0_i32_1 = arith.constant 0 : i32
    %c0_i32_2 = arith.constant 0 : i32
    return %c0_i32, %arg0, %c0_i32_0, %c0_i32_1 : i32, i32, i32, i32
  }
}

</mosaic_0001>

<bundles_post_ra>
// kernel: stacked_attention_forward.1
= control target key start
LH: loop header
LB: loop body
LE: loop exit
PB: predicated region body
PF: predicated region fallthrough
CT: control target
= control target key end

     0   :  { %s6919_s0 = inlined_call_operand.vmem [shape: f32[2,128,128], index: 0, kind: input, shape index: {}]   ;;  %s6920_s1 = inlined_call_operand.vmem [shape: bf16[128,128], index: 1, kind: input, shape index: {}]   ;;  %s6921_s2 = inlined_call_operand.vmem [shape: bf16[128,128], index: 2, kind: input, shape index: {}]   ;;  %s6922_s3 = inlined_call_operand.vmem [shape: f32[2,1,128], index: 3, kind: input, shape index: {}]   ;;  %s6923_s4 = inlined_call_operand.vmem [shape: f32[2,1,128], index: 4, kind: input, shape index: {}]   ;;  %s6924_s5 = inlined_call_operand.vmem [shape: bf16[4,128,160], index: 5, kind: input, shape index: {}]   ;;  %s6925_s6 = inlined_call_operand.vmem [shape: f32[4,1,160], index: 6, kind: input, shape index: {}]   ;;  %s6926_s7 = inlined_call_operand.vmem [shape: bf16[4,128,128], index: 7, kind: input, shape index: {}]   ;;  %s6927_s8 = inlined_call_operand.vmem [shape: f32[4,1,128], index: 8, kind: input, shape index: {}]   ;;  %s6928_s9 = inlined_call_operand.vmem [shape: f32[4,1,128], index: 9, kind: input, shape index: {}]   ;;  %s6929_s10 = inlined_call_operand.vmem [shape: f32[4,1,128], index: 10, kind: input, shape index: {}]   ;;  %s6930_s11 = inlined_call_operand.hbm [shape: f32[2,4,128,128], index: 11, kind: output, shape index: {}]  }
   0x1   :  { %6953 = sst [smem:[#allocation30_spill]] %s6930_s11 }
   0x2   :  { %16 = vsyncpa [#allocation7], 0 }
   0x3   :  { %18 = vsyncpa [#allocation7 + $0x1], 0  ;;  %s4826_s17 = smov 0   ;;  %s4828_s18 = smov 0  }
   0x4   :  { %s4830_s19 = smov 0   ;;  %s4832_s20 = smov 0  }
   0x5 LB: > { %6954 = sst [smem:[#allocation11_spill]] %s4744_s17  ;;  %s4847_s21 = sadd.s32 4294967295, %s4756_s20   ;;  %s4756_s20 = sphi %s4832_s20, %s6994_s20   ;;  %s4752_s19 = sphi %s4830_s19, %s6997_s19   ;;  %s4748_s18 = sphi %s4828_s18, %s6996_s18   ;;  %s4744_s17 = sphi %s4826_s17, %s6995_s17  }
   0x6   : > { %6955 = sst [smem:[#allocation12_spill]] %s4748_s18  ;;  %s3930_s22 = sadd.s32 4294967294, %s4756_s20  }
   0x7   : > { %6956 = sst [smem:[#allocation13_spill]] %s4752_s19  ;;  %s4851_s23 = sadd.s32 1, %s4756_s20  }
   0x8   : > { %6957 = sst [smem:[#allocation14_spill]] %s4756_s20  ;;  %s292_s24 = sadd.s32 1, %s4752_s19 }
   0x9   : > { %6958 = sst [smem:[#allocation15_spill]] %s4851_s23  ;;  %s289_s25 = ssub.s32 %s4756_s20, %s4851_s23 }
   0xa   : > { %p302_p0 = scmp.ne.s32.totalorder %s4752_s19, %s4748_s18  ;;  %p290_p1 = scmp.eq.s32.totalorder %s289_s25, 0 }
   0xb   : > { %p303_p2 = scmp.eq.s32.totalorder %s4847_s21, 3  ;;  %p308_p3 = scmp.ne.s32.totalorder %s4748_s18, %s4744_s17 }
   0xc   : > { %p309_p4 = scmp.eq.s32.totalorder %s3930_s22, 3  ;;  %p3933_p7 = scmp.ge.s32.totalorder %s4756_s20, 1 }
   0xd   : > { %s4862_s26 = scalar_select %p290_p1, %s4752_s19, %s292_s24  }
   0xe   : > { %p4864_p5 = por %p303_p2, %p302_p0  ;;  %p4868_p6 = por %p309_p4, %p308_p3 }
   0xf   : > { %6959 = sst [smem:[#allocation16_spill]] %s4862_s26  ;;  %p383_p8 = scmp.lt.s32.totalorder %s4756_s20, 5 }
  0x10   : > { %s6960_s27 = scalar_select %p4864_p5, 1, 0 }
  0x11   : > { %s6962_s28 = scalar_select %p4868_p6, 1, 0 }
  0x12   : > { %6961 = sst [smem:[#allocation17_spill]] %s6960_s27  ;;  %p384_p9 = pnand %p3933_p7, %p383_p8 }
  0x13   : > { %6963 = sst [smem:[#allocation18_spill]] %s6962_s28 }
  0x14   : > { %387 = sbr.rel (%p384_p9) target bundleno = 2909 (0xb5d), region = 64 }
  0x1b   : > { %s6931_s29 = sand.u32 1, %s4748_s18   ;;  %p441_p10 = scmp.lt.s32.totalorder %s4847_s21, 3 }
  0x1c   : > { %s3934_s30 = sshll.u32 %s6931_s29, 8  ;;  %p3940_p11 = scmp.ne.s32.totalorder %s4847_s21, 0 }
  0x1d   : > { %s4879_s12 = scalar_select %p441_p10, %s4847_s21, 3 }
  0x1e   : > { %468 = sbr.rel (%p3940_p11) target bundleno = 1030 (0x406), region = 68  ;;  %v469_v0 = vld [vmem:[%s6919_s0] sm:$0xff] (!%p3940_p11)  ;;  %v470_v1 = vld [vmem:[%s6919_s0 + $0x8] sm:$0xff] (!%p3940_p11)  ;;  %v471_v4 = vld [vmem:[%s6919_s0 + $0x10] sm:$0xff] (!%p3940_p11) }
  0x1f   : > { %s4040_s13 = sshll.u32 %s4879_s12, 7  ;;  %s3937_s14 = sshll.u32 %s4879_s12, 1  ;;  %485 = vxpose.xlu0.b32.start [1/16] (!%p3940_p11), %v469_v0, 128  ;;  %v3941_v2 = vld [vmem:[%s6919_s0 + $0x80] sm:$0xff] (!%p3940_p11)  ;;  %v3942_v3 = vld [vmem:[%s6919_s0 + $0x88] sm:$0xff] (!%p3940_p11)  ;;  %v3943_v5 = vld [vmem:[%s6919_s0 + $0x90] sm:$0xff] (!%p3940_p11) }
  0x20   : > { %s4886_s22 = scalar_lea.vmem %s6924_s5, %s4040_s13  ;;  %s4891_s26 = scalar_lea.vmem %s6925_s6, %s3937_s14  ;;  %550 = vxpose.xlu1.b32.start [1/16] (!%p3940_p11), %v3941_v2, 128  ;;  %v472_v6 = vld [vmem:[%s6919_s0 + $0x18] sm:$0xff] (!%p3940_p11)  ;;  %v4536_v8 = vld [vmem:[%s6920_s1] sm:$0xff] (!%p3940_p11)   ;;  %v4537_v9 = vld [vmem:[%s6920_s1 + $0x8] sm:$0xff] (!%p3940_p11)  }
  0x21   : > { %s4041_s29 = sshll.u32 %s4879_s12, 6  ;;  %s457_s28 = scalar_lea.vmem %s6927_s8, %s4879_s12  ;;  %v3944_v7 = vld [vmem:[%s6919_s0 + $0x98] sm:$0xff] (!%p3940_p11)  ;;  %4179 = vmatprep.subr.bf16.mxu0 (!%p3940_p11), %v4536_v8  ;;  %v473_v10 = vld [vmem:[%s6919_s0 + $0x20] sm:$0xff] (!%p3940_p11)  ;;  %v4538_v11 = vld [vmem:[%s6920_s1 + $0x10] sm:$0xff] (!%p3940_p11)  }
  0x22   : > { %s4901_s11 = scalar_lea.vmem %s6926_s7, %s4041_s29  ;;  %s460_s13 = scalar_lea.vmem %s6928_s9, %s4879_s12  ;;  %4180 = vmatpush3.bf16.msra.mxu0 (!%p3940_p11), %v4536_v8  ;;  %v3945_v12 = vld [vmem:[%s6919_s0 + $0xa0] sm:$0xff] (!%p3940_p11)  ;;  %v474_v13 = vld [vmem:[%s6919_s0 + $0x28] sm:$0xff] (!%p3940_p11)  ;;  %v4539_v15 = vld [vmem:[%s6920_s1 + $0x18] sm:$0xff] (!%p3940_p11)  }
  0x23   : > { %s463_s24 = scalar_lea.vmem %s6929_s10, %s4879_s12  ;;  %s4911_s14 = scalar_lea.vmem [#allocation6], %s3934_s30  ;;  %486 = vxpose.xlu0.b32.cont [2/16] (!%p3940_p11), %v470_v1, 128  ;;  %4181 = vmatprep.subr.bf16.mxu0 (!%p3940_p11), %v4537_v9  ;;  %v3946_v14 = vld [vmem:[%s6919_s0 + $0xa8] sm:$0xff] (!%p3940_p11)  ;;  %v475_v16 = vld [vmem:[%s6919_s0 + $0x30] sm:$0xff] (!%p3940_p11)  ;;  %v4540_v17 = vld [vmem:[%s6920_s1 + $0x20] sm:$0xff] (!%p3940_p11)  }
  0x24   : > { %551 = vxpose.xlu1.b32.cont [2/16] (!%p3940_p11), %v3942_v3, 128  ;;  %v3947_v18 = vld [vmem:[%s6919_s0 + $0xb0] sm:$0xff] (!%p3940_p11)  ;;  %v476_v19 = vld [vmem:[%s6919_s0 + $0x38] sm:$0xff] (!%p3940_p11)  ;;  %v4541_v20 = vld [vmem:[%s6920_s1 + $0x28] sm:$0xff] (!%p3940_p11)  }
  0x25   : > { %v3948_v21 = vld [vmem:[%s6919_s0 + $0xb8] sm:$0xff]  ;;  %v477_v22 = vld [vmem:[%s6919_s0 + $0x40] sm:$0xff]  ;;  %v4542_v23 = vld [vmem:[%s6920_s1 + $0x30] sm:$0xff]  }
  0x26   : > { %4182 = vmatpush3.bf16.msra.mxu0 %v4537_v9  ;;  %v3949_v24 = vld [vmem:[%s6919_s0 + $0xc0] sm:$0xff]  ;;  %v478_v25 = vld [vmem:[%s6919_s0 + $0x48] sm:$0xff]  ;;  %v4543_v26 = vld [vmem:[%s6920_s1 + $0x38] sm:$0xff]  }
  0x27   : > { %487 = vxpose.xlu0.b32.cont [3/16] %v471_v4, 128  ;;  %4183 = vmatprep.subr.bf16.mxu0 %v4538_v11  ;;  %v3950_v27 = vld [vmem:[%s6919_s0 + $0xc8] sm:$0xff]  ;;  %v479_v28 = vld [vmem:[%s6919_s0 + $0x50] sm:$0xff]  ;;  %v480_v30 = vld [vmem:[%s6919_s0 + $0x58] sm:$0xff] }
  0x28   : > { %552 = vxpose.xlu1.b32.cont [3/16] %v3943_v5, 128  ;;  %v3951_v29 = vld [vmem:[%s6919_s0 + $0xd0] sm:$0xff]  ;;  %v3952_v31 = vld [vmem:[%s6919_s0 + $0xd8] sm:$0xff]  ;;  %v481_v32 = vld [vmem:[%s6919_s0 + $0x60] sm:$0xff] }
  0x29   : > { %v3953_v33 = vld [vmem:[%s6919_s0 + $0xe0] sm:$0xff]  ;;  %v482_v34 = vld [vmem:[%s6919_s0 + $0x68] sm:$0xff]  ;;  %v483_v36 = vld [vmem:[%s6919_s0 + $0x70] sm:$0xff] }
  0x2a   : > { %4184 = vmatpush3.bf16.msra.mxu0 %v4538_v11  ;;  %v3954_v35 = vld [vmem:[%s6919_s0 + $0xe8] sm:$0xff]  ;;  %v3955_v37 = vld [vmem:[%s6919_s0 + $0xf0] sm:$0xff]  ;;  %v484_v38 = vld [vmem:[%s6919_s0 + $0x78] sm:$0xff] }
  0x2b   : > { %488 = vxpose.xlu0.b32.cont [4/16] %v472_v6, 128  ;;  %4185 = vmatprep.subr.bf16.mxu0 %v4539_v15  ;;  %v3956_v39 = vld [vmem:[%s6919_s0 + $0xf8] sm:$0xff] }
  0x2c   : > { %553 = vxpose.xlu1.b32.cont [4/16] %v3944_v7, 128 }
  0x2e   : > { %4186 = vmatpush3.bf16.msra.mxu0 %v4539_v15 }
  0x2f   : > { %489 = vxpose.xlu0.b32.cont [5/16] %v473_v10, 128  ;;  %4187 = vmatprep.subr.bf16.mxu0 %v4540_v17 }
  0x30   : > { %554 = vxpose.xlu1.b32.cont [5/16] %v3945_v12, 128 }
  0x32   : > { %4188 = vmatpush3.bf16.msra.mxu0 %v4540_v17 }
  0x33   : > { %490 = vxpose.xlu0.b32.cont [6/16] %v474_v13, 128  ;;  %4189 = vmatprep.subr.bf16.mxu0 %v4541_v20 }
  0x34   : > { %555 = vxpose.xlu1.b32.cont [6/16] %v3946_v14, 128 }
  0x36   : > { %4190 = vmatpush3.bf16.msra.mxu0 %v4541_v20 }
  0x37   : > { %491 = vxpose.xlu0.b32.cont [7/16] %v475_v16, 128  ;;  %4191 = vmatprep.subr.bf16.mxu0 %v4542_v23 }
  0x38   : > { %556 = vxpose.xlu1.b32.cont [7/16] %v3947_v18, 128 }
  0x3a   : > { %4192 = vmatpush3.bf16.msra.mxu0 %v4542_v23 }
  0x3b   : > { %492 = vxpose.xlu0.b32.cont [8/16] %v476_v19, 128  ;;  %4193 = vmatprep.subr.bf16.mxu0 %v4543_v26 }
  0x3c   : > { %557 = vxpose.xlu1.b32.cont [8/16] %v3948_v21, 128 }
  0x3e   : > { %4194 = vmatpush3.bf16.msra.mxu0 %v4543_v26 }
  0x3f   : > { %493 = vxpose.xlu0.b32.cont [9/16] %v477_v22, 128 }
  0x40   : > { %558 = vxpose.xlu1.b32.cont [9/16] %v3949_v24, 128 }
  0x43   : > { %494 = vxpose.xlu0.b32.cont [10/16] %v478_v25, 128 }
  0x44   : > { %559 = vxpose.xlu1.b32.cont [10/16] %v3950_v27, 128 }
  0x47   : > { %495 = vxpose.xlu0.b32.cont [11/16] %v479_v28, 128 }
  0x48   : > { %560 = vxpose.xlu1.b32.cont [11/16] %v3951_v29, 128 }
  0x4b   : > { %496 = vxpose.xlu0.b32.cont [12/16] %v480_v30, 128 }
  0x4c   : > { %561 = vxpose.xlu1.b32.cont [12/16] %v3952_v31, 128 }
  0x4f   : > { %497 = vxpose.xlu0.b32.cont [13/16] %v481_v32, 128 }
  0x50   : > { %562 = vxpose.xlu1.b32.cont [13/16] %v3953_v33, 128 }
  0x53   : > { %498 = vxpose.xlu0.b32.cont [14/16] %v482_v34, 128 }
  0x54   : > { %563 = vxpose.xlu1.b32.cont [14/16] %v3954_v35, 128 }
  0x57   : > { %499 = vxpose.xlu0.b32.cont [15/16] %v483_v36, 128 }
  0x58   : > { %564 = vxpose.xlu1.b32.cont [15/16] %v3955_v37, 128 }
  0x5b   : > { %500 = vxpose.xlu0.b32.end [16/16] %v484_v38, 128 }
  0x5c   : > { %565 = vxpose.xlu1.b32.end [16/16] %v3956_v39, 128 }
  0x9f   : > { %v501_v40 = vpop.trf.xlu0 }
  0xa0   : > { %v566_v41 = vpop.trf.xlu1 }
  0xa3   : > { %v502_v42 = vpop.trf.xlu0 }
  0xa4   : > { %v630_v43 = vpack.c.bf16 %v502_v42, %v501_v40  ;;  %v567_v44 = vpop.trf.xlu1 }
  0xa5   : > { %v638_v15 = vpack.c.bf16 %v567_v44, %v566_v41 }
  0xa6   : > { %4195 = vmatprep.mubr.bf16.mxu0 %v630_v43 }
  0xa7   : > { %v503_v45 = vpop.trf.xlu0 }
  0xa8   : > { %v568_v46 = vpop.trf.xlu1 }
  0xab   : > { %v504_v47 = vpop.trf.xlu0 }
  0xac   : > { %v631_v48 = vpack.c.bf16 %v504_v47, %v503_v45  ;;  %v569_v49 = vpop.trf.xlu1 }
  0xad   : > { %v639_v17 = vpack.c.bf16 %v569_v49, %v568_v46 }
  0xae   : > { %4196 = vmatmul.mubr.bf16.vlgmr.msra.gmra.mrb[0].mxu0 %v631_v48 }
  0xaf   : > { %v505_v50 = vpop.trf.xlu0 }
  0xb0   : > { %v570_v51 = vpop.trf.xlu1 }
  0xb3   : > { %v506_v52 = vpop.trf.xlu0 }
  0xb4   : > { %v632_v53 = vpack.c.bf16 %v506_v52, %v505_v50  ;;  %v571_v54 = vpop.trf.xlu1 }
  0xb5   : > { %v640_v18 = vpack.c.bf16 %v571_v54, %v570_v51 }
  0xb6   : > { %4199 = vmatprep.mubr.bf16.mxu0 %v632_v53 }
  0xb7   : > { %v507_v55 = vpop.trf.xlu0 }
  0xb8   : > { %v572_v56 = vpop.trf.xlu1 }
  0xbb   : > { %v508_v57 = vpop.trf.xlu0 }
  0xbc   : > { %v633_v58 = vpack.c.bf16 %v508_v57, %v507_v55  ;;  %v573_v59 = vpop.trf.xlu1 }
  0xbd   : > { %v641_v19 = vpack.c.bf16 %v573_v59, %v572_v56 }
  0xbe   : > { %4200 = vmatmul.mubr.bf16.gmra.mrb[4].mxu0 %v633_v58 }
  0xbf   : > { %v509_v60 = vpop.trf.xlu0 }
  0xc0   : > { %v574_v61 = vpop.trf.xlu1 }
  0xc3   : > { %v510_v62 = vpop.trf.xlu0 }
  0xc4   : > { %v634_v63 = vpack.c.bf16 %v510_v62, %v509_v60  ;;  %v575_v0 = vpop.trf.xlu1 }
  0xc5   : > { %v642_v20 = vpack.c.bf16 %v575_v0, %v574_v61 }
  0xc6   : > { %4203 = vmatprep.mubr.bf16.mxu0 %v634_v63 }
  0xc7   : > { %v511_v1 = vpop.trf.xlu0 }
  0xc8   : > { %v576_v2 = vpop.trf.xlu1 }
  0xcb   : > { %v512_v3 = vpop.trf.xlu0 }
  0xcc   : > { %v635_v4 = vpack.c.bf16 %v512_v3, %v511_v1  ;;  %v577_v5 = vpop.trf.xlu1 }
  0xcd   : > { %v643_v21 = vpack.c.bf16 %v577_v5, %v576_v2 }
  0xce   : > { %4204 = vmatmul.mubr.bf16.gmra.mrb[8].mxu0 %v635_v4 }
  0xcf   : > { %v513_v6 = vpop.trf.xlu0 }
  0xd0   : > { %v578_v7 = vpop.trf.xlu1 }
  0xd3   : > { %v514_v8 = vpop.trf.xlu0 }
  0xd4   : > { %v636_v9 = vpack.c.bf16 %v514_v8, %v513_v6  ;;  %v579_v10 = vpop.trf.xlu1 }
  0xd5   : > { %v644_v22 = vpack.c.bf16 %v579_v10, %v578_v7 }
  0xd6   : > { %4207 = vmatprep.mubr.bf16.mxu0 %v636_v9  ;;  %v4544_v9 = vld [vmem:[%s6921_s2] sm:$0xff]  }
  0xd7   : > { %v515_v11 = vpop.trf.xlu0  ;;  %4227 = vmatprep.subr.bf16.mxu1 %v4544_v9 }
  0xd8   : > { %v580_v12 = vpop.trf.xlu1  ;;  %4228 = vmatpush3.bf16.msra.mxu1 %v4544_v9 }
  0xdb   : > { %v516_v13 = vpop.trf.xlu0 }
  0xdc   : > { %v637_v14 = vpack.c.bf16 %v516_v13, %v515_v11  ;;  %v581_v16 = vpop.trf.xlu1 }
  0xdd   : > { %v645_v23 = vpack.c.bf16 %v581_v16, %v580_v12 }
  0xde   : > { %4208 = vmatmul.mubr.bf16.gmra.mrb[12].mxu0 %v637_v14  ;;  %v4545_v14 = vld [vmem:[%s6921_s2 + $0x8] sm:$0xff]  }
  0xdf   : > { %4211 = vmatprep.mubr.bf16.mxu0 %v638_v15  ;;  %4229 = vmatprep.subr.bf16.mxu1 %v4545_v14 }
  0xe0   : > { %4230 = vmatpush3.bf16.msra.mxu1 %v4545_v14 }
  0xe6   : > { %4212 = vmatmul.mubr.bf16.gmra.mrb[16].mxu0 %v639_v17 }
  0xe7   : > { %4215 = vmatprep.mubr.bf16.mxu0 %v640_v18 }
  0xee   : > { %4216 = vmatmul.mubr.bf16.gmra.mrb[20].mxu0 %v641_v19  ;;  %v4546_v19 = vld [vmem:[%s6921_s2 + $0x10] sm:$0xff]  }
  0xef   : > { %4219 = vmatprep.mubr.bf16.mxu0 %v642_v20  ;;  %4231 = vmatprep.subr.bf16.mxu1 %v4546_v19 }
  0xf0   : > { %4232 = vmatpush3.bf16.msra.mxu1 %v4546_v19 }
  0xf6   : > { %4220 = vmatmul.mubr.bf16.gmra.mrb[24].mxu0 %v643_v21 }
  0xf7   : > { %4223 = vmatprep.mubr.bf16.mxu0 %v644_v22 }
  0xfe   : > { %4224 = vmatmul.mubr.bf16.gmra.mrb[28].mxu0 %v645_v23 }
 0x181   : > { %v5034_v24 = vpop.f32.mrb[0].mxu0 }
 0x182   : > { %v5036_v25 = vpop.f32.mrb[1].mxu0 }
 0x183   : > { %v5038_v26 = vpop.f32.mrb[2].mxu0 }
 0x184   : > { %v5040_v27 = vpop.f32.mrb[3].mxu0 }
 0x185   : > { %v873_v28 = vadd.f32 %v5040_v27, %v5036_v25 }
 0x187   : > { %v874_v29 = vadd.f32 %v5034_v24, %v873_v28  ;;  %v4547_v28 = vld [vmem:[%s6921_s2 + $0x18] sm:$0xff]  }
 0x188   : > { %4233 = vmatprep.subr.bf16.mxu1 %v4547_v28 }
 0x189   : > { %v875_v30 = vadd.f32 %v5038_v26, %v874_v29  ;;  %4234 = vmatpush3.bf16.msra.mxu1 %v4547_v28 }
 0x191   : > { %v5046_v31 = vpop.f32.mrb[4].mxu0 }
 0x192   : > { %v5048_v32 = vpop.f32.mrb[5].mxu0 }
 0x193   : > { %v876_v33 = vadd.f32 %v875_v30, %v5048_v32  ;;  %v5051_v34 = vpop.f32.mrb[6].mxu0 }
 0x194   : > { %v5053_v35 = vpop.f32.mrb[7].mxu0 }
 0x195   : > { %v877_v36 = vadd.f32 %v876_v33, %v5053_v35  ;;  %v4548_v33 = vld [vmem:[%s6921_s2 + $0x20] sm:$0xff]  }
 0x196   : > { %4235 = vmatprep.subr.bf16.mxu1 %v4548_v33 }
 0x197   : > { %v878_v37 = vadd.f32 %v5046_v31, %v877_v36  ;;  %4236 = vmatpush3.bf16.msra.mxu1 %v4548_v33 }
 0x199   : > { %v879_v38 = vadd.f32 %v5051_v34, %v878_v37 }
 0x1a1   : > { %v5058_v39 = vpop.f32.mrb[8].mxu0 }
 0x1a2   : > { %v5060_v40 = vpop.f32.mrb[9].mxu0 }
 0x1a3   : > { %v880_v41 = vadd.f32 %v879_v38, %v5060_v40  ;;  %v5063_v42 = vpop.f32.mrb[10].mxu0  ;;  %v4549_v38 = vld [vmem:[%s6921_s2 + $0x28] sm:$0xff]  }
 0x1a4   : > { %v5065_v43 = vpop.f32.mrb[11].mxu0  ;;  %4237 = vmatprep.subr.bf16.mxu1 %v4549_v38 }
 0x1a5   : > { %v881_v44 = vadd.f32 %v880_v41, %v5065_v43  ;;  %4238 = vmatpush3.bf16.msra.mxu1 %v4549_v38 }
 0x1a7   : > { %v882_v45 = vadd.f32 %v5058_v39, %v881_v44 }
 0x1a9   : > { %v883_v46 = vadd.f32 %v5063_v42, %v882_v45  ;;  %v4550_v45 = vld [vmem:[%s6921_s2 + $0x30] sm:$0xff]  }
 0x1aa   : > { %4239 = vmatprep.subr.bf16.mxu1 %v4550_v45 }
 0x1ab   : > { %4240 = vmatpush3.bf16.msra.mxu1 %v4550_v45 }
 0x1b1   : > { %v5070_v47 = vpop.f32.mrb[12].mxu0 }
 0x1b2   : > { %v5072_v48 = vpop.f32.mrb[13].mxu0 }
 0x1b3   : > { %v884_v49 = vadd.f32 %v883_v46, %v5072_v48  ;;  %v5075_v50 = vpop.f32.mrb[14].mxu0 }
 0x1b4   : > { %v5077_v51 = vpop.f32.mrb[15].mxu0 }
 0x1b5   : > { %v885_v52 = vadd.f32 %v884_v49, %v5077_v51 }
 0x1b7   : > { %v886_v53 = vadd.f32 %v5070_v47, %v885_v52  ;;  %v4551_v52 = vld [vmem:[%s6921_s2 + $0x38] sm:$0xff]  }
 0x1b8   : > { %4241 = vmatprep.subr.bf16.mxu1 %v4551_v52 }
 0x1b9   : > { %v5081_v54 = vpop.f32.mrb[16].mxu0  ;;  %v887_v55 = vadd.f32 %v5075_v50, %v886_v53  ;;  %4242 = vmatpush3.bf16.msra.mxu1 %v4551_v52 }
 0x1ba   : > { %v5084_v56 = vpop.f32.mrb[17].mxu0 }
 0x1bb   : > { %v888_v57 = vadd.f32 %v887_v55, %v5084_v56  ;;  %v5087_v58 = vpop.f32.mrb[18].mxu0 }
 0x1bc   : > { %v5089_v59 = vpop.f32.mrb[19].mxu0 }
 0x1bd   : > { %v889_v60 = vadd.f32 %v888_v57, %v5089_v59 }
 0x1bf   : > { %v890_v61 = vadd.f32 %v5081_v54, %v889_v60 }
 0x1c1   : > { %v5093_v62 = vpop.f32.mrb[20].mxu0  ;;  %v891_v63 = vadd.f32 %v5087_v58, %v890_v61 }
 0x1c2   : > { %v5096_v0 = vpop.f32.mrb[21].mxu0 }
 0x1c3   : > { %v892_v1 = vadd.f32 %v891_v63, %v5096_v0  ;;  %v5099_v2 = vpop.f32.mrb[22].mxu0 }
 0x1c4   : > { %v5101_v3 = vpop.f32.mrb[23].mxu0 }
 0x1c5   : > { %v893_v4 = vadd.f32 %v892_v1, %v5101_v3 }
 0x1c7   : > { %v894_v5 = vadd.f32 %v5093_v62, %v893_v4 }
 0x1c9   : > { %v5105_v6 = vpop.f32.mrb[24].mxu0  ;;  %v895_v7 = vadd.f32 %v5099_v2, %v894_v5 }
 0x1ca   : > { %v5108_v8 = vpop.f32.mrb[25].mxu0 }
 0x1cb   : > { %v896_v10 = vadd.f32 %v895_v7, %v5108_v8  ;;  %v5114_v11 = vpop.f32.mrb[26].mxu0 }
 0x1cc   : > { %v5116_v12 = vpop.f32.mrb[27].mxu0 }
 0x1cd   : > { %v897_v13 = vadd.f32 %v896_v10, %v5116_v12 }
 0x1cf   : > { %v898_v15 = vadd.f32 %v5105_v6, %v897_v13 }
 0x1d1   : > { %v5123_v16 = vpop.f32.mrb[28].mxu0  ;;  %v899_v17 = vadd.f32 %v5114_v11, %v898_v15 }
 0x1d2   : > { %v856_v18 = vpop.f32.mrb[29].mxu0 }
 0x1d3   : > { %v900_v20 = vadd.f32 %v899_v17, %v856_v18  ;;  %v4226_v21 = vpop.f32.mrb[30].mxu0 }
 0x1d4   : > { %v859_v22 = vpop.f32.mrb[31].mxu0 }
 0x1d5   : > { %v901_v23 = vadd.f32 %v900_v20, %v859_v22 }
 0x1d7   : > { %v902_v29 = vadd.f32 %v5123_v16, %v901_v23 }
 0x1d9   : > { %v903_v30 = vadd.f32 %v4226_v21, %v902_v29 }
 0x1db   : > { %v904_v36 = vrot.slane %v903_v30, 4 }
 0x1dd   : > { %v905_v37 = vadd.f32 %v904_v36, %v903_v30 }
 0x1df   : > { %v906_v41 = vrot.slane %v905_v37, 2 }
 0x1e1   : > { %v907_v44 = vadd.f32 %v906_v41, %v905_v37 }
 0x1e3   : > { %v908_v46 = vrot.slane %v907_v44, 1 }
 0x1e5   : > { %v909_v49 = vadd.f32 %v908_v46, %v907_v44 }
 0x1e7   : > { %v910_v53 = vmul.f32 0.00390625, %v909_v49 }
 0x1e9   : > { %v5146_v55 = vsub.f32 %v5036_v25, %v910_v53  ;;  %v5149_v57 = vsub.f32 %v5040_v27, %v910_v53  ;;  %v5152_v60 = vsub.f32 %v5034_v24, %v910_v53  ;;  %v5155_v61 = vsub.f32 %v5038_v26, %v910_v53 }
 0x1ea   : > { %v5158_v63 = vsub.f32 %v5048_v32, %v910_v53  ;;  %v5161_v1 = vsub.f32 %v5053_v35, %v910_v53  ;;  %v5164_v4 = vsub.f32 %v5046_v31, %v910_v53  ;;  %v5167_v25 = vsub.f32 %v5051_v34, %v910_v53 }
 0x1eb   : > { %v5170_v27 = vsub.f32 %v5060_v40, %v910_v53  ;;  %v5173_v24 = vsub.f32 %v5065_v43, %v910_v53  ;;  %v5176_v26 = vsub.f32 %v5058_v39, %v910_v53  ;;  %v5179_v32 = vsub.f32 %v5063_v42, %v910_v53 }
 0x1ec   : > { %v5182_v35 = vsub.f32 %v5072_v48, %v910_v53  ;;  %v5185_v31 = vsub.f32 %v5077_v51, %v910_v53  ;;  %v5188_v34 = vsub.f32 %v5070_v47, %v910_v53  ;;  %v5191_v40 = vsub.f32 %v5075_v50, %v910_v53 }
 0x1ed   : > { %v5194_v43 = vsub.f32 %v5084_v56, %v910_v53  ;;  %v5197_v39 = vsub.f32 %v5089_v59, %v910_v53  ;;  %v5200_v42 = vsub.f32 %v5081_v54, %v910_v53  ;;  %v5203_v48 = vsub.f32 %v5087_v58, %v910_v53 }
 0x1ee   : > { %v5206_v51 = vsub.f32 %v5096_v0, %v910_v53  ;;  %v5209_v47 = vsub.f32 %v5101_v3, %v910_v53  ;;  %v5212_v50 = vsub.f32 %v5093_v62, %v910_v53  ;;  %v5215_v56 = vsub.f32 %v5099_v2, %v910_v53 }
 0x1ef   : > { %v5218_v59 = vsub.f32 %v5108_v8, %v910_v53  ;;  %v5221_v54 = vsub.f32 %v5116_v12, %v910_v53  ;;  %v5224_v58 = vsub.f32 %v5105_v6, %v910_v53  ;;  %v5227_v0 = vsub.f32 %v5114_v11, %v910_v53 }
 0x1f0   : > { %v5229_v3 = vsub.f32 %v856_v18, %v910_v53  ;;  %v5231_v5 = vsub.f32 %v859_v22, %v910_v53  ;;  %v5234_v62 = vsub.f32 %v5123_v16, %v910_v53  ;;  %v5236_v2 = vsub.f32 %v4226_v21, %v910_v53 }
 0x1f1   : > { %v943_v7 = vmul.f32 %v5146_v55, %v5146_v55  ;;  %v944_v8 = vmul.f32 %v5149_v57, %v5149_v57  ;;  %v945_v6 = vmul.f32 %v5152_v60, %v5152_v60  ;;  %v946_v10 = vmul.f32 %v5155_v61, %v5155_v61 }
 0x1f2   : > { %v947_v12 = vmul.f32 %v5158_v63, %v5158_v63  ;;  %v948_v14 = vmul.f32 %v5161_v1, %v5161_v1  ;;  %v949_v16 = vmul.f32 %v5164_v4, %v5164_v4  ;;  %v950_v18 = vmul.f32 %v5167_v25, %v5167_v25 }
 0x1f3   : > { %v975_v9 = vadd.f32 %v944_v8, %v943_v7  ;;  %v951_v20 = vmul.f32 %v5170_v27, %v5170_v27  ;;  %v952_v22 = vmul.f32 %v5173_v24, %v5173_v24  ;;  %v953_v28 = vmul.f32 %v5176_v26, %v5176_v26 }
 0x1f4   : > { %v954_v30 = vmul.f32 %v5179_v32, %v5179_v32  ;;  %v955_v36 = vmul.f32 %v5182_v35, %v5182_v35  ;;  %v956_v38 = vmul.f32 %v5185_v31, %v5185_v31  ;;  %v957_v44 = vmul.f32 %v5188_v34, %v5188_v34 }
 0x1f5   : > { %v976_v11 = vadd.f32 %v975_v9, %v945_v6  ;;  %v958_v46 = vmul.f32 %v5191_v40, %v5191_v40  ;;  %v959_v52 = vmul.f32 %v5194_v43, %v5194_v43  ;;  %v960_v7 = vmul.f32 %v5197_v39, %v5197_v39 }
 0x1f6   : > { %v961_v6 = vmul.f32 %v5200_v42, %v5200_v42 }
 0x1f7   : > { %v977_v13 = vadd.f32 %v976_v11, %v946_v10  ;;  %v962_v10 = vmul.f32 %v5203_v48, %v5203_v48 }
 0x1f9   : > { %v978_v15 = vadd.f32 %v977_v13, %v947_v12  ;;  %v963_v12 = vmul.f32 %v5206_v51, %v5206_v51 }
 0x1fb   : > { %v979_v17 = vadd.f32 %v978_v15, %v948_v14  ;;  %v964_v14 = vmul.f32 %v5209_v47, %v5209_v47 }
 0x1fd   : > { %v980_v19 = vadd.f32 %v979_v17, %v949_v16  ;;  %v965_v16 = vmul.f32 %v5212_v50, %v5212_v50 }
 0x1ff   : > { %v981_v21 = vadd.f32 %v980_v19, %v950_v18  ;;  %v966_v18 = vmul.f32 %v5215_v56, %v5215_v56 }
 0x201   : > { %v982_v23 = vadd.f32 %v981_v21, %v951_v20  ;;  %v967_v20 = vmul.f32 %v5218_v59, %v5218_v59 }
 0x203   : > { %v983_v29 = vadd.f32 %v982_v23, %v952_v22  ;;  %v968_v22 = vmul.f32 %v5221_v54, %v5221_v54 }
 0x205   : > { %v984_v33 = vadd.f32 %v983_v29, %v953_v28  ;;  %v969_v28 = vmul.f32 %v5224_v58, %v5224_v58 }
 0x207   : > { %v985_v37 = vadd.f32 %v984_v33, %v954_v30  ;;  %v970_v30 = vmul.f32 %v5227_v0, %v5227_v0 }
 0x209   : > { %v986_v41 = vadd.f32 %v985_v37, %v955_v36  ;;  %v971_v36 = vmul.f32 %v5229_v3, %v5229_v3 }
 0x20b   : > { %v987_v45 = vadd.f32 %v986_v41, %v956_v38  ;;  %v972_v38 = vmul.f32 %v5231_v5, %v5231_v5 }
 0x20d   : > { %v988_v49 = vadd.f32 %v987_v45, %v957_v44  ;;  %v973_v44 = vmul.f32 %v5234_v62, %v5234_v62 }
 0x20f   : > { %v989_v53 = vadd.f32 %v988_v49, %v958_v46  ;;  %v974_v46 = vmul.f32 %v5236_v2, %v5236_v2 }
 0x211   : > { %v990_v8 = vadd.f32 %v989_v53, %v959_v52 }
 0x213   : > { %v991_v9 = vadd.f32 %v990_v8, %v960_v7 }
 0x215   : > { %v992_v11 = vadd.f32 %v991_v9, %v961_v6 }
 0x217   : > { %v993_v13 = vadd.f32 %v992_v11, %v962_v10 }
 0x219   : > { %v994_v15 = vadd.f32 %v993_v13, %v963_v12  ;;  %v1017_v13 = vlaneseq }
 0x21b   : > { %v995_v17 = vadd.f32 %v994_v15, %v964_v14  ;;  %v5302_v14 = vshrl.u32 %v1017_v13, 7 }
 0x21d   : > { %v996_v19 = vadd.f32 %v995_v17, %v965_v16  ;;  %v871_v16 = vld [vmem:[%s6922_s3] sm:$0x1] }
 0x21f   : > { %v997_v21 = vadd.f32 %v996_v19, %v966_v18  ;;  %v1019_v18 = vsub.s32 0, %v5302_v14 }
 0x221   : > { %v998_v23 = vadd.f32 %v997_v21, %v967_v20 }
 0x223   : > { %v999_v29 = vadd.f32 %v998_v23, %v968_v22  ;;  %v5319_v22 = vld [vmem:[%s6923_s4] ss:$0 sm:$0xff] }
 0x225   : > { %v1000_v33 = vadd.f32 %v999_v29, %v969_v28 }
 0x227   : > { %v1001_v37 = vadd.f32 %v1000_v33, %v970_v30 }
 0x229   : > { %v1002_v41 = vadd.f32 %v1001_v37, %v971_v36 }
 0x22b   : > { %v1003_v45 = vadd.f32 %v1002_v41, %v972_v38 }
 0x22d   : > { %v1004_v49 = vadd.f32 %v1003_v45, %v973_v44 }
 0x22f   : > { %v1005_v52 = vadd.f32 %v1004_v49, %v974_v46 }
 0x231   : > { %v1006_v53 = vrot.slane %v1005_v52, 4 }
 0x233   : > { %v1007_v7 = vadd.f32 %v1006_v53, %v1005_v52 }
 0x235   : > { %v1008_v8 = vrot.slane %v1007_v7, 2 }
 0x237   : > { %v1009_v6 = vadd.f32 %v1008_v8, %v1007_v7 }
 0x239   : > { %v1010_v9 = vrot.slane %v1009_v6, 1 }
 0x23b   : > { %v1011_v10 = vadd.f32 %v1010_v9, %v1009_v6 }
 0x23d   : > { %v1012_v11 = vmul.f32 0.00390625, %v1011_v10 }
 0x23f   : > { %v1013_v12 = vadd.f32 1e-05, %v1012_v11 }
 0x241   : > { %4552 = vrsqrt.f32 %v1013_v12 }
 0x24b   : > { %v4553_v15 = vpop.eup %4552 }
 0x24c   : > { %v1015_v17 = vmul.f32 %v4553_v15, %v871_v16 }
 0x24e   : > { %v5310_v19 = vrot.slane %v1015_v17, %v1019_v18 }
 0x250   : > { %v1024_v20 = vmul.f32 %v5310_v19, %v5152_v60  ;;  %v1025_v21 = vmul.f32 %v5310_v19, %v5155_v61  ;;  %v1026_v23 = vmul.f32 %v5310_v19, %v5158_v63  ;;  %v1027_v28 = vmul.f32 %v5310_v19, %v5161_v1 }
 0x251   : > { %v1022_v29 = vmul.f32 %v5310_v19, %v5146_v55  ;;  %v1023_v60 = vmul.f32 %v5310_v19, %v5149_v57  ;;  %v1028_v55 = vmul.f32 %v5310_v19, %v5164_v4  ;;  %v1029_v57 = vmul.f32 %v5310_v19, %v5167_v25 }
 0x252   : > { %v1062_v30 = vadd.f32 %v5319_v22, %v1024_v20  ;;  %v1063_v61 = vadd.f32 %v5319_v22, %v1025_v21  ;;  %v1064_v33 = vadd.f32 %v5319_v22, %v1026_v23  ;;  %v1065_v36 = vadd.f32 %v5319_v22, %v1027_v28 }
 0x253   : > { %v1060_v37 = vadd.f32 %v5319_v22, %v1022_v29  ;;  %v1061_v63 = vadd.f32 %v5319_v22, %v1023_v60  ;;  %v1030_v41 = vmul.f32 %v5310_v19, %v5170_v27  ;;  %v1031_v45 = vmul.f32 %v5310_v19, %v5173_v24 }
 0x254   : > { %v1094_v38 = vmax.f32 %v1062_v30, 0.0  ;;  %v1095_v1 = vmax.f32 %v1063_v61, 0.0  ;;  %v1096_v49 = vmax.f32 %v1064_v33, 0.0  ;;  %v1097_v52 = vmax.f32 %v1065_v36, 0.0 }
 0x255   : > { %v1092_v44 = vmax.f32 %v1060_v37, 0.0  ;;  %v1093_v46 = vmax.f32 %v1061_v63, 0.0  ;;  %v1066_v8 = vadd.f32 %v5319_v22, %v1028_v55  ;;  %v1067_v6 = vadd.f32 %v5319_v22, %v1029_v57 }
 0x256   : > { %v1125_v53 = vpack.c.bf16 %v1095_v1, %v1094_v38  ;;  %v1068_v4 = vadd.f32 %v5319_v22, %v1030_v41  ;;  %v1069_v25 = vadd.f32 %v5319_v22, %v1031_v45  ;;  %v1126_v9 = vpack.c.bf16 %v1097_v52, %v1096_v49 }
 0x257   : > { %v1124_v7 = vpack.c.bf16 %v1093_v46, %v1092_v44  ;;  %v1032_v27 = vmul.f32 %v5310_v19, %v5176_v26  ;;  %v1033_v24 = vmul.f32 %v5310_v19, %v5179_v32  ;;  %v1098_v10 = vmax.f32 %v1066_v8, 0.0 }
 0x258   : > { %v1099_v11 = vmax.f32 %v1067_v6, 0.0  ;;  %v1034_v12 = vmul.f32 %v5310_v19, %v5182_v35  ;;  %v1035_v13 = vmul.f32 %v5310_v19, %v5185_v31  ;;  %v1100_v15 = vmax.f32 %v1068_v4, 0.0 }
 0x259   : > { %4243 = vmatprep.mubr.bf16.mxu1 %v1124_v7  ;;  %v1101_v16 = vmax.f32 %v1069_v25, 0.0  ;;  %v1070_v17 = vadd.f32 %v5319_v22, %v1032_v27  ;;  %v1071_v20 = vadd.f32 %v5319_v22, %v1033_v24  ;;  %v1036_v35 = vmul.f32 %v5310_v19, %v5188_v34 }
 0x25a   : > { %4244 = vmatmul.mubr.bf16.vlgmr.msra.gmra.mrb[0].mxu1 %v1125_v53  ;;  %v1127_v21 = vpack.c.bf16 %v1099_v11, %v1098_v10  ;;  %v1072_v26 = vadd.f32 %v5319_v22, %v1034_v12  ;;  %v1073_v23 = vadd.f32 %v5319_v22, %v1035_v13  ;;  %v1037_v31 = vmul.f32 %v5310_v19, %v5191_v40 }
 0x25b   : > { %4247 = vmatprep.mubr.bf16.mxu1 %v1126_v9  ;;  %v1128_v32 = vpack.c.bf16 %v1101_v16, %v1100_v15  ;;  %v1102_v28 = vmax.f32 %v1070_v17, 0.0  ;;  %v1103_v29 = vmax.f32 %v1071_v20, 0.0  ;;  %v1038_v60 = vmul.f32 %v5310_v19, %v5194_v43 }
 0x25c   : > { %v1039_v30 = vmul.f32 %v5310_v19, %v5197_v39  ;;  %v1104_v61 = vmax.f32 %v1072_v26, 0.0  ;;  %v1105_v33 = vmax.f32 %v1073_v23, 0.0  ;;  %v1074_v36 = vadd.f32 %v5319_v22, %v1036_v35 }
 0x25d   : > { %v1075_v37 = vadd.f32 %v5319_v22, %v1037_v31  ;;  %v1129_v63 = vpack.c.bf16 %v1103_v29, %v1102_v28  ;;  %v1076_v34 = vadd.f32 %v5319_v22, %v1038_v60  ;;  %v1040_v43 = vmul.f32 %v5310_v19, %v5200_v42 }
 0x25e   : > { %v1077_v38 = vadd.f32 %v5319_v22, %v1039_v30  ;;  %v1130_v40 = vpack.c.bf16 %v1105_v33, %v1104_v61  ;;  %v1041_v39 = vmul.f32 %v5310_v19, %v5203_v48  ;;  %v1106_v1 = vmax.f32 %v1074_v36, 0.0 }
 0x25f   : > { %v1107_v55 = vmax.f32 %v1075_v37, 0.0  ;;  %v1042_v57 = vmul.f32 %v5310_v19, %v5206_v51  ;;  %v1043_v41 = vmul.f32 %v5310_v19, %v5209_v47  ;;  %v1108_v44 = vmax.f32 %v1076_v34, 0.0 }
 0x260   : > { %v1109_v45 = vmax.f32 %v1077_v38, 0.0  ;;  %v1078_v46 = vadd.f32 %v5319_v22, %v1040_v43  ;;  %v1079_v49 = vadd.f32 %v5319_v22, %v1041_v39  ;;  %v1044_v51 = vmul.f32 %v5310_v19, %v5212_v50 }
 0x261   : > { %v1131_v52 = vpack.c.bf16 %v1107_v55, %v1106_v1  ;;  %v1080_v42 = vadd.f32 %v5319_v22, %v1042_v57  ;;  %v1081_v53 = vadd.f32 %v5319_v22, %v1043_v41  ;;  %v1045_v47 = vmul.f32 %v5310_v19, %v5215_v56 }
 0x262   : > { %4248 = vmatmul.mubr.bf16.gmra.mrb[4].mxu1 %v1127_v21  ;;  %v1132_v48 = vpack.c.bf16 %v1109_v45, %v1108_v44  ;;  %v1110_v7 = vmax.f32 %v1078_v46, 0.0  ;;  %v1111_v8 = vmax.f32 %v1079_v49, 0.0  ;;  %v1046_v6 = vmul.f32 %v5310_v19, %v5218_v59 }
 0x263   : > { %4251 = vmatprep.mubr.bf16.mxu1 %v1128_v32  ;;  %v1047_v4 = vmul.f32 %v5310_v19, %v5221_v54  ;;  %v1112_v25 = vmax.f32 %v1080_v42, 0.0  ;;  %v1113_v9 = vmax.f32 %v1081_v53, 0.0  ;;  %v1082_v27 = vadd.f32 %v5319_v22, %v1044_v51 }
 0x264   : > { %v1083_v24 = vadd.f32 %v5319_v22, %v1045_v47  ;;  %v1133_v10 = vpack.c.bf16 %v1111_v8, %v1110_v7  ;;  %v1084_v50 = vadd.f32 %v5319_v22, %v1046_v6  ;;  %v1048_v59 = vmul.f32 %v5310_v19, %v5224_v58 }
 0x265   : > { %v1085_v11 = vadd.f32 %v5319_v22, %v1047_v4  ;;  %v1134_v56 = vpack.c.bf16 %v1113_v9, %v1112_v25  ;;  %v1049_v54 = vmul.f32 %v5310_v19, %v5227_v0  ;;  %v1114_v12 = vmax.f32 %v1082_v27, 0.0 }
 0x266   : > { %v1115_v13 = vmax.f32 %v1083_v24, 0.0  ;;  %v1051_v15 = vmul.f32 %v5310_v19, %v5231_v5  ;;  %v1050_v16 = vmul.f32 %v5310_v19, %v5229_v3  ;;  %v1116_v17 = vmax.f32 %v1084_v50, 0.0 }
 0x267   : > { %v1117_v20 = vmax.f32 %v1085_v11, 0.0  ;;  %v1086_v21 = vadd.f32 %v5319_v22, %v1048_v59  ;;  %v1087_v26 = vadd.f32 %v5319_v22, %v1049_v54  ;;  %v1052_v5 = vmul.f32 %v5310_v19, %v5234_v62 }
 0x268   : > { %v1135_v23 = vpack.c.bf16 %v1115_v13, %v1114_v12  ;;  %v1089_v58 = vadd.f32 %v5319_v22, %v1051_v15  ;;  %v1088_v32 = vadd.f32 %v5319_v22, %v1050_v16  ;;  %v1053_v3 = vmul.f32 %v5310_v19, %v5236_v2 }
 0x269   : > { %v1136_v0 = vpack.c.bf16 %v1117_v20, %v1116_v17  ;;  %v1118_v35 = vmax.f32 %v1086_v21, 0.0  ;;  %v1119_v31 = vmax.f32 %v1087_v26, 0.0  ;;  %v1090_v60 = vadd.f32 %v5319_v22, %v1052_v5 }
 0x26a   : > { %4252 = vmatmul.mubr.bf16.gmra.mrb[8].mxu1 %v1129_v63  ;;  %v1121_v28 = vmax.f32 %v1089_v58, 0.0  ;;  %v1120_v29 = vmax.f32 %v1088_v32, 0.0  ;;  %v1091_v30 = vadd.f32 %v5319_v22, %v1053_v3 }
 0x26b   : > { %4255 = vmatprep.mubr.bf16.mxu1 %v1130_v40  ;;  %v1137_v61 = vpack.c.bf16 %v1119_v31, %v1118_v35  ;;  %v1122_v36 = vmax.f32 %v1090_v60, 0.0 }
 0x26c   : > { %v1138_v33 = vpack.c.bf16 %v1121_v28, %v1120_v29  ;;  %v1123_v37 = vmax.f32 %v1091_v30, 0.0 }
 0x26e   : > { %v1139_v63 = vpack.c.bf16 %v1123_v37, %v1122_v36 }
 0x272   : > { %4256 = vmatmul.mubr.bf16.gmra.mrb[12].mxu1 %v1131_v52 }
 0x273   : > { %4259 = vmatprep.mubr.bf16.mxu1 %v1132_v48 }
 0x27a   : > { %4260 = vmatmul.mubr.bf16.gmra.mrb[16].mxu1 %v1133_v10 }
 0x27b   : > { %4263 = vmatprep.mubr.bf16.mxu1 %v1134_v56 }
 0x282   : > { %4264 = vmatmul.mubr.bf16.gmra.mrb[20].mxu1 %v1135_v23 }
 0x283   : > { %4267 = vmatprep.mubr.bf16.mxu1 %v1136_v0 }
 0x28a   : > { %4268 = vmatmul.mubr.bf16.gmra.mrb[24].mxu1 %v1137_v61 }
 0x28b   : > { %4271 = vmatprep.mubr.bf16.mxu1 %v1138_v33 }
 0x292   : > { %4272 = vmatmul.mubr.bf16.gmra.mrb[28].mxu1 %v1139_v63 }
 0x32d   : > { %v5413_v62 = vpop.f32.mrb[0].mxu1 }
 0x32e   : > { %v5415_v34 = vpop.f32.mrb[1].mxu1 }
 0x32f   : > { %v5417_v2 = vpop.f32.mrb[2].mxu1 }
 0x330   : > { %v5419_v19 = vpop.f32.mrb[3].mxu1 }
 0x331   : > { %v1369_v38 = vadd.f32 %v5419_v19, %v5415_v34 }
 0x333   : > { %v1370_v22 = vadd.f32 %v5413_v62, %v1369_v38 }
 0x335   : > { %v5424_v40 = vpop.f32.mrb[4].mxu1  ;;  %v1371_v43 = vadd.f32 %v5417_v2, %v1370_v22 }
 0x336   : > { %v5427_v39 = vpop.f32.mrb[5].mxu1 }
 0x337   : > { %v1372_v1 = vadd.f32 %v1371_v43, %v5427_v39  ;;  %v5430_v55 = vpop.f32.mrb[6].mxu1 }
 0x338   : > { %v5432_v57 = vpop.f32.mrb[7].mxu1 }
 0x339   : > { %v1373_v41 = vadd.f32 %v1372_v1, %v5432_v57 }
 0x33b   : > { %v1374_v44 = vadd.f32 %v5424_v40, %v1373_v41 }
 0x33d   : > { %v5436_v45 = vpop.f32.mrb[8].mxu1  ;;  %v1375_v46 = vadd.f32 %v5430_v55, %v1374_v44 }
 0x33e   : > { %v1270_v49 = vpop.f32.mrb[9].mxu1 }
 0x33f   : > { %v1376_v52 = vadd.f32 %v1375_v46, %v1270_v49  ;;  %v5439_v42 = vpop.f32.mrb[10].mxu1 }
 0x340   : > { %v1273_v53 = vpop.f32.mrb[11].mxu1 }
 0x341   : > { %v1377_v48 = vadd.f32 %v1376_v52, %v1273_v53 }
 0x343   : > { %v1378_v51 = vadd.f32 %v5436_v45, %v1377_v48 }
 0x345   : > { %v4257_v47 = vpop.f32.mrb[12].mxu1  ;;  %v1379_v7 = vadd.f32 %v5439_v42, %v1378_v51 }
 0x346   : > { %v1286_v8 = vpop.f32.mrb[13].mxu1 }
 0x347   : > { %v1380_v6 = vadd.f32 %v1379_v7, %v1286_v8  ;;  %v4258_v4 = vpop.f32.mrb[14].mxu1 }
 0x348   : > { %v1289_v25 = vpop.f32.mrb[15].mxu1 }
 0x349   : > { %v1381_v9 = vadd.f32 %v1380_v6, %v1289_v25 }
 0x34b   : > { %v1382_v27 = vadd.f32 %v4257_v47, %v1381_v9 }
 0x34d   : > { %v4261_v24 = vpop.f32.mrb[16].mxu1  ;;  %v1383_v10 = vadd.f32 %v4258_v4, %v1382_v27 }
 0x34e   : > { %v1302_v50 = vpop.f32.mrb[17].mxu1 }
 0x34f   : > { %v1384_v11 = vadd.f32 %v1383_v10, %v1302_v50  ;;  %v4262_v56 = vpop.f32.mrb[18].mxu1 }
 0x350   : > { %v1305_v59 = vpop.f32.mrb[19].mxu1 }
 0x351   : > { %v1385_v54 = vadd.f32 %v1384_v11, %v1305_v59 }
 0x353   : > { %v1386_v12 = vadd.f32 %v4261_v24, %v1385_v54 }
 0x355   : > { %v4265_v13 = vpop.f32.mrb[20].mxu1  ;;  %v1387_v15 = vadd.f32 %v4262_v56, %v1386_v12 }
 0x356   : > { %v1318_v16 = vpop.f32.mrb[21].mxu1 }
 0x357   : > { %v1388_v17 = vadd.f32 %v1387_v15, %v1318_v16  ;;  %v4266_v20 = vpop.f32.mrb[22].mxu1 }
 0x358   : > { %v1321_v21 = vpop.f32.mrb[23].mxu1 }
 0x359   : > { %v1389_v26 = vadd.f32 %v1388_v17, %v1321_v21 }
 0x35b   : > { %v1390_v23 = vadd.f32 %v4265_v13, %v1389_v26 }
 0x35d   : > { %v4269_v58 = vpop.f32.mrb[24].mxu1  ;;  %v1391_v32 = vadd.f32 %v4266_v20, %v1390_v23 }
 0x35e   : > { %v1334_v0 = vpop.f32.mrb[25].mxu1 }
 0x35f   : > { %v1392_v5 = vadd.f32 %v1391_v32, %v1334_v0  ;;  %v4270_v3 = vpop.f32.mrb[26].mxu1 }
 0x360   : > { %v1337_v35 = vpop.f32.mrb[27].mxu1 }
 0x361   : > { %v1393_v31 = vadd.f32 %v1392_v5, %v1337_v35 }
 0x363   : > { %v1394_v28 = vadd.f32 %v4269_v58, %v1393_v31 }
 0x365   : > { %v4273_v29 = vpop.f32.mrb[28].mxu1  ;;  %v1395_v60 = vadd.f32 %v4270_v3, %v1394_v28 }
 0x366   : > { %v1350_v30 = vpop.f32.mrb[29].mxu1 }
 0x367   : > { %v1396_v61 = vadd.f32 %v1395_v60, %v1350_v30  ;;  %v4274_v33 = vpop.f32.mrb[30].mxu1 }
 0x368   : > { %v1353_v36 = vpop.f32.mrb[31].mxu1 }
 0x369   : > { %v1397_v37 = vadd.f32 %v1396_v61, %v1353_v36 }
 0x36b   : > { %v1398_v63 = vadd.f32 %v4273_v29, %v1397_v37 }
 0x36d   : > { %v1399_v38 = vadd.f32 %v4274_v33, %v1398_v63 }
 0x36f   : > { %v1400_v22 = vrot.slane %v1399_v38, 4 }
 0x371   : > { %v1401_v43 = vadd.f32 %v1400_v22, %v1399_v38 }
 0x373   : > { %v1402_v1 = vrot.slane %v1401_v43, 2 }
 0x375   : > { %v1403_v41 = vadd.f32 %v1402_v1, %v1401_v43 }
 0x377   : > { %v1404_v44 = vrot.slane %v1403_v41, 1 }
 0x379   : > { %v1405_v46 = vadd.f32 %v1404_v44, %v1403_v41 }
 0x37b   : > { %v1406_v52 = vmul.f32 0.00390625, %v1405_v46 }
 0x37d   : > { %v5444_v48 = vsub.f32 %v5415_v34, %v1406_v52  ;;  %v5447_v51 = vsub.f32 %v5419_v19, %v1406_v52  ;;  %v5450_v7 = vsub.f32 %v5413_v62, %v1406_v52  ;;  %v5453_v6 = vsub.f32 %v5417_v2, %v1406_v52 }
 0x37e   : > { %v5456_v9 = vsub.f32 %v5427_v39, %v1406_v52  ;;  %v5459_v27 = vsub.f32 %v5432_v57, %v1406_v52  ;;  %v5462_v10 = vsub.f32 %v5424_v40, %v1406_v52  ;;  %v5465_v34 = vsub.f32 %v5430_v55, %v1406_v52 }
 0x37f   : > { %v5467_v19 = vsub.f32 %v1270_v49, %v1406_v52  ;;  %v5469_v11 = vsub.f32 %v1273_v53, %v1406_v52  ;;  %v5472_v62 = vsub.f32 %v5436_v45, %v1406_v52  ;;  %v5475_v2 = vsub.f32 %v5439_v42, %v1406_v52 }
 0x380   : > { %v5477_v39 = vsub.f32 %v1286_v8, %v1406_v52  ;;  %v5479_v57 = vsub.f32 %v1289_v25, %v1406_v52  ;;  %v5481_v54 = vsub.f32 %v4257_v47, %v1406_v52  ;;  %v5483_v40 = vsub.f32 %v4258_v4, %v1406_v52 }
 0x381   : > { %v5485_v55 = vsub.f32 %v1302_v50, %v1406_v52  ;;  %v5487_v49 = vsub.f32 %v1305_v59, %v1406_v52  ;;  %v5489_v53 = vsub.f32 %v4261_v24, %v1406_v52  ;;  %v5491_v12 = vsub.f32 %v4262_v56, %v1406_v52 }
 0x382   : > { %v5493_v45 = vsub.f32 %v1318_v16, %v1406_v52  ;;  %v5495_v42 = vsub.f32 %v1321_v21, %v1406_v52  ;;  %v5497_v8 = vsub.f32 %v4265_v13, %v1406_v52  ;;  %v5499_v25 = vsub.f32 %v4266_v20, %v1406_v52 }
 0x383   : > { %v5501_v47 = vsub.f32 %v1334_v0, %v1406_v52  ;;  %v5503_v4 = vsub.f32 %v1337_v35, %v1406_v52  ;;  %v5505_v50 = vsub.f32 %v4269_v58, %v1406_v52  ;;  %v5507_v59 = vsub.f32 %v4270_v3, %v1406_v52 }
 0x384   : > { %v5509_v24 = vsub.f32 %v1350_v30, %v1406_v52  ;;  %v5511_v56 = vsub.f32 %v1353_v36, %v1406_v52  ;;  %v5513_v15 = vsub.f32 %v4273_v29, %v1406_v52  ;;  %v5515_v16 = vsub.f32 %v4274_v33, %v1406_v52 }
 0x385   : > { %v1439_v13 = vmul.f32 %v5444_v48, %v5444_v48  ;;  %v1440_v17 = vmul.f32 %v5447_v51, %v5447_v51  ;;  %v1441_v20 = vmul.f32 %v5450_v7, %v5450_v7  ;;  %v1442_v26 = vmul.f32 %v5453_v6, %v5453_v6 }
 0x386   : > { %v1443_v58 = vmul.f32 %v5456_v9, %v5456_v9  ;;  %v1444_v0 = vmul.f32 %v5459_v27, %v5459_v27  ;;  %v1445_v3 = vmul.f32 %v5462_v10, %v5462_v10  ;;  %v1446_v31 = vmul.f32 %v5465_v34, %v5465_v34 }
 0x387   : > { %v1471_v21 = vadd.f32 %v1440_v17, %v1439_v13  ;;  %v1447_v29 = vmul.f32 %v5467_v19, %v5467_v19  ;;  %v1448_v30 = vmul.f32 %v5469_v11, %v5469_v11  ;;  %v1449_v33 = vmul.f32 %v5472_v62, %v5472_v62 }
 0x388   : > { %v1450_v37 = vmul.f32 %v5475_v2, %v5475_v2  ;;  %v1451_v38 = vmul.f32 %v5477_v39, %v5477_v39  ;;  %v1452_v43 = vmul.f32 %v5479_v57, %v5479_v57  ;;  %v1453_v41 = vmul.f32 %v5481_v54, %v5481_v54 }
 0x389   : > { %v1472_v23 = vadd.f32 %v1471_v21, %v1441_v20  ;;  %v1454_v46 = vmul.f32 %v5483_v40, %v5483_v40  ;;  %v1455_v13 = vmul.f32 %v5485_v55, %v5485_v55  ;;  %v1456_v20 = vmul.f32 %v5487_v49, %v5487_v49 }
 0x38b   : > { %v1473_v32 = vadd.f32 %v1472_v23, %v1442_v26  ;;  %v1457_v26 = vmul.f32 %v5489_v53, %v5489_v53 }
 0x38d   : > { %v1474_v5 = vadd.f32 %v1473_v32, %v1443_v58  ;;  %v1458_v58 = vmul.f32 %v5491_v12, %v5491_v12 }
 0x38f   : > { %v1475_v35 = vadd.f32 %v1474_v5, %v1444_v0  ;;  %v1459_v0 = vmul.f32 %v5493_v45, %v5493_v45 }
 0x391   : > { %v1476_v28 = vadd.f32 %v1475_v35, %v1445_v3  ;;  %v1460_v3 = vmul.f32 %v5495_v42, %v5495_v42 }
 0x393   : > { %v1477_v60 = vadd.f32 %v1476_v28, %v1446_v31  ;;  %v1461_v31 = vmul.f32 %v5497_v8, %v5497_v8 }
 0x395   : > { %v1478_v61 = vadd.f32 %v1477_v60, %v1447_v29  ;;  %v1462_v29 = vmul.f32 %v5499_v25, %v5499_v25 }
 0x397   : > { %v1479_v36 = vadd.f32 %v1478_v61, %v1448_v30  ;;  %v1463_v30 = vmul.f32 %v5501_v47, %v5501_v47 }
 0x399   : > { %v1480_v63 = vadd.f32 %v1479_v36, %v1449_v33  ;;  %v1464_v33 = vmul.f32 %v5503_v4, %v5503_v4 }
 0x39b   : > { %v1481_v22 = vadd.f32 %v1480_v63, %v1450_v37  ;;  %v1465_v37 = vmul.f32 %v5505_v50, %v5505_v50 }
 0x39d   : > { %v1482_v1 = vadd.f32 %v1481_v22, %v1451_v38  ;;  %v1466_v38 = vmul.f32 %v5507_v59, %v5507_v59 }
 0x39f   : > { %v1483_v44 = vadd.f32 %v1482_v1, %v1452_v43  ;;  %v1467_v43 = vmul.f32 %v5509_v24, %v5509_v24 }
 0x3a1   : > { %v1484_v52 = vadd.f32 %v1483_v44, %v1453_v41  ;;  %v1468_v41 = vmul.f32 %v5511_v56, %v5511_v56 }
 0x3a3   : > { %v1485_v17 = vadd.f32 %v1484_v52, %v1454_v46  ;;  %v1469_v46 = vmul.f32 %v5513_v15, %v5513_v15 }
 0x3a5   : > { %v1486_v21 = vadd.f32 %v1485_v17, %v1455_v13  ;;  %v1470_v13 = vmul.f32 %v5515_v16, %v5515_v16 }
 0x3a7   : > { %v1487_v23 = vadd.f32 %v1486_v21, %v1456_v20 }
 0x3a9   : > { %v1488_v32 = vadd.f32 %v1487_v23, %v1457_v26 }
 0x3ab   : > { %v1489_v5 = vadd.f32 %v1488_v32, %v1458_v58 }
 0x3ad   : > { %v1490_v35 = vadd.f32 %v1489_v5, %v1459_v0 }
 0x3af   : > { %v1491_v28 = vadd.f32 %v1490_v35, %v1460_v3  ;;  %v3974_v35 = vld [vmem:[%s6922_s3 + $0x1] sm:$0x1] }
 0x3b1   : > { %v1492_v60 = vadd.f32 %v1491_v28, %v1461_v31 }
 0x3b3   : > { %v1493_v61 = vadd.f32 %v1492_v60, %v1462_v29 }
 0x3b5   : > { %v1494_v36 = vadd.f32 %v1493_v61, %v1463_v30 }
 0x3b7   : > { %v1495_v63 = vadd.f32 %v1494_v36, %v1464_v33 }
 0x3b9   : > { %v1496_v22 = vadd.f32 %v1495_v63, %v1465_v37 }
 0x3bb   : > { %v1497_v1 = vadd.f32 %v1496_v22, %v1466_v38 }
 0x3bd   : > { %v1498_v44 = vadd.f32 %v1497_v1, %v1467_v43 }
 0x3bf   : > { %v1499_v52 = vadd.f32 %v1498_v44, %v1468_v41 }
 0x3c1   : > { %v1500_v17 = vadd.f32 %v1499_v52, %v1469_v46 }
 0x3c3   : > { %v1501_v20 = vadd.f32 %v1500_v17, %v1470_v13 }
 0x3c5   : > { %v1502_v21 = vrot.slane %v1501_v20, 4 }
 0x3c7   : > { %v1503_v26 = vadd.f32 %v1502_v21, %v1501_v20 }
 0x3c9   : > { %v1504_v23 = vrot.slane %v1503_v26, 2 }
 0x3cb   : > { %v1505_v58 = vadd.f32 %v1504_v23, %v1503_v26 }
 0x3cd   : > { %v1506_v32 = vrot.slane %v1505_v58, 1 }
 0x3cf   : > { %v1507_v0 = vadd.f32 %v1506_v32, %v1505_v58 }
 0x3d1   : > { %v1508_v5 = vmul.f32 0.00390625, %v1507_v0 }
 0x3d3   : > { %v1509_v3 = vadd.f32 1e-05, %v1508_v5 }
 0x3d5   : > { %4554 = vrsqrt.f32 %v1509_v3 }
 0x3df   : > { %v4555_v31 = vpop.eup %4554 }
 0x3e0   : > { %v1511_v28 = vmul.f32 %v4555_v31, %v3974_v35 }
 0x3e2   : > { %v1516_v29 = vrot.slane %v1511_v28, %v1019_v18 }
 0x3e4   : > { %v1518_v60 = vmul.f32 %v1516_v29, %v5444_v48  ;;  %v1519_v30 = vmul.f32 %v1516_v29, %v5447_v51  ;;  %v1520_v61 = vmul.f32 %v1516_v29, %v5450_v7  ;;  %v1521_v33 = vmul.f32 %v1516_v29, %v5453_v6 }
 0x3e5   : > { %v1522_v36 = vmul.f32 %v1516_v29, %v5456_v9  ;;  %v1523_v37 = vmul.f32 %v1516_v29, %v5459_v27  ;;  %v1524_v63 = vmul.f32 %v1516_v29, %v5462_v10  ;;  %v1525_v38 = vmul.f32 %v1516_v29, %v5465_v34 }
 0x3e6   : > { %v1526_v22 = vmul.f32 %v1516_v29, %v5467_v19  ;;  %v1527_v14 = vmul.f32 %v1516_v29, %v5469_v11  ;;  %v1528_v18 = vmul.f32 %v1516_v29, %v5472_v62  ;;  %v1529_v48 = vmul.f32 %v1516_v29, %v5475_v2  ;;  %v3976_v11 = vld [vmem:[%s6923_s4 + $0x1] ss:$0 sm:$0xff] }
 0x3e7   : > { %v1530_v51 = vmul.f32 %v1516_v29, %v5477_v39  ;;  %v1531_v7 = vmul.f32 %v1516_v29, %v5479_v57  ;;  %v1532_v6 = vmul.f32 %v1516_v29, %v5481_v54  ;;  %v1533_v9 = vmul.f32 %v1516_v29, %v5483_v40 }
 0x3e8   : > { %v1534_v27 = vmul.f32 %v1516_v29, %v5485_v55  ;;  %v1535_v10 = vmul.f32 %v1516_v29, %v5487_v49  ;;  %v1536_v34 = vmul.f32 %v1516_v29, %v5489_v53  ;;  %v1537_v19 = vmul.f32 %v1516_v29, %v5491_v12 }
 0x3e9   : > { %v1538_v62 = vmul.f32 %v1516_v29, %v5493_v45  ;;  %v1539_v2 = vmul.f32 %v1516_v29, %v5495_v42  ;;  %v1540_v39 = vmul.f32 %v1516_v29, %v5497_v8  ;;  %v1541_v57 = vmul.f32 %v1516_v29, %v5499_v25 }
 0x3ea   : > { %v1542_v54 = vmul.f32 %v1516_v29, %v5501_v47  ;;  %v1543_v40 = vmul.f32 %v1516_v29, %v5503_v4  ;;  %v1544_v55 = vmul.f32 %v1516_v29, %v5505_v50  ;;  %v1545_v49 = vmul.f32 %v1516_v29, %v5507_v59 }
 0x3eb   : > { %v1546_v53 = vmul.f32 %v1516_v29, %v5509_v24  ;;  %v1547_v12 = vmul.f32 %v1516_v29, %v5511_v56  ;;  %v1548_v45 = vmul.f32 %v1516_v29, %v5513_v15  ;;  %v1549_v42 = vmul.f32 %v1516_v29, %v5515_v16 }
 0x3ec   : > { %v1556_v43 = vadd.f32 %v3976_v11, %v1518_v60  ;;  %v1557_v8 = vadd.f32 %v3976_v11, %v1519_v30  ;;  %v1558_v1 = vadd.f32 %v3976_v11, %v1520_v61  ;;  %v1559_v25 = vadd.f32 %v3976_v11, %v1521_v33 }
 0x3ed   : > { %v1560_v41 = vadd.f32 %v3976_v11, %v1522_v36  ;;  %v1561_v47 = vadd.f32 %v3976_v11, %v1523_v37  ;;  %v1562_v44 = vadd.f32 %v3976_v11, %v1524_v63  ;;  %v1563_v4 = vadd.f32 %v3976_v11, %v1525_v38 }
 0x3ee   : > { %v1564_v46 = vadd.f32 %v3976_v11, %v1526_v22  ;;  %v1565_v50 = vadd.f32 %v3976_v11, %v1527_v14  ;;  %v1566_v52 = vadd.f32 %v3976_v11, %v1528_v18  ;;  %v1567_v59 = vadd.f32 %v3976_v11, %v1529_v48 }
 0x3ef   : > { %v1568_v13 = vadd.f32 %v3976_v11, %v1530_v51  ;;  %v1569_v24 = vadd.f32 %v3976_v11, %v1531_v7  ;;  %v1570_v17 = vadd.f32 %v3976_v11, %v1532_v6  ;;  %v1571_v56 = vadd.f32 %v3976_v11, %v1533_v9 }
 0x3f0   : > { %v1572_v20 = vadd.f32 %v3976_v11, %v1534_v27  ;;  %v1573_v15 = vadd.f32 %v3976_v11, %v1535_v10  ;;  %v1574_v21 = vadd.f32 %v3976_v11, %v1536_v34  ;;  %v1575_v16 = vadd.f32 %v3976_v11, %v1537_v19 }
 0x3f1   : > { %v5621_v26 = vadd.f32 %v3976_v11, %v1538_v62  ;;  %v5623_v23 = vadd.f32 %v3976_v11, %v1539_v2  ;;  %v5625_v58 = vadd.f32 %v3976_v11, %v1540_v39  ;;  %v5627_v32 = vadd.f32 %v3976_v11, %v1541_v57 }
 0x3f2   : > { %v5629_v0 = vadd.f32 %v3976_v11, %v1542_v54  ;;  %v5631_v5 = vadd.f32 %v3976_v11, %v1543_v40  ;;  %v5633_v3 = vadd.f32 %v3976_v11, %v1544_v55  ;;  %v5635_v35 = vadd.f32 %v3976_v11, %v1545_v49 }
 0x3f3   : > { %v5637_v31 = vadd.f32 %v3976_v11, %v1546_v53  ;;  %v5639_v28 = vadd.f32 %v3976_v11, %v1547_v12  ;;  %v5641_v29 = vadd.f32 %v3976_v11, %v1548_v45  ;;  %v5643_v60 = vadd.f32 %v3976_v11, %v1549_v42 }
 0x3f4   : > { %v1588_v30 = vmax.f32 %v1556_v43, 0.0  ;;  %v1589_v61 = vmax.f32 %v1557_v8, 0.0  ;;  %v1590_v33 = vmax.f32 %v1558_v1, 0.0  ;;  %v1591_v36 = vmax.f32 %v1559_v25, 0.0 }
 0x3f5   : > { %v1592_v37 = vmax.f32 %v1560_v41, 0.0  ;;  %v1593_v63 = vmax.f32 %v1561_v47, 0.0  ;;  %v1594_v38 = vmax.f32 %v1562_v44, 0.0  ;;  %v1595_v22 = vmax.f32 %v1563_v4, 0.0 }
 0x3f6   : > { %v1596_v14 = vmax.f32 %v1564_v46, 0.0  ;;  %v1597_v18 = vmax.f32 %v1565_v50, 0.0  ;;  %v1598_v48 = vmax.f32 %v1566_v52, 0.0  ;;  %v1599_v51 = vmax.f32 %v1567_v59, 0.0  ;;  %1620 = vst [vmem:[#allocation2] sm:$0xff] %v1588_v30  ;;  %1621 = vst [vmem:[#allocation2 + $0x8] sm:$0xff] %v1589_v61 }
 0x3f7   : > { %1622 = vst [vmem:[#allocation2 + $0x10] sm:$0xff] %v1590_v33  ;;  %1623 = vst [vmem:[#allocation2 + $0x18] sm:$0xff] %v1591_v36  ;;  %v1600_v7 = vmax.f32 %v1568_v13, 0.0  ;;  %v1601_v6 = vmax.f32 %v1569_v24, 0.0  ;;  %v1602_v9 = vmax.f32 %v1570_v17, 0.0  ;;  %v1603_v27 = vmax.f32 %v1571_v56, 0.0 }
 0x3f8   : > { %1624 = vst [vmem:[#allocation2 + $0x20] sm:$0xff] %v1592_v37  ;;  %1625 = vst [vmem:[#allocation2 + $0x28] sm:$0xff] %v1593_v63  ;;  %v1604_v10 = vmax.f32 %v1572_v20, 0.0  ;;  %v1605_v34 = vmax.f32 %v1573_v15, 0.0  ;;  %v1606_v19 = vmax.f32 %v1574_v21, 0.0  ;;  %v1607_v11 = vmax.f32 %v1575_v16, 0.0 }
 0x3f9   : > { %1626 = vst [vmem:[#allocation2 + $0x30] sm:$0xff] %v1594_v38  ;;  %1627 = vst [vmem:[#allocation2 + $0x38] sm:$0xff] %v1595_v22  ;;  %v1608_v62 = vmax.f32 %v5621_v26, 0.0  ;;  %v1609_v2 = vmax.f32 %v5623_v23, 0.0  ;;  %v1610_v39 = vmax.f32 %v5625_v58, 0.0  ;;  %v1611_v57 = vmax.f32 %v5627_v32, 0.0 }
 0x3fa   : > { %1628 = vst [vmem:[#allocation2 + $0x40] sm:$0xff] %v1596_v14  ;;  %1629 = vst [vmem:[#allocation2 + $0x48] sm:$0xff] %v1597_v18  ;;  %v1612_v54 = vmax.f32 %v5629_v0, 0.0  ;;  %v1613_v40 = vmax.f32 %v5631_v5, 0.0  ;;  %v1614_v55 = vmax.f32 %v5633_v3, 0.0  ;;  %v1615_v49 = vmax.f32 %v5635_v35, 0.0 }
 0x3fb   : > { %1630 = vst [vmem:[#allocation2 + $0x50] sm:$0xff] %v1598_v48  ;;  %1631 = vst [vmem:[#allocation2 + $0x58] sm:$0xff] %v1599_v51  ;;  %v1616_v53 = vmax.f32 %v5637_v31, 0.0  ;;  %v1617_v12 = vmax.f32 %v5639_v28, 0.0  ;;  %v1618_v45 = vmax.f32 %v5641_v29, 0.0  ;;  %v1619_v42 = vmax.f32 %v5643_v60, 0.0 }
 0x3fc   : > { %1632 = vst [vmem:[#allocation2 + $0x60] sm:$0xff] %v1600_v7  ;;  %1633 = vst [vmem:[#allocation2 + $0x68] sm:$0xff] %v1601_v6 }
 0x3fd   : > { %1634 = vst [vmem:[#allocation2 + $0x70] sm:$0xff] %v1602_v9  ;;  %1635 = vst [vmem:[#allocation2 + $0x78] sm:$0xff] %v1603_v27 }
 0x3fe   : > { %1636 = vst [vmem:[#allocation2 + $0x80] sm:$0xff] %v1604_v10  ;;  %1637 = vst [vmem:[#allocation2 + $0x88] sm:$0xff] %v1605_v34 }
 0x3ff   : > { %1638 = vst [vmem:[#allocation2 + $0x90] sm:$0xff] %v1606_v19  ;;  %1639 = vst [vmem:[#allocation2 + $0x98] sm:$0xff] %v1607_v11 }
 0x400   : > { %1640 = vst [vmem:[#allocation2 + $0xa0] sm:$0xff] %v1608_v62  ;;  %1641 = vst [vmem:[#allocation2 + $0xa8] sm:$0xff] %v1609_v2 }
 0x401   : > { %1642 = vst [vmem:[#allocation2 + $0xb0] sm:$0xff] %v1610_v39  ;;  %1643 = vst [vmem:[#allocation2 + $0xb8] sm:$0xff] %v1611_v57 }
 0x402   : > { %1644 = vst [vmem:[#allocation2 + $0xc0] sm:$0xff] %v1612_v54  ;;  %1645 = vst [vmem:[#allocation2 + $0xc8] sm:$0xff] %v1613_v40 }
 0x403   : > { %1646 = vst [vmem:[#allocation2 + $0xd0] sm:$0xff] %v1614_v55  ;;  %1647 = vst [vmem:[#allocation2 + $0xd8] sm:$0xff] %v1615_v49 }
 0x404   : > { %1648 = vst [vmem:[#allocation2 + $0xe0] sm:$0xff] %v1616_v53  ;;  %1649 = vst [vmem:[#allocation2 + $0xe8] sm:$0xff] %v1617_v12 }
 0x405   : > { %1650 = vst [vmem:[#allocation2 + $0xf0] sm:$0xff] %v1618_v45  ;;  %1651 = vst [vmem:[#allocation2 + $0xf8] sm:$0xff] %v1619_v42 }
 0x406 PF: > { %v4556_v43 = vld [vmem:[%s4886_s22 + $0x4] ss:$8 sps:$4 sm:$0xff]   ;;  %v4558_v8 = vld [vmem:[%s4886_s22] ss:$8 sps:$4 sm:$0xff]   ;;  %v4758_v1 = vmov 0   ;;  %v1688_v26 = vld [vmem:[#allocation2 + $0x10] sm:$0xff] }
 0x407   : > { %1857 = vmatprep.mubr.bf16.mxu0 %v4758_v1  ;;  %1825 = vmatprep.subr.bf16.mxu0 %v4556_v43  ;;  %v4559_v25 = vld [vmem:[%s4886_s22 + $0x14] ss:$8 sps:$4 sm:$0xff]   ;;  %v4561_v41 = vld [vmem:[%s4886_s22 + $0x10] ss:$8 sps:$4 sm:$0xff]   ;;  %v4562_v47 = vld [vmem:[%s4886_s22 + $0x24] ss:$8 sps:$4 sm:$0xff]  }
 0x408   : > { %1826 = vmatpush1.bf16.msra.mxu0 %v4558_v8  ;;  %v4564_v44 = vld [vmem:[%s4886_s22 + $0x20] ss:$8 sps:$4 sm:$0xff]   ;;  %v4565_v4 = vld [vmem:[%s4886_s22 + $0x34] ss:$8 sps:$4 sm:$0xff]   ;;  %v4567_v46 = vld [vmem:[%s4886_s22 + $0x30] ss:$8 sps:$4 sm:$0xff]   ;;  %v1735_v8 = vlaneseq }
 0x409   : > { %1827 = vmatprep.subr.bf16.mxu0 %v4559_v25  ;;  %v4568_v50 = vld [vmem:[%s4886_s22 + $0x44] ss:$8 sps:$4 sm:$0xff]   ;;  %v4570_v52 = vld [vmem:[%s4886_s22 + $0x40] ss:$8 sps:$4 sm:$0xff]   ;;  %v4571_v59 = vld [vmem:[%s4886_s22 + $0x54] ss:$8 sps:$4 sm:$0xff]  }
 0x40a   : > { %v4573_v13 = vld [vmem:[%s4886_s22 + $0x50] ss:$8 sps:$4 sm:$0xff]   ;;  %v4574_v24 = vld [vmem:[%s4886_s22 + $0x64] ss:$8 sps:$4 sm:$0xff]   ;;  %v4576_v17 = vld [vmem:[%s4886_s22 + $0x60] ss:$8 sps:$4 sm:$0xff]  }
 0x40b   : > { %v4577_v56 = vld [vmem:[%s4886_s22 + $0x74] ss:$8 sps:$4 sm:$0xff]   ;;  %v4579_v20 = vld [vmem:[%s4886_s22 + $0x70] ss:$8 sps:$4 sm:$0xff]   ;;  %v1686_v15 = vld [vmem:[#allocation2] sm:$0xff]  ;;  %v5689_v25 = vshrl.u32 %v1735_v8, 7 }
 0x40c   : > { %1828 = vmatpush1.bf16.msra.mxu0 %v4561_v41  ;;  %v1687_v21 = vld [vmem:[#allocation2 + $0x8] sm:$0xff]  ;;  %v1689_v23 = vld [vmem:[#allocation2 + $0x18] sm:$0xff]  ;;  %v1690_v32 = vld [vmem:[#allocation2 + $0x20] sm:$0xff]  ;;  %vm2066_vm0 = vcmask 261120   ;;  %s6987_s12 = sld [smem:[#allocation12_spill]] }
 0x40d   : > { %1829 = vmatprep.subr.bf16.mxu0 %v4562_v47  ;;  %v1718_v16 = vpack.c.bf16 %v1687_v21, %v1686_v15  ;;  %v1719_v58 = vpack.c.bf16 %v1689_v23, %v1688_v26  ;;  %v1691_v0 = vld [vmem:[#allocation2 + $0x28] sm:$0xff]  ;;  %v1692_v3 = vld [vmem:[#allocation2 + $0x30] sm:$0xff]  ;;  %v1693_v35 = vld [vmem:[#allocation2 + $0x38] sm:$0xff]  ;;  %v6941_v41 = vsub.s32 0, %v5689_v25 }
 0x40e   : > { %v1720_v5 = vpack.c.bf16 %v1691_v0, %v1690_v32  ;;  %v1721_v31 = vpack.c.bf16 %v1693_v35, %v1692_v3  ;;  %v1694_v28 = vld [vmem:[#allocation2 + $0x40] sm:$0xff]  ;;  %v1695_v29 = vld [vmem:[#allocation2 + $0x48] sm:$0xff]  ;;  %v1696_v30 = vld [vmem:[#allocation2 + $0x50] sm:$0xff] }
 0x40f   : > { %v1722_v60 = vpack.c.bf16 %v1695_v29, %v1694_v28  ;;  %v1697_v61 = vld [vmem:[#allocation2 + $0x58] sm:$0xff]  ;;  %v1698_v36 = vld [vmem:[#allocation2 + $0x60] sm:$0xff]  ;;  %v1699_v37 = vld [vmem:[#allocation2 + $0x68] sm:$0xff] }
 0x410   : > { %1830 = vmatpush1.bf16.msra.mxu0 %v4564_v44  ;;  %v1723_v33 = vpack.c.bf16 %v1697_v61, %v1696_v30  ;;  %v1724_v63 = vpack.c.bf16 %v1699_v37, %v1698_v36  ;;  %v1700_v38 = vld [vmem:[#allocation2 + $0x70] sm:$0xff]  ;;  %v1701_v22 = vld [vmem:[#allocation2 + $0x78] sm:$0xff]  ;;  %v1702_v18 = vld [vmem:[#allocation2 + $0x80] sm:$0xff]  ;;  %v1741_v44 = vsub.s32 1, %v5689_v25 }
 0x411   : > { %1831 = vmatprep.subr.bf16.mxu0 %v4565_v4  ;;  %v1725_v14 = vpack.c.bf16 %v1701_v22, %v1700_v38  ;;  %v1703_v48 = vld [vmem:[#allocation2 + $0x88] sm:$0xff]  ;;  %v1704_v7 = vld [vmem:[#allocation2 + $0x90] sm:$0xff]  ;;  %v1705_v6 = vld [vmem:[#allocation2 + $0x98] sm:$0xff] }
 0x412   : > { %v1726_v51 = vpack.c.bf16 %v1703_v48, %v1702_v18  ;;  %v1727_v9 = vpack.c.bf16 %v1705_v6, %v1704_v7  ;;  %v1706_v27 = vld [vmem:[#allocation2 + $0xa0] sm:$0xff]  ;;  %v1707_v10 = vld [vmem:[#allocation2 + $0xa8] sm:$0xff]  ;;  %v1708_v19 = vld [vmem:[#allocation2 + $0xb0] sm:$0xff] }
 0x413   : > { %v1728_v34 = vpack.c.bf16 %v1707_v10, %v1706_v27  ;;  %v1709_v11 = vld [vmem:[#allocation2 + $0xb8] sm:$0xff]  ;;  %v1710_v2 = vld [vmem:[#allocation2 + $0xc0] sm:$0xff]  ;;  %v1711_v39 = vld [vmem:[#allocation2 + $0xc8] sm:$0xff] }
 0x414   : > { %1832 = vmatpush1.bf16.msra.mxu0 %v4567_v46  ;;  %v1729_v62 = vpack.c.bf16 %v1709_v11, %v1708_v19  ;;  %v1730_v57 = vpack.c.bf16 %v1711_v39, %v1710_v2  ;;  %v1712_v54 = vld [vmem:[#allocation2 + $0xd0] sm:$0xff]  ;;  %v1713_v40 = vld [vmem:[#allocation2 + $0xd8] sm:$0xff]  ;;  %v1714_v49 = vld [vmem:[#allocation2 + $0xe0] sm:$0xff] }
 0x415   : > { %1833 = vmatprep.subr.bf16.mxu0 %v4568_v50  ;;  %v1731_v55 = vpack.c.bf16 %v1713_v40, %v1712_v54  ;;  %v1715_v53 = vld [vmem:[#allocation2 + $0xe8] sm:$0xff]  ;;  %v1716_v45 = vld [vmem:[#allocation2 + $0xf0] sm:$0xff]  ;;  %v1717_v42 = vld [vmem:[#allocation2 + $0xf8] sm:$0xff] }
 0x416   : > { %v1732_v12 = vpack.c.bf16 %v1715_v53, %v1714_v49  ;;  %v1733_v43 = vpack.c.bf16 %v1717_v42, %v1716_v45  ;;  %v1668_v47 = vld [vmem:[%s4891_s26] sm:$0x3] }
 0x417   : > { %v5696_v4 = vrot.slane %v1668_v47, %v6941_v41  ;;  %v5698_v50 = vrot.slane %v1668_v47, %v1741_v44 }
 0x418   : > { %1834 = vmatpush1.bf16.msra.mxu0 %v4570_v52 }
 0x419   : > { %1835 = vmatprep.subr.bf16.mxu0 %v4571_v59 }
 0x41c   : > { %1836 = vmatpush1.bf16.msra.mxu0 %v4573_v13 }
 0x41d   : > { %1837 = vmatprep.subr.bf16.mxu0 %v4574_v24 }
 0x420   : > { %1838 = vmatpush1.bf16.msra.mxu0 %v4576_v17 }
 0x421   : > { %1839 = vmatprep.subr.bf16.mxu0 %v4577_v56 }
 0x424   : > { %1840 = vmatpush1.bf16.msra.mxu0 %v4579_v20 }
 0x427   : > { %1858 = vmatmul.mubr.bf16.vlgmr.msra.gmra.mrb[0].mxu0 %v1718_v16 }
 0x428   : > { %1867 = vmatprep.mubr.bf16.mxu0 %v4758_v1 }
 0x42f   : > { %1868 = vmatmul.mubr.bf16.gmra.mrb[4].mxu0 %v1719_v58 }
 0x430   : > { %1877 = vmatprep.mubr.bf16.mxu0 %v4758_v1 }
 0x437   : > { %1878 = vmatmul.mubr.bf16.gmra.mrb[8].mxu0 %v1720_v5 }
 0x438   : > { %1887 = vmatprep.mubr.bf16.mxu0 %v4758_v1 }
 0x43f   : > { %1888 = vmatmul.mubr.bf16.gmra.mrb[12].mxu0 %v1721_v31 }
 0x440   : > { %1897 = vmatprep.mubr.bf16.mxu0 %v4758_v1 }
 0x447   : > { %1898 = vmatmul.mubr.bf16.gmra.mrb[16].mxu0 %v1722_v60 }
 0x448   : > { %1907 = vmatprep.mubr.bf16.mxu0 %v4758_v1 }
 0x44f   : > { %1908 = vmatmul.mubr.bf16.gmra.mrb[20].mxu0 %v1723_v33 }
 0x450   : > { %1917 = vmatprep.mubr.bf16.mxu0 %v4758_v1 }
 0x457   : > { %1918 = vmatmul.mubr.bf16.gmra.mrb[24].mxu0 %v1724_v63 }
 0x458   : > { %1927 = vmatprep.mubr.bf16.mxu0 %v4758_v1 }
 0x45f   : > { %1928 = vmatmul.mubr.bf16.gmra.mrb[28].mxu0 %v1725_v14 }
 0x460   : > { %1937 = vmatprep.mubr.bf16.mxu0 %v4758_v1 }
 0x467   : > { %1938 = vmatmul.mubr.bf16.gmra.mrb[32].mxu0 %v1726_v51 }
 0x468   : > { %1947 = vmatprep.mubr.bf16.mxu0 %v4758_v1 }
 0x46f   : > { %1948 = vmatmul.mubr.bf16.gmra.mrb[36].mxu0 %v1727_v9 }
 0x470   : > { %1957 = vmatprep.mubr.bf16.mxu0 %v4758_v1 }
 0x477   : > { %1958 = vmatmul.mubr.bf16.gmra.mrb[40].mxu0 %v1728_v34 }
 0x478   : > { %1967 = vmatprep.mubr.bf16.mxu0 %v4758_v1 }
 0x47f   : > { %1968 = vmatmul.mubr.bf16.gmra.mrb[44].mxu0 %v1729_v62 }
 0x480   : > { %1977 = vmatprep.mubr.bf16.mxu0 %v4758_v1 }
 0x487   : > { %1978 = vmatmul.mubr.bf16.gmra.mrb[48].mxu0 %v1730_v57 }
 0x488   : > { %1987 = vmatprep.mubr.bf16.mxu0 %v4758_v1 }
 0x48f   : > { %1988 = vmatmul.mubr.bf16.gmra.mrb[52].mxu0 %v1731_v55 }
 0x490   : > { %1997 = vmatprep.mubr.bf16.mxu0 %v4758_v1 }
 0x497   : > { %1998 = vmatmul.mubr.bf16.gmra.mrb[56].mxu0 %v1732_v12 }
 0x498   : > { %2007 = vmatprep.mubr.bf16.mxu0 %v4758_v1 }
 0x49f   : > { %2008 = vmatmul.mubr.bf16.gmra.mrb[60].mxu0 %v1733_v43 }
 0x4fa   : > { %v1859_v46 = vpop.f32.mrb[0].mxu0 }
 0x4fb   : > { %v1861_v1 = vpop.f32.mrb[1].mxu0  ;;  %v1860_v59 = vadd.f32 %v1859_v46, %v5696_v4 }
 0x4fc   : > { %v1863_v52 = vpop.f32.mrb[2].mxu0  ;;  %v1862_v17 = vadd.f32 %v1861_v1, %v5698_v50 }
 0x4fd   : > { %v1864_v13 = vadd.f32 %v1863_v52, %v5696_v4  ;;  %v1865_v24 = vpop.f32.mrb[3].mxu0 }
 0x4fe   : > { %v1866_v56 = vadd.f32 %v1865_v24, %v5698_v50 }
 0x4ff   : > { %v5704_v20 = vpack.c.bf16 %v1864_v13, %v1860_v59 }
 0x500   : > { %v2050_v15 = vpack.c.bf16 %v1866_v56, %v1862_v17 }
 0x502   : > { %2067 = vst.msk [vmem:[#allocation5] sm:$0xff] %vm2066_vm0, %v2050_v15  ;;  %v1869_v21 = vpop.f32.mrb[4].mxu0 }
 0x503   : > { %v1871_v16 = vpop.f32.mrb[5].mxu0  ;;  %v1870_v23 = vadd.f32 %v1869_v21, %v5696_v4 }
 0x504   : > { %v1873_v26 = vpop.f32.mrb[6].mxu0  ;;  %v1872_v0 = vadd.f32 %v1871_v16, %v5698_v50 }
 0x505   : > { %v1874_v58 = vadd.f32 %v1873_v26, %v5696_v4  ;;  %v1875_v32 = vpop.f32.mrb[7].mxu0 }
 0x506   : > { %v1876_v5 = vadd.f32 %v1875_v32, %v5698_v50 }
 0x507   : > { %v5711_v3 = vpack.c.bf16 %v1874_v58, %v1870_v23 }
 0x508   : > { %v2051_v35 = vpack.c.bf16 %v1876_v5, %v1872_v0 }
 0x509   : > { %v2083_v31 = vld [vmem:[#allocation5] sm:$0xff] }
 0x50a   : > { %2068 = vst.msk [vmem:[#allocation5 + $0x8] sm:$0xff] %vm2066_vm0, %v2051_v35  ;;  %v1879_v28 = vpop.f32.mrb[8].mxu0  ;;  %4467 = vmatprep.subr.msk.bf16.mxu1 %vm2066_vm0, %v2083_v31  ;;  %4291 = vmatprep.mubr.msk.bf16.mxu1 %vm2066_vm0, %v2083_v31  ;;  %v2092_v29 = vsel %vm2066_vm0, %v2083_v31, 0 }
 0x50b   : > { %v1881_v60 = vpop.f32.mrb[9].mxu0  ;;  %4276 = vmatpush3.bf16.xpose.msra.mxu1 %v2092_v29  ;;  %v1880_v61 = vadd.f32 %v1879_v28, %v5696_v4 }
 0x50c   : > { %v1883_v30 = vpop.f32.mrb[10].mxu0  ;;  %v1882_v37 = vadd.f32 %v1881_v60, %v5698_v50 }
 0x50d   : > { %v1884_v33 = vadd.f32 %v1883_v30, %v5696_v4  ;;  %v1885_v36 = vpop.f32.mrb[11].mxu0 }
 0x50e   : > { %v1886_v63 = vadd.f32 %v1885_v36, %v5698_v50 }
 0x50f   : > { %v5721_v38 = vpack.c.bf16 %v1884_v33, %v1880_v61 }
 0x510   : > { %v2052_v22 = vpack.c.bf16 %v1886_v63, %v1882_v37 }
 0x511   : > { %v5723_v14 = vld [vmem:[#allocation5 + $0x8] sm:$0xff] }
 0x512   : > { %2069 = vst.msk [vmem:[#allocation5 + $0x10] sm:$0xff] %vm2066_vm0, %v2052_v22  ;;  %v1889_v18 = vpop.f32.mrb[12].mxu0  ;;  %4468 = vmatprep.subr.msk.bf16.mxu1 %vm2066_vm0, %v5723_v14  ;;  %v2095_v48 = vsel %vm2066_vm0, %v5723_v14, 0 }
 0x513   : > { %v1891_v51 = vpop.f32.mrb[13].mxu0  ;;  %4278 = vmatpush3.bf16.xpose.msra.mxu1 %v2095_v48  ;;  %v1890_v6 = vadd.f32 %v1889_v18, %v5696_v4 }
 0x514   : > { %v1893_v7 = vpop.f32.mrb[14].mxu0  ;;  %v1892_v10 = vadd.f32 %v1891_v51, %v5698_v50 }
 0x515   : > { %v1894_v9 = vadd.f32 %v1893_v7, %v5696_v4  ;;  %v1895_v27 = vpop.f32.mrb[15].mxu0 }
 0x516   : > { %v1896_v34 = vadd.f32 %v1895_v27, %v5698_v50 }
 0x517   : > { %v5734_v19 = vpack.c.bf16 %v1894_v9, %v1890_v6 }
 0x518   : > { %v2053_v11 = vpack.c.bf16 %v1896_v34, %v1892_v10 }
 0x519   : > { %v5736_v62 = vld [vmem:[#allocation5 + $0x10] sm:$0xff] }
 0x51a   : > { %2070 = vst.msk [vmem:[#allocation5 + $0x18] sm:$0xff] %vm2066_vm0, %v2053_v11  ;;  %v1899_v2 = vpop.f32.mrb[16].mxu0  ;;  %4469 = vmatprep.subr.msk.bf16.mxu1 %vm2066_vm0, %v5736_v62  ;;  %v2098_v39 = vsel %vm2066_vm0, %v5736_v62, 0 }
 0x51b   : > { %v1901_v57 = vpop.f32.mrb[17].mxu0  ;;  %4280 = vmatpush3.bf16.xpose.msra.mxu1 %v2098_v39  ;;  %v1900_v40 = vadd.f32 %v1899_v2, %v5696_v4 }
 0x51c   : > { %v1903_v54 = vpop.f32.mrb[18].mxu0  ;;  %v1902_v53 = vadd.f32 %v1901_v57, %v5698_v50 }
 0x51d   : > { %v1904_v55 = vadd.f32 %v1903_v54, %v5696_v4  ;;  %v1905_v49 = vpop.f32.mrb[19].mxu0 }
 0x51e   : > { %v1906_v12 = vadd.f32 %v1905_v49, %v5698_v50 }
 0x51f   : > { %v5747_v45 = vpack.c.bf16 %v1904_v55, %v1900_v40 }
 0x520   : > { %v2054_v42 = vpack.c.bf16 %v1906_v12, %v1902_v53 }
 0x521   : > { %v5749_v43 = vld [vmem:[#allocation5 + $0x18] sm:$0xff] }
 0x522   : > { %2071 = vst.msk [vmem:[#allocation5 + $0x20] sm:$0xff] %vm2066_vm0, %v2054_v42  ;;  %v1909_v8 = vpop.f32.mrb[20].mxu0  ;;  %4470 = vmatprep.subr.msk.bf16.mxu1 %vm2066_vm0, %v5749_v43  ;;  %v2101_v47 = vsel %vm2066_vm0, %v5749_v43, 0 }
 0x523   : > { %v1911_v44 = vpop.f32.mrb[21].mxu0  ;;  %4282 = vmatpush3.bf16.xpose.msra.mxu1 %v2101_v47  ;;  %v1910_v1 = vadd.f32 %v1909_v8, %v5696_v4 }
 0x524   : > { %v1913_v46 = vpop.f32.mrb[22].mxu0  ;;  %v1912_v13 = vadd.f32 %v1911_v44, %v5698_v50 }
 0x525   : > { %v1914_v52 = vadd.f32 %v1913_v46, %v5696_v4  ;;  %v1915_v59 = vpop.f32.mrb[23].mxu0 }
 0x526   : > { %v1916_v24 = vadd.f32 %v1915_v59, %v5698_v50 }
 0x527   : > { %v5760_v17 = vpack.c.bf16 %v1914_v52, %v1910_v1 }
 0x528   : > { %v2055_v56 = vpack.c.bf16 %v1916_v24, %v1912_v13 }
 0x529   : > { %v5762_v15 = vld [vmem:[#allocation5 + $0x20] sm:$0xff] }
 0x52a   : > { %2072 = vst.msk [vmem:[#allocation5 + $0x28] sm:$0xff] %vm2066_vm0, %v2055_v56  ;;  %v1919_v21 = vpop.f32.mrb[24].mxu0  ;;  %4471 = vmatprep.subr.msk.bf16.mxu1 %vm2066_vm0, %v5762_v15  ;;  %v2104_v16 = vsel %vm2066_vm0, %v5762_v15, 0 }
 0x52b   : > { %v1921_v26 = vpop.f32.mrb[25].mxu0  ;;  %4284 = vmatpush3.bf16.xpose.msra.mxu1 %v2104_v16  ;;  %v1920_v58 = vadd.f32 %v1919_v21, %v5696_v4 }
 0x52c   : > { %v1923_v23 = vpop.f32.mrb[26].mxu0  ;;  %v1922_v5 = vadd.f32 %v1921_v26, %v5698_v50 }
 0x52d   : > { %v1924_v32 = vadd.f32 %v1923_v23, %v5696_v4  ;;  %v1925_v0 = vpop.f32.mrb[27].mxu0 }
 0x52e   : > { %v1926_v35 = vadd.f32 %v1925_v0, %v5698_v50 }
 0x52f   : > { %v5773_v31 = vpack.c.bf16 %v1924_v32, %v1920_v58 }
 0x530   : > { %v2056_v28 = vpack.c.bf16 %v1926_v35, %v1922_v5 }
 0x531   : > { %v5775_v29 = vld [vmem:[#allocation5 + $0x28] sm:$0xff] }
 0x532   : > { %2073 = vst.msk [vmem:[#allocation5 + $0x30] sm:$0xff] %vm2066_vm0, %v2056_v28  ;;  %v1929_v60 = vpop.f32.mrb[28].mxu0  ;;  %4472 = vmatprep.subr.msk.bf16.mxu1 %vm2066_vm0, %v5775_v29  ;;  %v2107_v30 = vsel %vm2066_vm0, %v5775_v29, 0 }
 0x533   : > { %v1931_v61 = vpop.f32.mrb[29].mxu0  ;;  %4286 = vmatpush3.bf16.xpose.msra.mxu1 %v2107_v30  ;;  %v1930_v36 = vadd.f32 %v1929_v60, %v5696_v4 }
 0x534   : > { %v1933_v33 = vpop.f32.mrb[30].mxu0  ;;  %v1932_v22 = vadd.f32 %v1931_v61, %v5698_v50 }
 0x535   : > { %v1934_v37 = vadd.f32 %v1933_v33, %v5696_v4  ;;  %v1935_v63 = vpop.f32.mrb[31].mxu0 }
 0x536   : > { %v1936_v18 = vadd.f32 %v1935_v63, %v5698_v50 }
 0x537   : > { %v5786_v48 = vpack.c.bf16 %v1934_v37, %v1930_v36 }
 0x538   : > { %v2057_v51 = vpack.c.bf16 %v1936_v18, %v1932_v22 }
 0x539   : > { %v5788_v7 = vld [vmem:[#allocation5 + $0x30] sm:$0xff] }
 0x53a   : > { %2074 = vst.msk [vmem:[#allocation5 + $0x38] sm:$0xff] %vm2066_vm0, %v2057_v51  ;;  %v1939_v6 = vpop.f32.mrb[32].mxu0  ;;  %4473 = vmatprep.subr.msk.bf16.mxu1 %vm2066_vm0, %v5788_v7  ;;  %v2110_v9 = vsel %vm2066_vm0, %v5788_v7, 0 }
 0x53b   : > { %v1941_v27 = vpop.f32.mrb[33].mxu0  ;;  %4288 = vmatpush3.bf16.xpose.msra.mxu1 %v2110_v9  ;;  %v1940_v34 = vadd.f32 %v1939_v6, %v5696_v4 }
 0x53c   : > { %v1943_v10 = vpop.f32.mrb[34].mxu0  ;;  %v1942_v39 = vadd.f32 %v1941_v27, %v5698_v50 }
 0x53d   : > { %v1944_v11 = vadd.f32 %v1943_v10, %v5696_v4  ;;  %v1945_v2 = vpop.f32.mrb[35].mxu0 }
 0x53e   : > { %v1946_v57 = vadd.f32 %v1945_v2, %v5698_v50 }
 0x53f   : > { %v5799_v54 = vpack.c.bf16 %v1944_v11, %v1940_v34 }
 0x540   : > { %v2058_v40 = vpack.c.bf16 %v1946_v57, %v1942_v39 }
 0x541   : > { %v5801_v55 = vld [vmem:[#allocation5 + $0x38] sm:$0xff] }
 0x542   : > { %2075 = vst.msk [vmem:[#allocation5 + $0x40] sm:$0xff] %vm2066_vm0, %v2058_v40  ;;  %v1949_v49 = vpop.f32.mrb[36].mxu0  ;;  %4474 = vmatprep.subr.msk.bf16.mxu1 %vm2066_vm0, %v5801_v55  ;;  %v2113_v53 = vsel %vm2066_vm0, %v5801_v55, 0 }
 0x543   : > { %v1951_v12 = vpop.f32.mrb[37].mxu0  ;;  %4290 = vmatpush3.bf16.xpose.msra.mxu1 %v2113_v53  ;;  %v1950_v8 = vadd.f32 %v1949_v49, %v5696_v4 }
 0x544   : > { %v1953_v42 = vpop.f32.mrb[38].mxu0  ;;  %4307 = vmatprep.subr.bf16.mxu1 %v5704_v20  ;;  %v1952_v46 = vadd.f32 %v1951_v12, %v5698_v50 }
 0x545   : > { %v1954_v47 = vadd.f32 %v1953_v42, %v5696_v4  ;;  %v1955_v44 = vpop.f32.mrb[39].mxu0 }
 0x546   : > { %v1956_v1 = vadd.f32 %v1955_v44, %v5698_v50 }
 0x547   : > { %v5813_v52 = vpack.c.bf16 %v1954_v47, %v1950_v8 }
 0x548   : > { %v2059_v59 = vpack.c.bf16 %v1956_v1, %v1952_v46 }
 0x549   : > { %v2573_v13 = vld [vmem:[#allocation5 + $0x40] sm:$0xff] }
 0x54a   : > { %2076 = vst.msk [vmem:[#allocation5 + $0x48] sm:$0xff] %vm2066_vm0, %v2059_v59  ;;  %v1959_v24 = vpop.f32.mrb[40].mxu0  ;;  %4292 = vmatmul.mubr.msk.bf16.vlgmr.msra.gmra.mrb[0].mxu1 %vm2066_vm0, %v5723_v14  ;;  %4475 = vmatprep.subr.msk.bf16.mxu0 %vm2066_vm0, %v2573_v13  ;;  %v2582_v56 = vsel %vm2066_vm0, %v2573_v13, 0 }
 0x54b   : > { %4355 = vmatprep.mubr.msk.bf16.mxu0 %vm2066_vm0, %v2573_v13  ;;  %v1961_v21 = vpop.f32.mrb[41].mxu0  ;;  %4295 = vmatprep.mubr.msk.bf16.mxu1 %vm2066_vm0, %v5736_v62  ;;  %v1960_v26 = vadd.f32 %v1959_v24, %v5696_v4 }
 0x54c   : > { %4308 = vmatpush3.bf16.msra.mxu1 %v5704_v20  ;;  %4340 = vmatpush3.bf16.xpose.msra.mxu0 %v2582_v56  ;;  %v1963_v16 = vpop.f32.mrb[42].mxu0  ;;  %v1962_v58 = vadd.f32 %v1961_v21, %v5698_v50 }
 0x54d   : > { %v1964_v23 = vadd.f32 %v1963_v16, %v5696_v4  ;;  %4309 = vmatprep.subr.bf16.mxu1 %v5711_v3  ;;  %v1965_v14 = vpop.f32.mrb[43].mxu0 }
 0x54e   : > { %v1966_v32 = vadd.f32 %v1965_v14, %v5698_v50 }
 0x54f   : > { %v5829_v0 = vpack.c.bf16 %v1964_v23, %v1960_v26 }
 0x550   : > { %v2060_v5 = vpack.c.bf16 %v1966_v32, %v1962_v58  ;;  %4310 = vmatpush3.bf16.msra.mxu1 %v5711_v3 }
 0x551   : > { %4311 = vmatprep.subr.bf16.mxu1 %v5721_v38  ;;  %v5833_v20 = vld [vmem:[#allocation5 + $0x48] sm:$0xff] }
 0x552   : > { %2077 = vst.msk [vmem:[#allocation5 + $0x50] sm:$0xff] %vm2066_vm0, %v2060_v5  ;;  %v1969_v62 = vpop.f32.mrb[44].mxu0  ;;  %4296 = vmatmul.mubr.msk.bf16.gmra.mrb[4].mxu1 %vm2066_vm0, %v5749_v43  ;;  %4476 = vmatprep.subr.msk.bf16.mxu0 %vm2066_vm0, %v5833_v20  ;;  %v2585_v35 = vsel %vm2066_vm0, %v5833_v20, 0 }
 0x553   : > { %v1971_v28 = vpop.f32.mrb[45].mxu0  ;;  %4299 = vmatprep.mubr.msk.bf16.mxu1 %vm2066_vm0, %v5762_v15  ;;  %v1970_v60 = vadd.f32 %v1969_v62, %v5696_v4 }
 0x554   : > { %4312 = vmatpush3.bf16.msra.mxu1 %v5721_v38  ;;  %4342 = vmatpush3.bf16.xpose.msra.mxu0 %v2585_v35  ;;  %v1973_v3 = vpop.f32.mrb[46].mxu0  ;;  %v1972_v61 = vadd.f32 %v1971_v28, %v5698_v50 }
 0x555   : > { %v1974_v30 = vadd.f32 %v1973_v3, %v5696_v4  ;;  %4313 = vmatprep.subr.bf16.mxu1 %v5734_v19  ;;  %v1975_v43 = vpop.f32.mrb[47].mxu0 }
 0x556   : > { %v1976_v33 = vadd.f32 %v1975_v43, %v5698_v50 }
 0x557   : > { %v5850_v36 = vpack.c.bf16 %v1974_v30, %v1970_v60 }
 0x558   : > { %v2061_v37 = vpack.c.bf16 %v1976_v33, %v1972_v61  ;;  %4314 = vmatpush3.bf16.msra.mxu1 %v5734_v19 }
 0x559   : > { %4315 = vmatprep.subr.bf16.mxu1 %v5747_v45  ;;  %v5854_v38 = vld [vmem:[#allocation5 + $0x50] sm:$0xff] }
 0x55a   : > { %2078 = vst.msk [vmem:[#allocation5 + $0x58] sm:$0xff] %vm2066_vm0, %v2061_v37  ;;  %v1979_v15 = vpop.f32.mrb[48].mxu0  ;;  %4300 = vmatmul.mubr.msk.bf16.gmra.mrb[8].mxu1 %vm2066_vm0, %v5775_v29  ;;  %4477 = vmatprep.subr.msk.bf16.mxu0 %vm2066_vm0, %v5854_v38  ;;  %v2588_v63 = vsel %vm2066_vm0, %v5854_v38, 0 }
 0x55b   : > { %v1981_v22 = vpop.f32.mrb[49].mxu0  ;;  %4303 = vmatprep.mubr.msk.bf16.mxu1 %vm2066_vm0, %v5788_v7  ;;  %v1980_v18 = vadd.f32 %v1979_v15, %v5696_v4 }
 0x55c   : > { %4316 = vmatpush3.bf16.msra.mxu1 %v5747_v45  ;;  %4344 = vmatpush3.bf16.xpose.msra.mxu0 %v2588_v63  ;;  %v1983_v19 = vpop.f32.mrb[50].mxu0  ;;  %v1982_v6 = vadd.f32 %v1981_v22, %v5698_v50 }
 0x55d   : > { %v1984_v51 = vadd.f32 %v1983_v19, %v5696_v4  ;;  %4317 = vmatprep.subr.bf16.mxu1 %v5760_v17  ;;  %v1985_v29 = vpop.f32.mrb[51].mxu0 }
 0x55e   : > { %v1986_v9 = vadd.f32 %v1985_v29, %v5698_v50 }
 0x55f   : > { %v5871_v27 = vpack.c.bf16 %v1984_v51, %v1980_v18 }
 0x560   : > { %v2062_v10 = vpack.c.bf16 %v1986_v9, %v1982_v6  ;;  %4318 = vmatpush3.bf16.msra.mxu1 %v5760_v17 }
 0x561   : > { %4319 = vmatprep.subr.bf16.mxu1 %v5773_v31  ;;  %v2576_v45 = vld [vmem:[#allocation5 + $0x58] sm:$0xff] }
 0x562   : > { %2079 = vst.msk [vmem:[#allocation5 + $0x60] sm:$0xff] %vm2066_vm0, %v2062_v10  ;;  %v1989_v7 = vpop.f32.mrb[52].mxu0  ;;  %4304 = vmatmul.mubr.msk.bf16.gmra.mrb[12].mxu1 %vm2066_vm0, %v5801_v55  ;;  %4478 = vmatprep.subr.msk.bf16.mxu0 %vm2066_vm0, %v2576_v45  ;;  %v2591_v34 = vsel %vm2066_vm0, %v2576_v45, 0 }
 0x563   : > { %v1991_v11 = vpop.f32.mrb[53].mxu0  ;;  %v1990_v17 = vadd.f32 %v1989_v7, %v5696_v4 }
 0x564   : > { %4320 = vmatpush3.bf16.msra.mxu1 %v5773_v31  ;;  %4346 = vmatpush3.bf16.xpose.msra.mxu0 %v2591_v34  ;;  %v1993_v2 = vpop.f32.mrb[54].mxu0  ;;  %v1992_v40 = vadd.f32 %v1991_v11, %v5698_v50 }
 0x565   : > { %v1994_v39 = vadd.f32 %v1993_v2, %v5696_v4  ;;  %4321 = vmatprep.subr.bf16.mxu1 %v5786_v48  ;;  %v1995_v57 = vpop.f32.mrb[55].mxu0 }
 0x566   : > { %v1996_v55 = vadd.f32 %v1995_v57, %v5698_v50 }
 0x567   : > { %v5886_v49 = vpack.c.bf16 %v1994_v39, %v1990_v17 }
 0x568   : > { %v2063_v53 = vpack.c.bf16 %v1996_v55, %v1992_v40  ;;  %4322 = vmatpush3.bf16.msra.mxu1 %v5786_v48 }
 0x569   : > { %4371 = vmatprep.subr.bf16.mxu1 %v5799_v54  ;;  %v2577_v31 = vld [vmem:[#allocation5 + $0x60] sm:$0xff] }
 0x56a   : > { %2080 = vst.msk [vmem:[#allocation5 + $0x68] sm:$0xff] %vm2066_vm0, %v2063_v53  ;;  %v1999_v12 = vpop.f32.mrb[56].mxu0  ;;  %4479 = vmatprep.subr.msk.bf16.mxu0 %vm2066_vm0, %v2577_v31  ;;  %v2594_v42 = vsel %vm2066_vm0, %v2577_v31, 0 }
 0x56b   : > { %v2001_v8 = vpop.f32.mrb[57].mxu0  ;;  %v2000_v44 = vadd.f32 %v1999_v12, %v5696_v4 }
 0x56c   : > { %4348 = vmatpush3.bf16.xpose.msra.mxu0 %v2594_v42  ;;  %v2003_v47 = vpop.f32.mrb[58].mxu0  ;;  %v2002_v48 = vadd.f32 %v2001_v8, %v5698_v50 }
 0x56d   : > { %v2004_v46 = vadd.f32 %v2003_v47, %v5696_v4  ;;  %v2005_v1 = vpop.f32.mrb[59].mxu0 }
 0x56e   : > { %v2006_v59 = vadd.f32 %v2005_v1, %v5698_v50 }
 0x56f   : > { %v5897_v13 = vpack.c.bf16 %v2004_v46, %v2000_v44 }
 0x570   : > { %v2064_v24 = vpack.c.bf16 %v2006_v59, %v2002_v48 }
 0x571   : > { %v2578_v56 = vld [vmem:[#allocation5 + $0x68] sm:$0xff] }
 0x572   : > { %2081 = vst.msk [vmem:[#allocation5 + $0x70] sm:$0xff] %vm2066_vm0, %v2064_v24  ;;  %v2009_v21 = vpop.f32.mrb[60].mxu0  ;;  %4480 = vmatprep.subr.msk.bf16.mxu0 %vm2066_vm0, %v2578_v56  ;;  %v2597_v16 = vsel %vm2066_vm0, %v2578_v56, 0 }
 0x573   : > { %v2011_v26 = vpop.f32.mrb[61].mxu0  ;;  %v2010_v14 = vadd.f32 %v2009_v21, %v5696_v4 }
 0x574   : > { %4350 = vmatpush3.bf16.xpose.msra.mxu0 %v2597_v16  ;;  %v2013_v23 = vpop.f32.mrb[62].mxu0  ;;  %v2012_v5 = vadd.f32 %v2011_v26, %v5698_v50 }
 0x575   : > { %v2014_v58 = vadd.f32 %v2013_v23, %v5696_v4  ;;  %v2015_v32 = vpop.f32.mrb[63].mxu0 }
 0x576   : > { %v2016_v62 = vadd.f32 %v2015_v32, %v5698_v50 }
 0x577   : > { %v5906_v35 = vpack.c.bf16 %v2014_v58, %v2010_v14 }
 0x578   : > { %v2065_v28 = vpack.c.bf16 %v2016_v62, %v2012_v5 }
 0x579   : > { %v2579_v3 = vld [vmem:[#allocation5 + $0x70] sm:$0xff] }
 0x57a   : > { %2082 = vst.msk [vmem:[#allocation5 + $0x78] sm:$0xff] %vm2066_vm0, %v2065_v28  ;;  %4481 = vmatprep.subr.msk.bf16.mxu0 %vm2066_vm0, %v2579_v3  ;;  %v2600_v60 = vsel %vm2066_vm0, %v2579_v3, 0 }
 0x57c   : > { %4352 = vmatpush3.bf16.xpose.msra.mxu0 %v2600_v60 }
 0x581   : > { %v2580_v30 = vld [vmem:[#allocation5 + $0x78] sm:$0xff] }
 0x582   : > { %4482 = vmatprep.subr.msk.bf16.mxu0 %vm2066_vm0, %v2580_v30  ;;  %v2603_v4 = vsel %vm2066_vm0, %v2580_v30, 0 }
 0x584   : > { %4354 = vmatpush3.bf16.xpose.msra.mxu0 %v2603_v4 }
 0x58b   : > { %4356 = vmatmul.mubr.msk.bf16.vlgmr.msra.gmra.mrb[64].mxu0 %vm2066_vm0, %v5833_v20 }
 0x58c   : > { %4359 = vmatprep.mubr.msk.bf16.mxu0 %vm2066_vm0, %v5854_v38 }
 0x593   : > { %4360 = vmatmul.mubr.msk.bf16.gmra.mrb[68].mxu0 %vm2066_vm0, %v2576_v45 }
 0x594   : > { %4363 = vmatprep.mubr.msk.bf16.mxu0 %vm2066_vm0, %v2577_v31 }
 0x59b   : > { %4364 = vmatmul.mubr.msk.bf16.gmra.mrb[72].mxu0 %vm2066_vm0, %v2578_v56 }
 0x59c   : > { %4367 = vmatprep.mubr.msk.bf16.mxu0 %vm2066_vm0, %v2579_v3 }
 0x5a3   : > { %4368 = vmatmul.mubr.msk.bf16.gmra.mrb[76].mxu0 %vm2066_vm0, %v2580_v30 }
 0x61d   : > { %v5922_v50 = vpop.f32.mrb[0].mxu1 }
 0x61e   : > { %2216 = vmax.xlane.f32.xlu1 %v5922_v50  ;;  %v5925_v43 = vpop.f32.mrb[1].mxu1 }
 0x61f   : > { %2212 = vmax.xlane.f32.xlu0 %v5925_v43  ;;  %v5928_v20 = vpop.f32.mrb[2].mxu1 }
 0x620   : > { %v5930_v61 = vpop.f32.mrb[3].mxu1 }
 0x622   : > { %2218 = vmax.xlane.f32.xlu1 %v5928_v20 }
 0x623   : > { %2214 = vmax.xlane.f32.xlu0 %v5930_v61 }
 0x625   : > { %v5934_v33 = vpop.f32.mrb[4].mxu1 }
 0x626   : > { %v5936_v37 = vpop.f32.mrb[5].mxu1 }
 0x627   : > { %2220 = vmax.xlane.f32.xlu0 %v5936_v37  ;;  %v5939_v38 = vpop.f32.mrb[6].mxu1 }
 0x628   : > { %v5941_v15 = vpop.f32.mrb[7].mxu1 }
 0x629   : > { %2222 = vmax.xlane.f32.xlu1 %v5941_v15 }
 0x62b   : > { %2224 = vmax.xlane.f32.xlu0 %v5934_v33 }
 0x62d   : > { %2226 = vmax.xlane.f32.xlu1 %v5939_v38  ;;  %v5946_v63 = vpop.f32.mrb[8].mxu1 }
 0x62e   : > { %v5948_v22 = vpop.f32.mrb[9].mxu1 }
 0x62f   : > { %2228 = vmax.xlane.f32.xlu0 %v5948_v22  ;;  %v5951_v19 = vpop.f32.mrb[10].mxu1 }
 0x630   : > { %v5953_v18 = vpop.f32.mrb[11].mxu1 }
 0x631   : > { %2230 = vmax.xlane.f32.xlu1 %v5953_v18 }
 0x633   : > { %2232 = vmax.xlane.f32.xlu0 %v5946_v63 }
 0x635   : > { %2234 = vmax.xlane.f32.xlu1 %v5951_v19  ;;  %v5958_v51 = vpop.f32.mrb[12].mxu1 }
 0x636   : > { %v5960_v29 = vpop.f32.mrb[13].mxu1 }
 0x637   : > { %2236 = vmax.xlane.f32.xlu0 %v5960_v29  ;;  %v5963_v6 = vpop.f32.mrb[14].mxu1 }
 0x638   : > { %v5965_v9 = vpop.f32.mrb[15].mxu1 }
 0x639   : > { %2238 = vmax.xlane.f32.xlu1 %v5965_v9 }
 0x63b   : > { %2240 = vmax.xlane.f32.xlu0 %v5958_v51 }
 0x63d   : > { %2242 = vmax.xlane.f32.xlu1 %v5963_v6 }
 0x65e   : > { %v5970_v10 = vpop.f32.mrb[64].mxu0 }
 0x65f   : > { %v5972_v45 = vpop.f32.mrb[65].mxu0 }
 0x660   : > { %v5974_v7 = vpop.f32.mrb[66].mxu0  ;;  %2702 = vmax.xlane.f32.xlu0 %v5972_v45 }
 0x661   : > { %v5977_v34 = vpop.f32.mrb[67].mxu0 }
 0x662   : > { %2704 = vmax.xlane.f32.xlu1 %v5977_v34 }
 0x664   : > { %2706 = vmax.xlane.f32.xlu0 %v5970_v10 }
 0x666   : > { %v5981_v11 = vpop.f32.mrb[68].mxu0  ;;  %2708 = vmax.xlane.f32.xlu1 %v5974_v7 }
 0x667   : > { %v5984_v2 = vpop.f32.mrb[69].mxu0 }
 0x668   : > { %v5986_v17 = vpop.f32.mrb[70].mxu0  ;;  %2710 = vmax.xlane.f32.xlu0 %v5984_v2 }
 0x669   : > { %v5989_v39 = vpop.f32.mrb[71].mxu0 }
 0x66a   : > { %2712 = vmax.xlane.f32.xlu1 %v5989_v39 }
 0x66c   : > { %2714 = vmax.xlane.f32.xlu0 %v5981_v11 }
 0x66e   : > { %v5993_v57 = vpop.f32.mrb[72].mxu0  ;;  %2716 = vmax.xlane.f32.xlu1 %v5986_v17 }
 0x66f   : > { %v5996_v40 = vpop.f32.mrb[73].mxu0 }
 0x670   : > { %v5998_v55 = vpop.f32.mrb[74].mxu0  ;;  %2718 = vmax.xlane.f32.xlu0 %v5996_v40 }
 0x671   : > { %v6001_v53 = vpop.f32.mrb[75].mxu0 }
 0x672   : > { %2720 = vmax.xlane.f32.xlu1 %v6001_v53 }
 0x674   : > { %2722 = vmax.xlane.f32.xlu0 %v5993_v57 }
 0x676   : > { %v6005_v31 = vpop.f32.mrb[76].mxu0  ;;  %2724 = vmax.xlane.f32.xlu1 %v5998_v55 }
 0x677   : > { %v6008_v12 = vpop.f32.mrb[77].mxu0 }
 0x678   : > { %v6010_v42 = vpop.f32.mrb[78].mxu0  ;;  %2726 = vmax.xlane.f32.xlu0 %v6008_v12 }
 0x679   : > { %v6013_v8 = vpop.f32.mrb[79].mxu0 }
 0x67a   : > { %2728 = vmax.xlane.f32.xlu1 %v6013_v8 }
 0x67c   : > { %2730 = vmax.xlane.f32.xlu0 %v6005_v31 }
 0x67e   : > { %2732 = vmax.xlane.f32.xlu1 %v6010_v42 }
 0x6ab   : > { %v2217_v47 = vpop.xlane.xlu1 %2216 }
 0x6ac   : > { %v2246_v44 = vsub.f32 %v5922_v50, %v2217_v47  ;;  %v2213_v46 = vpop.xlane.xlu0 %2212 }
 0x6ad   : > { %v2244_v1 = vsub.f32 %v5925_v43, %v2213_v46 }
 0x6ae   : > { %v2264_v24 = vmul.f32 1.442695, %v2246_v44 }
 0x6af   : > { %v2260_v48 = vmul.f32 1.442695, %v2244_v1  ;;  %v2219_v59 = vpop.xlane.xlu1 %2218 }
 0x6b0   : > { %v2247_v56 = vsub.f32 %v5928_v20, %v2219_v59  ;;  %v2215_v21 = vpop.xlane.xlu0 %2214 }
 0x6b1   : > { %4588 = vpow2.f32 %v2260_v48  ;;  %v2245_v16 = vsub.f32 %v5930_v61, %v2215_v21 }
 0x6b2   : > { %4590 = vpow2.f32 %v2264_v24  ;;  %v2266_v23 = vmul.f32 1.442695, %v2247_v56 }
 0x6b3   : > { %v2262_v26 = vmul.f32 1.442695, %v2245_v16 }
 0x6b4   : > { %v2221_v14 = vpop.xlane.xlu0 %2220 }
 0x6b5   : > { %4592 = vpow2.f32 %v2262_v26  ;;  %v2248_v58 = vsub.f32 %v5936_v37, %v2221_v14 }
 0x6b6   : > { %v2223_v32 = vpop.xlane.xlu1 %2222  ;;  %4594 = vpow2.f32 %v2266_v23 }
 0x6b7   : > { %v2268_v5 = vmul.f32 1.442695, %v2248_v58  ;;  %v2249_v62 = vsub.f32 %v5941_v15, %v2223_v32 }
 0x6b8   : > { %v2225_v28 = vpop.xlane.xlu0 %2224 }
 0x6b9   : > { %4596 = vpow2.f32 %v2268_v5  ;;  %v2270_v3 = vmul.f32 1.442695, %v2249_v62  ;;  %v2250_v60 = vsub.f32 %v5934_v33, %v2225_v28 }
 0x6ba   : > { %v2227_v30 = vpop.xlane.xlu1 %2226 }
 0x6bb   : > { %v6025_v4 = vpop.eup %4588  ;;  %v2272_v50 = vmul.f32 1.442695, %v2250_v60  ;;  %v2251_v43 = vsub.f32 %v5939_v38, %v2227_v30  ;;  %4598 = vpow2.f32 %v2270_v3 }
 0x6bc   : > { %v2229_v20 = vpop.xlane.xlu0 %2228  ;;  %2292 = vadd.xlane.f32.xlu0 %v6025_v4  ;;  %v6030_v15 = vpop.eup %4590 }
 0x6bd   : > { %4600 = vpow2.f32 %v2272_v50  ;;  %v2274_v61 = vmul.f32 1.442695, %v2251_v43  ;;  %v2252_v37 = vsub.f32 %v5948_v22, %v2229_v20 }
 0x6be   : > { %v2231_v47 = vpop.xlane.xlu1 %2230 }
 0x6bf   : > { %v6032_v44 = vpop.eup %4592  ;;  %v2276_v33 = vmul.f32 1.442695, %v2252_v37  ;;  %v2253_v46 = vsub.f32 %v5953_v18, %v2231_v47  ;;  %4602 = vpow2.f32 %v2274_v61 }
 0x6c0   : > { %v2233_v1 = vpop.xlane.xlu0 %2232  ;;  %2296 = vadd.xlane.f32.xlu0 %v6030_v15  ;;  %2294 = vadd.xlane.f32.xlu1 %v6032_v44  ;;  %v6038_v59 = vpop.eup %4594 }
 0x6c1   : > { %4604 = vpow2.f32 %v2276_v33  ;;  %v2278_v38 = vmul.f32 1.442695, %v2253_v46  ;;  %v2254_v48 = vsub.f32 %v5946_v63, %v2233_v1 }
 0x6c2   : > { %v2235_v22 = vpop.xlane.xlu1 %2234 }
 0x6c3   : > { %v6040_v24 = vpop.eup %4596  ;;  %v2280_v56 = vmul.f32 1.442695, %v2254_v48  ;;  %v2255_v21 = vsub.f32 %v5951_v19, %v2235_v22  ;;  %4606 = vpow2.f32 %v2278_v38 }
 0x6c4   : > { %2300 = vadd.xlane.f32.xlu0 %v6040_v24  ;;  %v2237_v18 = vpop.xlane.xlu0 %2236  ;;  %2298 = vadd.xlane.f32.xlu1 %v6038_v59 }
 0x6c5   : > { %4608 = vpow2.f32 %v2280_v56  ;;  %v2282_v16 = vmul.f32 1.442695, %v2255_v21  ;;  %v2256_v26 = vsub.f32 %v5960_v29, %v2237_v18  ;;  %v6046_v23 = vpop.eup %4598 }
 0x6c6   : > { %v2239_v63 = vpop.xlane.xlu1 %2238 }
 0x6c7   : > { %v6048_v14 = vpop.eup %4600  ;;  %v2284_v58 = vmul.f32 1.442695, %v2256_v26  ;;  %v2257_v32 = vsub.f32 %v5965_v9, %v2239_v63  ;;  %4610 = vpow2.f32 %v2282_v16 }
 0x6c8   : > { %2304 = vadd.xlane.f32.xlu0 %v6048_v14  ;;  %v2241_v19 = vpop.xlane.xlu0 %2240  ;;  %2302 = vadd.xlane.f32.xlu1 %v6046_v23 }
 0x6c9   : > { %4612 = vpow2.f32 %v2284_v58  ;;  %v2286_v5 = vmul.f32 1.442695, %v2257_v32  ;;  %v2258_v62 = vsub.f32 %v5958_v51, %v2241_v19  ;;  %v6054_v28 = vpop.eup %4602 }
 0x6ca   : > { %v2243_v29 = vpop.xlane.xlu1 %2242 }
 0x6cb   : > { %v6056_v3 = vpop.eup %4604  ;;  %v2288_v60 = vmul.f32 1.442695, %v2258_v62  ;;  %v2259_v30 = vsub.f32 %v5963_v6, %v2243_v29  ;;  %4614 = vpow2.f32 %v2286_v5 }
 0x6cc   : > { %2308 = vadd.xlane.f32.xlu0 %v6056_v3  ;;  %2306 = vadd.xlane.f32.xlu1 %v6054_v28 }
 0x6cd   : > { %4616 = vpow2.f32 %v2288_v60  ;;  %v2290_v9 = vmul.f32 1.442695, %v2259_v30  ;;  %v6061_v50 = vpop.eup %4606 }
 0x6cf   : > { %v6063_v43 = vpop.eup %4608  ;;  %4618 = vpow2.f32 %v2290_v9 }
 0x6d0   : > { %2312 = vadd.xlane.f32.xlu0 %v6063_v43  ;;  %2310 = vadd.xlane.f32.xlu1 %v6061_v50 }
 0x6d1   : > { %v6067_v51 = vpop.eup %4610 }
 0x6d3   : > { %v6069_v20 = vpop.eup %4612 }
 0x6d4   : > { %2316 = vadd.xlane.f32.xlu0 %v6069_v20  ;;  %2314 = vadd.xlane.f32.xlu1 %v6067_v51 }
 0x6d5   : > { %v6073_v6 = vpop.eup %4614 }
 0x6d7   : > { %v6075_v61 = vpop.eup %4616 }
 0x6d8   : > { %2320 = vadd.xlane.f32.xlu0 %v6075_v61  ;;  %2318 = vadd.xlane.f32.xlu1 %v6073_v6 }
 0x6d9   : > { %v6079_v37 = vpop.eup %4618 }
 0x6dc   : > { %2322 = vadd.xlane.f32.xlu1 %v6079_v37 }
 0x6ed   : > { %v2703_v47 = vpop.xlane.xlu0 %2702 }
 0x6ee   : > { %v2734_v33 = vsub.f32 %v5972_v45, %v2703_v47 }
 0x6ef   : > { %v2705_v46 = vpop.xlane.xlu1 %2704 }
 0x6f0   : > { %v2750_v1 = vmul.f32 1.442695, %v2734_v33  ;;  %v2735_v38 = vsub.f32 %v5977_v34, %v2705_v46 }
 0x6f1   : > { %v2707_v48 = vpop.xlane.xlu0 %2706 }
 0x6f2   : > { %4620 = vpow2.f32 %v2750_v1  ;;  %v2752_v22 = vmul.f32 1.442695, %v2735_v38  ;;  %v2736_v56 = vsub.f32 %v5970_v10, %v2707_v48 }
 0x6f3   : > { %v2709_v21 = vpop.xlane.xlu1 %2708 }
 0x6f4   : > { %4622 = vpow2.f32 %v2752_v22  ;;  %v2754_v18 = vmul.f32 1.442695, %v2736_v56  ;;  %v2737_v16 = vsub.f32 %v5974_v7, %v2709_v21 }
 0x6f5   : > { %v2711_v26 = vpop.xlane.xlu0 %2710 }
 0x6f6   : > { %4624 = vpow2.f32 %v2754_v18  ;;  %v2756_v63 = vmul.f32 1.442695, %v2737_v16  ;;  %v2738_v58 = vsub.f32 %v5984_v2, %v2711_v26 }
 0x6f7   : > { %v2713_v45 = vpop.xlane.xlu1 %2712 }
 0x6f8   : > { %4626 = vpow2.f32 %v2756_v63  ;;  %v2758_v32 = vmul.f32 1.442695, %v2738_v58  ;;  %v2739_v34 = vsub.f32 %v5989_v39, %v2713_v45 }
 0x6f9   : > { %v2715_v19 = vpop.xlane.xlu0 %2714 }
 0x6fa   : > { %4628 = vpow2.f32 %v2758_v32  ;;  %v2760_v5 = vmul.f32 1.442695, %v2739_v34  ;;  %v2740_v10 = vsub.f32 %v5981_v11, %v2715_v19 }
 0x6fb   : > { %v2717_v62 = vpop.xlane.xlu1 %2716 }
 0x6fc   : > { %v6089_v29 = vpop.eup %4620  ;;  %4630 = vpow2.f32 %v2760_v5  ;;  %v2762_v7 = vmul.f32 1.442695, %v2740_v10  ;;  %v2741_v60 = vsub.f32 %v5986_v17, %v2717_v62 }
 0x6fd   : > { %2782 = vadd.xlane.f32.xlu0 %v6089_v29  ;;  %v2719_v2 = vpop.xlane.xlu0 %2718 }
 0x6fe   : > { %v6093_v30 = vpop.eup %4622  ;;  %4632 = vpow2.f32 %v2762_v7  ;;  %v2764_v9 = vmul.f32 1.442695, %v2741_v60  ;;  %v2742_v39 = vsub.f32 %v5996_v40, %v2719_v2 }
 0x6ff   : > { %2784 = vadd.xlane.f32.xlu1 %v6093_v30  ;;  %v2721_v47 = vpop.xlane.xlu1 %2720 }
 0x700   : > { %v6097_v11 = vpop.eup %4624  ;;  %4634 = vpow2.f32 %v2764_v9  ;;  %v2766_v33 = vmul.f32 1.442695, %v2742_v39  ;;  %v2743_v46 = vsub.f32 %v6001_v53, %v2721_v47 }
 0x701   : > { %2786 = vadd.xlane.f32.xlu0 %v6097_v11  ;;  %v2723_v17 = vpop.xlane.xlu0 %2722 }
 0x702   : > { %v6101_v1 = vpop.eup %4626  ;;  %4636 = vpow2.f32 %v2766_v33  ;;  %v2768_v38 = vmul.f32 1.442695, %v2743_v46  ;;  %v2744_v48 = vsub.f32 %v5993_v57, %v2723_v17 }
 0x703   : > { %2788 = vadd.xlane.f32.xlu1 %v6101_v1  ;;  %v2725_v40 = vpop.xlane.xlu1 %2724 }
 0x704   : > { %v6105_v22 = vpop.eup %4628  ;;  %4638 = vpow2.f32 %v2768_v38  ;;  %v2770_v56 = vmul.f32 1.442695, %v2744_v48  ;;  %v2745_v21 = vsub.f32 %v5998_v55, %v2725_v40 }
 0x705   : > { %2790 = vadd.xlane.f32.xlu0 %v6105_v22  ;;  %v2727_v53 = vpop.xlane.xlu0 %2726 }
 0x706   : > { %v6109_v18 = vpop.eup %4630  ;;  %4640 = vpow2.f32 %v2770_v56  ;;  %v2772_v16 = vmul.f32 1.442695, %v2745_v21  ;;  %v2746_v26 = vsub.f32 %v6008_v12, %v2727_v53 }
 0x707   : > { %2792 = vadd.xlane.f32.xlu1 %v6109_v18  ;;  %v2729_v57 = vpop.xlane.xlu1 %2728 }
 0x708   : > { %v6113_v63 = vpop.eup %4632  ;;  %4642 = vpow2.f32 %v2772_v16  ;;  %v2774_v58 = vmul.f32 1.442695, %v2746_v26  ;;  %v2747_v45 = vsub.f32 %v6013_v8, %v2729_v57 }
 0x709   : > { %2794 = vadd.xlane.f32.xlu0 %v6113_v63  ;;  %v2731_v55 = vpop.xlane.xlu0 %2730 }
 0x70a   : > { %v6117_v32 = vpop.eup %4634  ;;  %4644 = vpow2.f32 %v2774_v58  ;;  %v2776_v34 = vmul.f32 1.442695, %v2747_v45  ;;  %v2748_v19 = vsub.f32 %v6005_v31, %v2731_v55 }
 0x70b   : > { %2796 = vadd.xlane.f32.xlu1 %v6117_v32  ;;  %v2733_v12 = vpop.xlane.xlu1 %2732 }
 0x70c   : > { %v6121_v5 = vpop.eup %4636  ;;  %4646 = vpow2.f32 %v2776_v34  ;;  %v2778_v10 = vmul.f32 1.442695, %v2748_v19  ;;  %v2749_v62 = vsub.f32 %v6010_v42, %v2733_v12 }
 0x70d   : > { %2798 = vadd.xlane.f32.xlu0 %v6121_v5 }
 0x70e   : > { %v6125_v8 = vpop.eup %4638  ;;  %4648 = vpow2.f32 %v2778_v10  ;;  %v2780_v7 = vmul.f32 1.442695, %v2749_v62 }
 0x70f   : > { %2800 = vadd.xlane.f32.xlu1 %v6125_v8 }
 0x710   : > { %v6128_v60 = vpop.eup %4640  ;;  %4650 = vpow2.f32 %v2780_v7 }
 0x711   : > { %2802 = vadd.xlane.f32.xlu0 %v6128_v60 }
 0x712   : > { %v6131_v31 = vpop.eup %4642 }
 0x713   : > { %2804 = vadd.xlane.f32.xlu1 %v6131_v31 }
 0x714   : > { %v6134_v2 = vpop.eup %4644 }
 0x715   : > { %2806 = vadd.xlane.f32.xlu0 %v6134_v2 }
 0x716   : > { %v6137_v42 = vpop.eup %4646 }
 0x717   : > { %2808 = vadd.xlane.f32.xlu1 %v6137_v42 }
 0x718   : > { %v6140_v9 = vpop.eup %4648 }
 0x719   : > { %2810 = vadd.xlane.f32.xlu0 %v6140_v9 }
 0x71a   : > { %v6143_v39 = vpop.eup %4650 }
 0x71b   : > { %2812 = vadd.xlane.f32.xlu1 %v6143_v39 }
 0x749   : > { %v2293_v47 = vpop.xlane.xlu0 %2292 }
 0x74a   : > { %4652 = vrcp.f32 %v2293_v47 }
 0x74d   : > { %v2297_v33 = vpop.xlane.xlu0 %2296  ;;  %v2295_v46 = vpop.xlane.xlu1 %2294 }
 0x74e   : > { %4654 = vrcp.f32 %v2297_v33 }
 0x74f   : > { %4656 = vrcp.f32 %v2295_v46 }
 0x751   : > { %v2301_v17 = vpop.xlane.xlu0 %2300  ;;  %v2299_v38 = vpop.xlane.xlu1 %2298 }
 0x752   : > { %4658 = vrcp.f32 %v2301_v17 }
 0x753   : > { %4660 = vrcp.f32 %v2299_v38 }
 0x754   : > { %v4653_v56 = vpop.eup %4652 }
 0x755   : > { %v2305_v48 = vpop.xlane.xlu0 %2304  ;;  %v2303_v40 = vpop.xlane.xlu1 %2302  ;;  %v6147_v57 = vmul.f32 %v4653_v56, %v6025_v4 }
 0x756   : > { %4662 = vrcp.f32 %v2305_v48 }
 0x757   : > { %4664 = vrcp.f32 %v2303_v40 }
 0x758   : > { %v4655_v21 = vpop.eup %4654 }
 0x759   : > { %v4657_v53 = vpop.eup %4656  ;;  %v2309_v16 = vpop.xlane.xlu0 %2308  ;;  %v6153_v55 = vmul.f32 %v4655_v21, %v6030_v15 }
 0x75a   : > { %v2307_v26 = vpop.xlane.xlu1 %2306  ;;  %4666 = vrcp.f32 %v2309_v16  ;;  %v6150_v58 = vmul.f32 %v4657_v53, %v6032_v44 }
 0x75b   : > { %4668 = vrcp.f32 %v2307_v26 }
 0x75c   : > { %v4659_v45 = vpop.eup %4658  ;;  %v2356_v34 = vadd.f32 %v6150_v58, %v6147_v57 }
 0x75d   : > { %v4661_v19 = vpop.eup %4660  ;;  %v2313_v12 = vpop.xlane.xlu0 %2312  ;;  %v6162_v7 = vmul.f32 %v4659_v45, %v6040_v24 }
 0x75e   : > { %v2311_v10 = vpop.xlane.xlu1 %2310  ;;  %v6158_v62 = vmul.f32 %v4661_v19, %v6038_v59  ;;  %4670 = vrcp.f32 %v2313_v12  ;;  %v2357_v4 = vadd.f32 %v2356_v34, %v6153_v55 }
 0x75f   : > { %4672 = vrcp.f32 %v2311_v10 }
 0x760   : > { %v4663_v44 = vpop.eup %4662  ;;  %v2358_v15 = vadd.f32 %v2357_v4, %v6158_v62 }
 0x761   : > { %v4665_v47 = vpop.eup %4664  ;;  %v2317_v33 = vpop.xlane.xlu0 %2316  ;;  %v6170_v48 = vmul.f32 %v4663_v44, %v6048_v14 }
 0x762   : > { %v2315_v46 = vpop.xlane.xlu1 %2314  ;;  %v6166_v17 = vmul.f32 %v4665_v47, %v6046_v23  ;;  %4674 = vrcp.f32 %v2317_v33  ;;  %v2359_v59 = vadd.f32 %v2358_v15, %v6162_v7 }
 0x763   : > { %4676 = vrcp.f32 %v2315_v46 }
 0x764   : > { %v4667_v38 = vpop.eup %4666  ;;  %v2360_v40 = vadd.f32 %v2359_v59, %v6166_v17 }
 0x765   : > { %v4669_v24 = vpop.eup %4668  ;;  %v2321_v56 = vpop.xlane.xlu0 %2320  ;;  %v6178_v26 = vmul.f32 %v4667_v38, %v6056_v3 }
 0x766   : > { %v2319_v21 = vpop.xlane.xlu1 %2318  ;;  %v6174_v53 = vmul.f32 %v4669_v24, %v6054_v28  ;;  %4678 = vrcp.f32 %v2321_v56  ;;  %v2361_v23 = vadd.f32 %v2360_v40, %v6170_v48 }
 0x767   : > { %4680 = vrcp.f32 %v2319_v21 }
 0x768   : > { %v4671_v16 = vpop.eup %4670  ;;  %v2362_v45 = vadd.f32 %v2361_v23, %v6174_v53 }
 0x769   : > { %v4673_v14 = vpop.eup %4672  ;;  %v6186_v10 = vmul.f32 %v4671_v16, %v6063_v43 }
 0x76a   : > { %v2323_v34 = vpop.xlane.xlu1 %2322  ;;  %v6182_v19 = vmul.f32 %v4673_v14, %v6061_v50  ;;  %v2363_v12 = vadd.f32 %v2362_v45, %v6178_v26 }
 0x76b   : > { %4682 = vrcp.f32 %v2323_v34 }
 0x76c   : > { %v4675_v28 = vpop.eup %4674  ;;  %v2364_v4 = vadd.f32 %v2363_v12, %v6182_v19 }
 0x76d   : > { %v4677_v44 = vpop.eup %4676  ;;  %v6194_v33 = vmul.f32 %v4675_v28, %v6069_v20 }
 0x76e   : > { %v6190_v3 = vmul.f32 %v4677_v44, %v6067_v51  ;;  %v2365_v15 = vadd.f32 %v2364_v4, %v6186_v10 }
 0x770   : > { %v4679_v47 = vpop.eup %4678  ;;  %v2366_v50 = vadd.f32 %v2365_v15, %v6190_v3 }
 0x771   : > { %v4681_v46 = vpop.eup %4680  ;;  %v6202_v40 = vmul.f32 %v4679_v47, %v6075_v61 }
 0x772   : > { %v6198_v59 = vmul.f32 %v4681_v46, %v6073_v6  ;;  %v2367_v43 = vadd.f32 %v2366_v50, %v6194_v33 }
 0x774   : > { %v2368_v51 = vadd.f32 %v2367_v43, %v6198_v59 }
 0x775   : > { %v4683_v38 = vpop.eup %4682 }
 0x776   : > { %v6206_v24 = vmul.f32 %v4683_v38, %v6079_v37  ;;  %v2369_v20 = vadd.f32 %v2368_v51, %v6202_v40 }
 0x778   : > { %v2370_v56 = vadd.f32 %v2369_v20, %v6206_v24 }
 0x77a   : > { %v2371_v21 = vrot.slane %v2370_v56, 4 }
 0x77c   : > { %v2372_v23 = vadd.f32 %v2371_v21, %v2370_v56 }
 0x77e   : > { %v2373_v16 = vrot.slane %v2372_v23, 2 }
 0x780   : > { %v2374_v6 = vadd.f32 %v2373_v16, %v2372_v23 }
 0x782   : > { %v2375_v45 = vrot.slane %v2374_v6, 1 }
 0x784   : > { %v2376_v14 = vadd.f32 %v2375_v45, %v2374_v6 }
 0x786   : > { %v2377_v34 = vadd.f32 1e-09, %v2376_v14 }
 0x788   : > { %4684 = vrcp.f32 %v2377_v34 }
 0x78a   : > { %v2783_v12 = vpop.xlane.xlu0 %2782 }
 0x78b   : > { %4686 = vrcp.f32 %v2783_v12 }
 0x78c   : > { %v2785_v61 = vpop.xlane.xlu1 %2784 }
 0x78d   : > { %4688 = vrcp.f32 %v2785_v61 }
 0x78e   : > { %v2787_v28 = vpop.xlane.xlu0 %2786 }
 0x78f   : > { %4690 = vrcp.f32 %v2787_v28 }
 0x790   : > { %v2789_v37 = vpop.xlane.xlu1 %2788 }
 0x791   : > { %4692 = vrcp.f32 %v2789_v37 }
 0x792   : > { %v6210_v4 = vpop.eup %4684  ;;  %v2791_v44 = vpop.xlane.xlu0 %2790 }
 0x793   : > { %4694 = vrcp.f32 %v2791_v44  ;;  %v2379_v15 = vmul.f32 %v6210_v4, %v6147_v57  ;;  %v2380_v47 = vmul.f32 %v6210_v4, %v6150_v58  ;;  %v2381_v43 = vmul.f32 %v6210_v4, %v6153_v55 }
 0x794   : > { %v2793_v50 = vpop.xlane.xlu1 %2792  ;;  %v2382_v38 = vmul.f32 %v6210_v4, %v6158_v62  ;;  %v2383_v57 = vmul.f32 %v6210_v4, %v6162_v7  ;;  %v2384_v58 = vmul.f32 %v6210_v4, %v6166_v17 }
 0x795   : > { %4696 = vrcp.f32 %v2793_v50  ;;  %v2395_v46 = vpack.c.bf16 %v2380_v47, %v2379_v15  ;;  %v4687_v51 = vpop.eup %4686  ;;  %v2387_v47 = vmul.f32 %v6210_v4, %v6178_v26 }
 0x796   : > { %v2795_v20 = vpop.xlane.xlu0 %2794  ;;  %v2396_v16 = vpack.c.bf16 %v2382_v38, %v2381_v43  ;;  %v6225_v55 = vmul.f32 %v4687_v51, %v6089_v29  ;;  %v2385_v29 = vmul.f32 %v6210_v4, %v6170_v48 }
 0x797   : > { %v4689_v56 = vpop.eup %4688  ;;  %4698 = vrcp.f32 %v2795_v20  ;;  %2411 = vxpose.xlu0.c.b16.start [1/8] %v2395_v46, 128 }
 0x798   : > { %v2797_v21 = vpop.xlane.xlu1 %2796  ;;  %v6228_v62 = vmul.f32 %v4689_v56, %v6093_v30  ;;  %v2397_v30 = vpack.c.bf16 %v2384_v58, %v2383_v57  ;;  %v2389_v56 = vmul.f32 %v6210_v4, %v6186_v10 }
 0x799   : > { %v4691_v23 = vpop.eup %4690  ;;  %4700 = vrcp.f32 %v2797_v21 }
 0x79a   : > { %v2799_v6 = vpop.xlane.xlu0 %2798  ;;  %v6231_v45 = vmul.f32 %v4691_v23, %v6097_v11  ;;  %v2846_v7 = vadd.f32 %v6228_v62, %v6225_v55  ;;  %v2386_v11 = vmul.f32 %v6210_v4, %v6174_v53 }
 0x79b   : > { %v4693_v14 = vpop.eup %4692  ;;  %4702 = vrcp.f32 %v2799_v6  ;;  %2412 = vxpose.xlu0.c.b16.cont [2/8] %v2396_v16, 128 }
 0x79c   : > { %v6236_v17 = vmul.f32 %v4693_v14, %v6101_v1  ;;  %v2801_v34 = vpop.xlane.xlu1 %2800  ;;  %v2847_v61 = vadd.f32 %v2846_v7, %v6231_v45  ;;  %v2398_v53 = vpack.c.bf16 %v2386_v11, %v2385_v29  ;;  %v2391_v14 = vmul.f32 %v6210_v4, %v6194_v33 }
 0x79d   : > { %v4695_v12 = vpop.eup %4694  ;;  %4704 = vrcp.f32 %v2801_v34  ;;  %v2393_v33 = vmul.f32 %v6210_v4, %v6202_v40 }
 0x79e   : > { %v6244_v28 = vmul.f32 %v4695_v12, %v6105_v22  ;;  %v2803_v37 = vpop.xlane.xlu0 %2802  ;;  %v2848_v1 = vadd.f32 %v2847_v61, %v6236_v17  ;;  %v2388_v22 = vmul.f32 %v6210_v4, %v6182_v19 }
 0x79f   : > { %v4697_v44 = vpop.eup %4696  ;;  %4706 = vrcp.f32 %v2803_v37  ;;  %2413 = vxpose.xlu0.c.b16.cont [3/8] %v2397_v30, 128  ;;  %v2394_v37 = vmul.f32 %v6210_v4, %v6206_v24 }
 0x7a0   : > { %v6248_v15 = vmul.f32 %v4697_v44, %v6109_v18  ;;  %v2805_v48 = vpop.xlane.xlu1 %2804  ;;  %v2849_v46 = vadd.f32 %v2848_v1, %v6244_v28  ;;  %v2399_v19 = vpack.c.bf16 %v2388_v22, %v2387_v47 }
 0x7a1   : > { %v4699_v50 = vpop.eup %4698  ;;  %4708 = vrcp.f32 %v2805_v48 }
 0x7a2   : > { %v6256_v43 = vmul.f32 %v4699_v50, %v6113_v63  ;;  %v2807_v38 = vpop.xlane.xlu0 %2806  ;;  %v2850_v18 = vadd.f32 %v2849_v46, %v6248_v15  ;;  %v2390_v63 = vmul.f32 %v6210_v4, %v6190_v3  ;;  %v2402_v50 = vpack.c.bf16 %v2394_v37, %v2393_v33 }
 0x7a3   : > { %v4701_v51 = vpop.eup %4700  ;;  %4710 = vrcp.f32 %v2807_v38  ;;  %2414 = vxpose.xlu0.c.b16.cont [4/8] %v2398_v53, 128 }
 0x7a4   : > { %v6260_v20 = vmul.f32 %v4701_v51, %v6117_v32  ;;  %v2809_v26 = vpop.xlane.xlu1 %2808  ;;  %v2851_v57 = vadd.f32 %v2850_v18, %v6256_v43  ;;  %v2400_v3 = vpack.c.bf16 %v2390_v63, %v2389_v56 }
 0x7a5   : > { %v4703_v21 = vpop.eup %4702  ;;  %4712 = vrcp.f32 %v2809_v26 }
 0x7a6   : > { %v6268_v58 = vmul.f32 %v4703_v21, %v6121_v5  ;;  %v2811_v23 = vpop.xlane.xlu0 %2810  ;;  %v2852_v32 = vadd.f32 %v2851_v57, %v6260_v20  ;;  %v2392_v5 = vmul.f32 %v6210_v4, %v6198_v59 }
 0x7a7   : > { %v4705_v16 = vpop.eup %4704  ;;  %4714 = vrcp.f32 %v2811_v23  ;;  %2415 = vxpose.xlu0.c.b16.cont [5/8] %v2399_v19, 128 }
 0x7a8   : > { %v6272_v6 = vmul.f32 %v4705_v16, %v6125_v8  ;;  %v2813_v10 = vpop.xlane.xlu1 %2812  ;;  %v2853_v34 = vadd.f32 %v2852_v32, %v6268_v58  ;;  %v2401_v61 = vpack.c.bf16 %v2392_v5, %v2391_v14  ;;  %v6300_v14 = vld [vmem:[%s4901_s11 + $0x8] sm:$0xff]  }
 0x7a9   : > { %v4707_v7 = vpop.eup %4706  ;;  %4716 = vrcp.f32 %v2813_v10  ;;  %v6297_v10 = vld [vmem:[%s4901_s11] sm:$0xff]  }
 0x7aa   : > { %v2835_v29 = vmul.f32 %v4707_v7, %v6128_v60  ;;  %v2854_v30 = vadd.f32 %v2853_v34, %v6272_v6  ;;  %4403 = vmatprep.subr.bf16.mxu0 %v6297_v10 }
 0x7ab   : > { %v4709_v12 = vpop.eup %4708  ;;  %2416 = vxpose.xlu0.c.b16.cont [6/8] %v2400_v3, 128  ;;  %4404 = vmatpush3.bf16.msra.mxu0 %v6297_v10  ;;  %v6315_v3 = vld [vmem:[%s4901_s11 + $0x18] sm:$0xff]  }
 0x7ac   : > { %v2837_v8 = vmul.f32 %v4709_v12, %v6131_v31  ;;  %v2855_v44 = vadd.f32 %v2854_v30, %v2835_v29  ;;  %4405 = vmatprep.subr.bf16.mxu0 %v6300_v14 }
 0x7ad   : > { %v4711_v11 = vpop.eup %4710 }
 0x7ae   : > { %v2839_v59 = vmul.f32 %v4711_v11, %v6134_v2  ;;  %v2856_v60 = vadd.f32 %v2855_v44, %v2837_v8 }
 0x7af   : > { %v4713_v1 = vpop.eup %4712  ;;  %2417 = vxpose.xlu0.c.b16.cont [7/8] %v2401_v61, 128  ;;  %4406 = vmatpush3.bf16.msra.mxu0 %v6300_v14 }
 0x7b0   : > { %v2841_v48 = vmul.f32 %v4713_v1, %v6137_v42  ;;  %v2857_v53 = vadd.f32 %v2856_v60, %v2839_v59 }
 0x7b1   : > { %v4715_v47 = vpop.eup %4714 }
 0x7b2   : > { %v2843_v31 = vmul.f32 %v4715_v47, %v6140_v9  ;;  %v2858_v46 = vadd.f32 %v2857_v53, %v2841_v48  ;;  %v4585_v47 = vld [vmem:[%s4901_s11 + $0x28] sm:$0xff]   ;;  %v4587_v53 = vld [vmem:[%s4901_s11 + $0x38] sm:$0xff]  }
 0x7b3   : > { %v4717_v22 = vpop.eup %4716  ;;  %2418 = vxpose.xlu0.c.b16.end [8/8] %v2402_v50, 128  ;;  %v4586_v50 = vld [vmem:[%s4901_s11 + $0x30] sm:$0xff]  }
 0x7b4   : > { %v2845_v40 = vmul.f32 %v4717_v22, %v6143_v39  ;;  %v2859_v38 = vadd.f32 %v2858_v46, %v2843_v31  ;;  %v6349_v22 = vld [vmem:[#allocation2] sm:$0xff] }
 0x7b6   : > { %v2860_v24 = vadd.f32 %v2859_v38, %v2845_v40 }
 0x7b8   : > { %v2861_v4 = vrot.slane %v2860_v24, 4 }
 0x7ba   : > { %v2862_v51 = vadd.f32 %v2861_v4, %v2860_v24  ;;  %v6354_v4 = vld [vmem:[#allocation2 + $0x8] sm:$0xff] }
 0x7bc   : > { %v2863_v2 = vrot.slane %v2862_v51, 2 }
 0x7be   : > { %v2864_v18 = vadd.f32 %v2863_v2, %v2862_v51 }
 0x7c0   : > { %v2865_v26 = vrot.slane %v2864_v18, 1 }
 0x7c2   : > { %v2866_v42 = vadd.f32 %v2865_v26, %v2864_v18 }
 0x7c4   : > { %v2867_v56 = vadd.f32 1e-09, %v2866_v42 }
 0x7c6   : > { %4718 = vrcp.f32 %v2867_v56 }
 0x7d0   : > { %v4719_v21 = vpop.eup %4718 }
 0x7d1   : > { %v2869_v9 = vmul.f32 %v4719_v21, %v6225_v55  ;;  %v2870_v19 = vmul.f32 %v4719_v21, %v6228_v62  ;;  %v2871_v39 = vmul.f32 %v4719_v21, %v6231_v45  ;;  %v2872_v57 = vmul.f32 %v4719_v21, %v6236_v17  ;;  %v6308_v17 = vld [vmem:[%s4901_s11 + $0x10] sm:$0xff]  }
 0x7d2   : > { %v2873_v16 = vmul.f32 %v4719_v21, %v6244_v28  ;;  %v2874_v32 = vmul.f32 %v4719_v21, %v6248_v15  ;;  %v2875_v62 = vmul.f32 %v4719_v21, %v6256_v43  ;;  %v2876_v45 = vmul.f32 %v4719_v21, %v6260_v20  ;;  %4407 = vmatprep.subr.bf16.mxu0 %v6308_v17 }
 0x7d3   : > { %v2885_v63 = vpack.c.bf16 %v2870_v19, %v2869_v9  ;;  %v2886_v23 = vpack.c.bf16 %v2872_v57, %v2871_v39  ;;  %v2877_v15 = vmul.f32 %v4719_v21, %v6268_v58  ;;  %v2878_v7 = vmul.f32 %v4719_v21, %v6272_v6  ;;  %4408 = vmatpush3.bf16.msra.mxu0 %v6308_v17  ;;  %v6359_v19 = vld [vmem:[#allocation2 + $0x20] sm:$0xff]  ;;  %v2531_v39 = vld [vmem:[#allocation2 + $0x38] sm:$0xff] }
 0x7d4   : > { %v2887_v55 = vpack.c.bf16 %v2874_v32, %v2873_v16  ;;  %v2888_v28 = vpack.c.bf16 %v2876_v45, %v2875_v62  ;;  %v2879_v20 = vmul.f32 %v4719_v21, %v2835_v29  ;;  %v2880_v5 = vmul.f32 %v4719_v21, %v2837_v8  ;;  %4409 = vmatprep.subr.bf16.mxu0 %v6315_v3  ;;  %v6361_v16 = vld [vmem:[#allocation2 + $0x28] sm:$0xff] }
 0x7d5   : > { %2902 = vxpose.xlu1.c.b16.start [1/8] %v2885_v63, 128  ;;  %v2889_v43 = vpack.c.bf16 %v2878_v7, %v2877_v15  ;;  %v2881_v12 = vmul.f32 %v4719_v21, %v2839_v59  ;;  %v2882_v58 = vmul.f32 %v4719_v21, %v2841_v48  ;;  %v2883_v30 = vmul.f32 %v4719_v21, %v2843_v31  ;;  %v4584_v48 = vld [vmem:[%s4901_s11 + $0x20] sm:$0xff]   ;;  %v6347_v31 = vld [vmem:[#allocation2 + $0x10] sm:$0xff] }
 0x7d6   : > { %v2890_v34 = vpack.c.bf16 %v2880_v5, %v2879_v20  ;;  %v2884_v11 = vmul.f32 %v4719_v21, %v2845_v40  ;;  %v6351_v40 = vld [vmem:[#allocation2 + $0x18] sm:$0xff]  ;;  %v2530_v21 = vld [vmem:[#allocation2 + $0x30] sm:$0xff]  ;;  %v6365_v15 = vld [vmem:[#allocation2 + $0x40] sm:$0xff] }
 0x7d7   : > { %4410 = vmatpush3.bf16.msra.mxu0 %v6315_v3  ;;  %v2891_v6 = vpack.c.bf16 %v2882_v58, %v2881_v12  ;;  %6964 = vst [vmem:[#allocation19_spill] sm:$0xff] %v6365_v15  ;;  %v6367_v5 = vld [vmem:[#allocation2 + $0x48] sm:$0xff] }
 0x7d8   : > { %v2892_v61 = vpack.c.bf16 %v2884_v11, %v2883_v30  ;;  %4411 = vmatprep.subr.bf16.mxu0 %v4584_v48  ;;  %6965 = vst [vmem:[#allocation20_spill] sm:$0xff] %v6367_v5 }
 0x7d9   : > { %2903 = vxpose.xlu1.c.b16.cont [2/8] %v2886_v23, 128 }
 0x7db   : > { %4412 = vmatpush3.bf16.msra.mxu0 %v4584_v48 }
 0x7dc   : > { %4413 = vmatprep.subr.bf16.mxu0 %v4585_v47 }
 0x7dd   : > { %2904 = vxpose.xlu1.c.b16.cont [3/8] %v2887_v55, 128 }
 0x7df   : > { %4414 = vmatpush3.bf16.msra.mxu0 %v4585_v47 }
 0x7e0   : > { %4415 = vmatprep.subr.bf16.mxu0 %v4586_v50 }
 0x7e1   : > { %2905 = vxpose.xlu1.c.b16.cont [4/8] %v2888_v28, 128 }
 0x7e3   : > { %4416 = vmatpush3.bf16.msra.mxu0 %v4586_v50 }
 0x7e4   : > { %4417 = vmatprep.subr.bf16.mxu0 %v4587_v53 }
 0x7e5   : > { %2906 = vxpose.xlu1.c.b16.cont [5/8] %v2889_v43, 128 }
 0x7e7   : > { %4418 = vmatpush3.bf16.msra.mxu0 %v4587_v53 }
 0x7e9   : > { %2907 = vxpose.xlu1.c.b16.cont [6/8] %v2890_v34, 128 }
 0x7ed   : > { %2908 = vxpose.xlu1.c.b16.cont [7/8] %v2891_v6, 128 }
 0x7f1   : > { %2909 = vxpose.xlu1.c.b16.end [8/8] %v2892_v61, 128  ;;  %v2538_v61 = vld [vmem:[#allocation2 + $0x70] sm:$0xff] }
 0x7fd   : > { %v2419_v33 = vpop.trf.xlu0 }
 0x7fe   : > { %4323 = vmatprep.mubr.bf16.mxu1 %v2419_v33 }
 0x801   : > { %v2420_v29 = vpop.trf.xlu0 }
 0x802   : > { %4324 = vmatmul.mubr.bf16.vlgmr.msra.gmra.mrb[16].mxu1 %v2420_v29  ;;  %v2536_v29 = vld [vmem:[#allocation2 + $0x60] sm:$0xff] }
 0x803   : > { %4372 = vmatpush3.bf16.msra.mxu1 %v5799_v54 }
 0x804   : > { %4373 = vmatprep.subr.bf16.mxu1 %v5813_v52 }
 0x805   : > { %v2421_v8 = vpop.trf.xlu0 }
 0x806   : > { %4327 = vmatprep.mubr.bf16.mxu1 %v2421_v8 }
 0x807   : > { %4374 = vmatpush3.bf16.msra.mxu1 %v5813_v52 }
 0x808   : > { %4375 = vmatprep.subr.bf16.mxu1 %v5829_v0 }
 0x809   : > { %v2422_v37 = vpop.trf.xlu0 }
 0x80a   : > { %4328 = vmatmul.mubr.bf16.gmra.mrb[20].mxu1 %v2422_v37  ;;  %v2539_v37 = vld [vmem:[#allocation2 + $0x78] sm:$0xff] }
 0x80b   : > { %4376 = vmatpush3.bf16.msra.mxu1 %v5829_v0 }
 0x80c   : > { %4377 = vmatprep.subr.bf16.mxu1 %v5850_v36 }
 0x80d   : > { %v2423_v44 = vpop.trf.xlu0 }
 0x80e   : > { %4331 = vmatprep.mubr.bf16.mxu1 %v2423_v44 }
 0x80f   : > { %4378 = vmatpush3.bf16.msra.mxu1 %v5850_v36 }
 0x810   : > { %4379 = vmatprep.subr.bf16.mxu1 %v5871_v27 }
 0x811   : > { %v2424_v54 = vpop.trf.xlu0 }
 0x812   : > { %4332 = vmatmul.mubr.bf16.gmra.mrb[24].mxu1 %v2424_v54 }
 0x813   : > { %4380 = vmatpush3.bf16.msra.mxu1 %v5871_v27 }
 0x814   : > { %4381 = vmatprep.subr.bf16.mxu1 %v5886_v49 }
 0x815   : > { %v2425_v52 = vpop.trf.xlu0 }
 0x816   : > { %4335 = vmatprep.mubr.bf16.mxu1 %v2425_v52  ;;  %v2537_v52 = vld [vmem:[#allocation2 + $0x68] sm:$0xff] }
 0x817   : > { %4382 = vmatpush3.bf16.msra.mxu1 %v5886_v49 }
 0x818   : > { %4383 = vmatprep.subr.bf16.mxu1 %v5897_v13 }
 0x819   : > { %v2426_v0 = vpop.trf.xlu0 }
 0x81a   : > { %4336 = vmatmul.mubr.bf16.gmra.mrb[28].mxu1 %v2426_v0 }
 0x81b   : > { %4384 = vmatpush3.bf16.msra.mxu1 %v5897_v13 }
 0x81c   : > { %4385 = vmatprep.subr.bf16.mxu1 %v5906_v35 }
 0x81f   : > { %4386 = vmatpush3.bf16.msra.mxu1 %v5906_v35 }
 0x820   : > { %4451 = vmatprep.subr.bf16.mxu1 %v6297_v10 }
 0x83b   : > { %v2910_v36 = vpop.trf.xlu1 }
 0x83c   : > { %4387 = vmatprep.mubr.bf16.mxu1 %v2910_v36 }
 0x83f   : > { %v2911_v27 = vpop.trf.xlu1 }
 0x840   : > { %4388 = vmatmul.mubr.bf16.vlgmr.msra.gmra.mrb[32].mxu1 %v2911_v27 }
 0x841   : > { %4459 = vmatpush3.bf16.msra.mxu1 %v6297_v10 }
 0x842   : > { %4452 = vmatprep.subr.bf16.mxu1 %v6300_v14 }
 0x843   : > { %v2912_v49 = vpop.trf.xlu1 }
 0x844   : > { %4391 = vmatprep.mubr.bf16.mxu1 %v2912_v49 }
 0x845   : > { %4460 = vmatpush3.bf16.msra.mxu1 %v6300_v14 }
 0x846   : > { %4453 = vmatprep.subr.bf16.mxu1 %v6308_v17 }
 0x847   : > { %v2913_v13 = vpop.trf.xlu1 }
 0x848   : > { %4392 = vmatmul.mubr.bf16.gmra.mrb[36].mxu1 %v2913_v13 }
 0x849   : > { %4461 = vmatpush3.bf16.msra.mxu1 %v6308_v17  ;;  %v2534_v17 = vld [vmem:[#allocation2 + $0x50] sm:$0xff] }
 0x84a   : > { %4454 = vmatprep.subr.bf16.mxu1 %v6315_v3 }
 0x84b   : > { %v2914_v35 = vpop.trf.xlu1 }
 0x84c   : > { %4395 = vmatprep.mubr.bf16.mxu1 %v2914_v35 }
 0x84d   : > { %4462 = vmatpush3.bf16.msra.mxu1 %v6315_v3  ;;  %v2535_v3 = vld [vmem:[#allocation2 + $0x58] sm:$0xff] }
 0x84e   : > { %4455 = vmatprep.subr.bf16.mxu1 %v4584_v48 }
 0x84f   : > { %v2915_v59 = vpop.trf.xlu1 }
 0x850   : > { %4396 = vmatmul.mubr.bf16.gmra.mrb[40].mxu1 %v2915_v59 }
 0x851   : > { %4463 = vmatpush3.bf16.msra.mxu1 %v4584_v48 }
 0x852   : > { %4456 = vmatprep.subr.bf16.mxu1 %v4585_v47 }
 0x853   : > { %v2916_v1 = vpop.trf.xlu1 }
 0x854   : > { %4399 = vmatprep.mubr.bf16.mxu1 %v2916_v1  ;;  %v6371_v1 = vld [vmem:[#allocation2 + $0x90] sm:$0xff] }
 0x855   : > { %4464 = vmatpush3.bf16.msra.mxu1 %v4585_v47  ;;  %v6375_v47 = vld [vmem:[#allocation2 + $0x98] sm:$0xff] }
 0x856   : > { %4457 = vmatprep.subr.bf16.mxu1 %v4586_v50 }
 0x857   : > { %v2917_v60 = vpop.trf.xlu1 }
 0x858   : > { %4400 = vmatmul.mubr.bf16.gmra.mrb[44].mxu1 %v2917_v60  ;;  %v6373_v60 = vld [vmem:[#allocation2 + $0x80] sm:$0xff] }
 0x859   : > { %4465 = vmatpush3.bf16.msra.mxu1 %v4586_v50 }
 0x85a   : > { %4458 = vmatprep.subr.bf16.mxu1 %v4587_v53 }
 0x85d   : > { %4466 = vmatpush3.bf16.msra.mxu1 %v4587_v53 }
 0x8d5   : > { %v4325_v46 = vpop.f32.mrb[16].mxu1 }
 0x8d6   : > { %v2542_v38 = vsub.f32 %v6347_v31, %v4325_v46  ;;  %v2461_v24 = vpop.f32.mrb[17].mxu1  ;;  %v6378_v46 = vld [vmem:[#allocation2 + $0x88] sm:$0xff] }
 0x8d7   : > { %v2540_v51 = vsub.f32 %v6349_v22, %v2461_v24  ;;  %v4326_v2 = vpop.f32.mrb[18].mxu1 }
 0x8d8   : > { %v2543_v18 = vsub.f32 %v6351_v40, %v4326_v2  ;;  %v2464_v26 = vpop.f32.mrb[19].mxu1 }
 0x8d9   : > { %v2541_v42 = vsub.f32 %v6354_v4, %v2464_v26 }
 0x8da   : > { %v3098_v56 = vpack.c.bf16 %v2543_v18, %v2542_v38 }
 0x8db   : > { %v3097_v9 = vpack.c.bf16 %v2541_v42, %v2540_v51  ;;  %v6383_v42 = vld [vmem:[#allocation2 + $0xb0] sm:$0xff] }
 0x8dd   : > { %v4329_v63 = vpop.f32.mrb[20].mxu1  ;;  %4419 = vmatprep.mubr.bf16.mxu0 %v3097_v9 }
 0x8de   : > { %v2546_v57 = vsub.f32 %v2530_v21, %v4329_v63  ;;  %v2477_v23 = vpop.f32.mrb[21].mxu1  ;;  %4420 = vmatmul.mubr.bf16.vlgmr.msra.gmra.mrb[80].mxu0 %v3098_v56  ;;  %v6385_v21 = vld [vmem:[#allocation2 + $0xa0] sm:$0xff]  ;;  %v6387_v63 = vld [vmem:[#allocation2 + $0xb8] sm:$0xff] }
 0x8df   : > { %v2544_v32 = vsub.f32 %v6359_v19, %v2477_v23  ;;  %v4330_v10 = vpop.f32.mrb[22].mxu1  ;;  %6966 = vst [vmem:[#allocation21_spill] sm:$0xff] %v6387_v63  ;;  %v6390_v23 = vld [vmem:[#allocation2 + $0xa8] sm:$0xff] }
 0x8e0   : > { %v2547_v14 = vsub.f32 %v2531_v39, %v4330_v10  ;;  %v2480_v55 = vpop.f32.mrb[23].mxu1 }
 0x8e1   : > { %v2545_v62 = vsub.f32 %v6361_v16, %v2480_v55 }
 0x8e2   : > { %v3100_v45 = vpack.c.bf16 %v2547_v14, %v2546_v57 }
 0x8e3   : > { %v3099_v28 = vpack.c.bf16 %v2545_v62, %v2544_v32 }
 0x8e5   : > { %v4333_v7 = vpop.f32.mrb[24].mxu1  ;;  %4423 = vmatprep.mubr.bf16.mxu0 %v3099_v28 }
 0x8e6   : > { %v2550_v43 = vsub.f32 %v2534_v17, %v4333_v7  ;;  %v2493_v20 = vpop.f32.mrb[25].mxu1  ;;  %4424 = vmatmul.mubr.bf16.gmra.mrb[84].mxu0 %v3100_v45  ;;  %v6395_v17 = vld [vmem:[#allocation2 + $0xd0] sm:$0xff]  ;;  %v6397_v7 = vld [vmem:[#allocation2 + $0xc0] sm:$0xff] }
 0x8e7   : > { %v2548_v34 = vsub.f32 %v6365_v15, %v2493_v20  ;;  %v4334_v12 = vpop.f32.mrb[26].mxu1  ;;  %6967 = vst [vmem:[#allocation22_spill] sm:$0xff] %v6395_v17  ;;  %6968 = vst [vmem:[#allocation23_spill] sm:$0xff] %v6397_v7 }
 0x8e8   : > { %v2551_v58 = vsub.f32 %v2535_v3, %v4334_v12  ;;  %v2496_v6 = vpop.f32.mrb[27].mxu1  ;;  %v6402_v12 = vld [vmem:[#allocation2 + $0xc8] sm:$0xff] }
 0x8e9   : > { %v2549_v30 = vsub.f32 %v6367_v5, %v2496_v6  ;;  %6970 = vst [vmem:[#allocation25_spill] sm:$0xff] %v6402_v12 }
 0x8ea   : > { %v3102_v11 = vpack.c.bf16 %v2551_v58, %v2550_v43  ;;  %v6399_v43 = vld [vmem:[#allocation2 + $0xd8] sm:$0xff] }
 0x8eb   : > { %v3101_v33 = vpack.c.bf16 %v2549_v30, %v2548_v34  ;;  %6969 = vst [vmem:[#allocation24_spill] sm:$0xff] %v6399_v43 }
 0x8ed   : > { %v4337_v8 = vpop.f32.mrb[28].mxu1  ;;  %4427 = vmatprep.mubr.bf16.mxu1 %v3101_v33 }
 0x8ee   : > { %v2554_v44 = vsub.f32 %v2538_v61, %v4337_v8  ;;  %v2509_v54 = vpop.f32.mrb[29].mxu1  ;;  %4428 = vmatmul.mubr.bf16.vlgmr.msra.gmra.mrb[48].mxu1 %v3102_v11 }
 0x8ef   : > { %v2552_v0 = vsub.f32 %v2536_v29, %v2509_v54  ;;  %v4338_v36 = vpop.f32.mrb[30].mxu1  ;;  %v6407_v29 = vld [vmem:[#allocation2 + $0xf0] sm:$0xff]  ;;  %v6411_v54 = vld [vmem:[#allocation2 + $0xf8] sm:$0xff] }
 0x8f0   : > { %v2555_v27 = vsub.f32 %v2539_v37, %v4338_v36  ;;  %v2512_v49 = vpop.f32.mrb[31].mxu1  ;;  %6971 = vst [vmem:[#allocation26_spill] sm:$0xff] %v6407_v29  ;;  %v6409_v37 = vld [vmem:[#allocation2 + $0xe0] sm:$0xff]  ;;  %6973 = vst [vmem:[#allocation28_spill] sm:$0xff] %v6411_v54  ;;  %v6414_v36 = vld [vmem:[#allocation2 + $0xe8] sm:$0xff] }
 0x8f1   : > { %v2553_v13 = vsub.f32 %v2537_v52, %v2512_v49  ;;  %6972 = vst [vmem:[#allocation27_spill] sm:$0xff] %v6409_v37  ;;  %6974 = vst [vmem:[#allocation29_spill] sm:$0xff] %v6414_v36 }
 0x8f2   : > { %v3104_v35 = vpack.c.bf16 %v2555_v27, %v2554_v44 }
 0x8f3   : > { %v3103_v59 = vpack.c.bf16 %v2553_v13, %v2552_v0 }
 0x8f5   : > { %4431 = vmatprep.mubr.bf16.mxu1 %v3103_v59 }
 0x8f6   : > { %4432 = vmatmul.mubr.bf16.gmra.mrb[52].mxu1 %v3104_v35 }
 0x913   : > { %v4389_v48 = vpop.f32.mrb[32].mxu1 }
 0x914   : > { %v3034_v50 = vsub.f32 %v6371_v1, %v4389_v48  ;;  %v2952_v53 = vpop.f32.mrb[33].mxu1 }
 0x915   : > { %v3032_v38 = vsub.f32 %v6373_v60, %v2952_v53  ;;  %v4390_v24 = vpop.f32.mrb[34].mxu1 }
 0x916   : > { %v3035_v51 = vsub.f32 %v6375_v47, %v4390_v24  ;;  %v2955_v2 = vpop.f32.mrb[35].mxu1  ;;  %v6424_v24 = vld [vmem:[%s457_s28] ss:$0 sm:$0xff] }
 0x917   : > { %v3033_v18 = vsub.f32 %v6378_v46, %v2955_v2 }
 0x918   : > { %v3106_v26 = vpack.c.bf16 %v3035_v51, %v3034_v50 }
 0x919   : > { %v3105_v56 = vpack.c.bf16 %v3033_v18, %v3032_v38 }
 0x91b   : > { %v4393_v9 = vpop.f32.mrb[36].mxu1  ;;  %4435 = vmatprep.mubr.bf16.mxu1 %v3105_v56 }
 0x91c   : > { %v3038_v39 = vsub.f32 %v6383_v42, %v4393_v9  ;;  %v2968_v57 = vpop.f32.mrb[37].mxu1  ;;  %4436 = vmatmul.mubr.bf16.gmra.mrb[56].mxu1 %v3106_v26 }
 0x91d   : > { %v3036_v32 = vsub.f32 %v6385_v21, %v2968_v57  ;;  %v4394_v10 = vpop.f32.mrb[38].mxu1 }
 0x91e   : > { %v3039_v14 = vsub.f32 %v6387_v63, %v4394_v10  ;;  %v2971_v55 = vpop.f32.mrb[39].mxu1 }
 0x91f   : > { %v3037_v62 = vsub.f32 %v6390_v23, %v2971_v55 }
 0x920   : > { %v3108_v45 = vpack.c.bf16 %v3039_v14, %v3038_v39 }
 0x921   : > { %v3107_v28 = vpack.c.bf16 %v3037_v62, %v3036_v32 }
 0x923   : > { %v4397_v3 = vpop.f32.mrb[40].mxu1  ;;  %4439 = vmatprep.mubr.bf16.mxu1 %v3107_v28 }
 0x924   : > { %v3042_v20 = vsub.f32 %v6395_v17, %v4397_v3  ;;  %v2984_v34 = vpop.f32.mrb[41].mxu1  ;;  %4440 = vmatmul.mubr.bf16.gmra.mrb[60].mxu1 %v3108_v45 }
 0x925   : > { %v3040_v58 = vsub.f32 %v6397_v7, %v2984_v34  ;;  %v4398_v6 = vpop.f32.mrb[42].mxu1 }
 0x926   : > { %v3043_v30 = vsub.f32 %v6399_v43, %v4398_v6  ;;  %v2987_v11 = vpop.f32.mrb[43].mxu1 }
 0x927   : > { %v3041_v61 = vsub.f32 %v6402_v12, %v2987_v11 }
 0x928   : > { %v3110_v33 = vpack.c.bf16 %v3043_v30, %v3042_v20 }
 0x929   : > { %v3109_v8 = vpack.c.bf16 %v3041_v61, %v3040_v58 }
 0x92b   : > { %v4401_v44 = vpop.f32.mrb[44].mxu1  ;;  %4443 = vmatprep.mubr.bf16.mxu1 %v3109_v8 }
 0x92c   : > { %v3046_v52 = vsub.f32 %v6407_v29, %v4401_v44  ;;  %v3000_v0 = vpop.f32.mrb[45].mxu1  ;;  %4444 = vmatmul.mubr.bf16.gmra.mrb[64].mxu1 %v3110_v33 }
 0x92d   : > { %v3044_v27 = vsub.f32 %v6409_v37, %v3000_v0  ;;  %v4402_v49 = vpop.f32.mrb[46].mxu1 }
 0x92e   : > { %v3047_v13 = vsub.f32 %v6411_v54, %v4402_v49  ;;  %v3003_v35 = vpop.f32.mrb[47].mxu1 }
 0x92f   : > { %v3045_v59 = vsub.f32 %v6414_v36, %v3003_v35 }
 0x930   : > { %v3112_v48 = vpack.c.bf16 %v3047_v13, %v3046_v52 }
 0x931   : > { %v3111_v50 = vpack.c.bf16 %v3045_v59, %v3044_v27 }
 0x933   : > { %4447 = vmatprep.mubr.bf16.mxu1 %v3111_v50 }
 0x934   : > { %4448 = vmatmul.mubr.bf16.gmra.mrb[68].mxu1 %v3112_v48 }
 0x9b1   : > { %v4421_v53 = vpop.f32.mrb[80].mxu0 }
 0x9b2   : > { %v3201_v38 = vpop.f32.mrb[81].mxu0  ;;  %v6433_v9 = vadd.f32 %v4421_v53, %v6424_v24 }
 0x9b3   : > { %v4422_v51 = vpop.f32.mrb[82].mxu0  ;;  %v6427_v18 = vadd.f32 %v6424_v24, %v3201_v38 }
 0x9b4   : > { %v3204_v2 = vpop.f32.mrb[83].mxu0  ;;  %v6438_v14 = vadd.f32 %v4422_v51, %v6424_v24 }
 0x9b5   : > { %v6430_v26 = vadd.f32 %v6424_v24, %v3204_v2 }
 0x9b7   : > { %v3362_v39 = vadd.f32 %v6430_v26, %v6427_v18 }
 0x9b9   : > { %v4425_v56 = vpop.f32.mrb[84].mxu0  ;;  %v3363_v55 = vadd.f32 %v3362_v39, %v6433_v9 }
 0x9ba   : > { %v3217_v57 = vpop.f32.mrb[85].mxu0  ;;  %v6450_v11 = vadd.f32 %v4425_v56, %v6424_v24 }
 0x9bb   : > { %v4426_v32 = vpop.f32.mrb[86].mxu0  ;;  %v6442_v45 = vadd.f32 %v6424_v24, %v3217_v57  ;;  %v3364_v28 = vadd.f32 %v3363_v55, %v6438_v14 }
 0x9bc   : > { %v3220_v10 = vpop.f32.mrb[87].mxu0  ;;  %v6454_v52 = vadd.f32 %v4426_v32, %v6424_v24 }
 0x9bd   : > { %v3365_v58 = vadd.f32 %v3364_v28, %v6442_v45  ;;  %v6447_v6 = vadd.f32 %v6424_v24, %v3220_v10 }
 0x9bf   : > { %v3366_v61 = vadd.f32 %v3365_v58, %v6447_v6 }
 0x9c1   : > { %v4429_v62 = vpop.f32.mrb[48].mxu1  ;;  %v3367_v0 = vadd.f32 %v3366_v61, %v6450_v11 }
 0x9c2   : > { %v3233_v3 = vpop.f32.mrb[49].mxu1  ;;  %v6466_v59 = vadd.f32 %v4429_v62, %v6424_v24 }
 0x9c3   : > { %v4430_v20 = vpop.f32.mrb[50].mxu1  ;;  %v6458_v27 = vadd.f32 %v6424_v24, %v3233_v3  ;;  %v3368_v49 = vadd.f32 %v3367_v0, %v6454_v52 }
 0x9c4   : > { %v3236_v34 = vpop.f32.mrb[51].mxu1  ;;  %v6470_v50 = vadd.f32 %v4430_v20, %v6424_v24 }
 0x9c5   : > { %v3369_v13 = vadd.f32 %v3368_v49, %v6458_v27  ;;  %v6463_v35 = vadd.f32 %v6424_v24, %v3236_v34 }
 0x9c7   : > { %v3370_v48 = vadd.f32 %v3369_v13, %v6463_v35 }
 0x9c9   : > { %v4433_v30 = vpop.f32.mrb[52].mxu1  ;;  %v3371_v53 = vadd.f32 %v3370_v48, %v6466_v59 }
 0x9ca   : > { %v3249_v33 = vpop.f32.mrb[53].mxu1  ;;  %v6482_v39 = vadd.f32 %v4433_v30, %v6424_v24 }
 0x9cb   : > { %v4434_v8 = vpop.f32.mrb[54].mxu1  ;;  %v6474_v38 = vadd.f32 %v6424_v24, %v3249_v33  ;;  %v3372_v51 = vadd.f32 %v3371_v53, %v6470_v50 }
 0x9cc   : > { %v3252_v44 = vpop.f32.mrb[55].mxu1  ;;  %v6486_v32 = vadd.f32 %v4434_v8, %v6424_v24 }
 0x9cd   : > { %v3373_v2 = vadd.f32 %v3372_v51, %v6474_v38  ;;  %v6479_v56 = vadd.f32 %v6424_v24, %v3252_v44 }
 0x9cf   : > { %v3374_v57 = vadd.f32 %v3373_v2, %v6479_v56 }
 0x9d1   : > { %v3375_v10 = vadd.f32 %v3374_v57, %v6482_v39 }
 0x9d3   : > { %v3376_v3 = vadd.f32 %v3375_v10, %v6486_v32 }
 0x9ef   : > { %v4437_v55 = vpop.f32.mrb[56].mxu1 }
 0x9f0   : > { %v3265_v62 = vpop.f32.mrb[57].mxu1  ;;  %v3274_v30 = vadd.f32 %v4437_v55, %v6424_v24 }
 0x9f1   : > { %v3266_v28 = vadd.f32 %v6424_v24, %v3265_v62  ;;  %v4438_v20 = vpop.f32.mrb[58].mxu1 }
 0x9f2   : > { %v3268_v34 = vpop.f32.mrb[59].mxu1  ;;  %v3277_v44 = vadd.f32 %v4438_v20, %v6424_v24 }
 0x9f3   : > { %v3377_v58 = vadd.f32 %v3376_v3, %v3266_v28  ;;  %v3269_v61 = vadd.f32 %v6424_v24, %v3268_v34 }
 0x9f5   : > { %v3378_v33 = vadd.f32 %v3377_v58, %v3269_v61 }
 0x9f7   : > { %v3379_v8 = vadd.f32 %v3378_v33, %v3274_v30  ;;  %v4441_v0 = vpop.f32.mrb[60].mxu1 }
 0x9f8   : > { %v3281_v49 = vpop.f32.mrb[61].mxu1  ;;  %v3290_v10 = vadd.f32 %v4441_v0, %v6424_v24 }
 0x9f9   : > { %v3282_v13 = vadd.f32 %v6424_v24, %v3281_v49  ;;  %v3380_v48 = vadd.f32 %v3379_v8, %v3277_v44  ;;  %v4442_v53 = vpop.f32.mrb[62].mxu1 }
 0x9fa   : > { %v3284_v51 = vpop.f32.mrb[63].mxu1  ;;  %v3293_v3 = vadd.f32 %v4442_v53, %v6424_v24 }
 0x9fb   : > { %v3381_v2 = vadd.f32 %v3380_v48, %v3282_v13  ;;  %v3285_v57 = vadd.f32 %v6424_v24, %v3284_v51 }
 0x9fd   : > { %v3382_v62 = vadd.f32 %v3381_v2, %v3285_v57 }
 0x9ff   : > { %v3383_v55 = vadd.f32 %v3382_v62, %v3290_v10  ;;  %v4445_v34 = vpop.f32.mrb[64].mxu1 }
 0xa00   : > { %v3297_v58 = vpop.f32.mrb[65].mxu1  ;;  %v3306_v48 = vadd.f32 %v4445_v34, %v6424_v24 }
 0xa01   : > { %v3298_v20 = vadd.f32 %v6424_v24, %v3297_v58  ;;  %v3384_v33 = vadd.f32 %v3383_v55, %v3293_v3  ;;  %v4446_v41 = vpop.f32.mrb[66].mxu1 }
 0xa02   : > { %v3300_v54 = vpop.f32.mrb[67].mxu1  ;;  %v3309_v51 = vadd.f32 %v4446_v41, %v6424_v24 }
 0xa03   : > { %v3385_v49 = vadd.f32 %v3384_v33, %v3298_v20  ;;  %v3301_v8 = vadd.f32 %v6424_v24, %v3300_v54 }
 0xa05   : > { %v3386_v29 = vadd.f32 %v3385_v49, %v3301_v8 }
 0xa07   : > { %v3387_v0 = vadd.f32 %v3386_v29, %v3306_v48  ;;  %v4449_v2 = vpop.f32.mrb[68].mxu1 }
 0xa08   : > { %v3313_v36 = vpop.f32.mrb[69].mxu1  ;;  %v3322_v33 = vadd.f32 %v4449_v2, %v6424_v24 }
 0xa09   : > { %v3314_v53 = vadd.f32 %v6424_v24, %v3313_v36  ;;  %v3388_v62 = vadd.f32 %v3387_v0, %v3309_v51  ;;  %v4450_v37 = vpop.f32.mrb[70].mxu1 }
 0xa0a   : > { %v3316_v43 = vpop.f32.mrb[71].mxu1  ;;  %v3325_v54 = vadd.f32 %v4450_v37, %v6424_v24 }
 0xa0b   : > { %v3389_v58 = vadd.f32 %v3388_v62, %v3314_v53  ;;  %v3317_v55 = vadd.f32 %v6424_v24, %v3316_v43 }
 0xa0d   : > { %v3390_v17 = vadd.f32 %v3389_v58, %v3317_v55 }
 0xa0f   : > { %v3391_v34 = vadd.f32 %v3390_v17, %v3322_v33 }
 0xa11   : > { %v3392_v49 = vadd.f32 %v3391_v34, %v3325_v54 }
 0xa13   : > { %v3393_v5 = vrot.slane %v3392_v49, 4 }
 0xa15   : > { %v3394_v41 = vadd.f32 %v3393_v5, %v3392_v49 }
 0xa17   : > { %v3395_v29 = vrot.slane %v3394_v41, 2 }
 0xa19   : > { %v3396_v12 = vadd.f32 %v3395_v29, %v3394_v41 }
 0xa1b   : > { %v3397_v15 = vrot.slane %v3396_v12, 1 }
 0xa1d   : > { %v3398_v7 = vadd.f32 %v3397_v15, %v3396_v12 }
 0xa1f   : > { %v3399_v36 = vmul.f32 0.00390625, %v3398_v7 }
 0xa21   : > { %v6506_v0 = vsub.f32 %v3266_v28, %v3399_v36  ;;  %v6508_v63 = vsub.f32 %v3269_v61, %v3399_v36  ;;  %v6510_v62 = vsub.f32 %v3274_v30, %v3399_v36  ;;  %v6512_v43 = vsub.f32 %v3277_v44, %v3399_v36 }
 0xa22   : > { %v6514_v2 = vsub.f32 %v3282_v13, %v3399_v36  ;;  %v6516_v37 = vsub.f32 %v3285_v57, %v3399_v36  ;;  %v6518_v17 = vsub.f32 %v3290_v10, %v3399_v36  ;;  %v6520_v5 = vsub.f32 %v3293_v3, %v3399_v36 }
 0xa23   : > { %v6522_v24 = vsub.f32 %v3298_v20, %v3399_v36  ;;  %v6524_v15 = vsub.f32 %v3301_v8, %v3399_v36  ;;  %v6526_v7 = vsub.f32 %v3306_v48, %v3399_v36  ;;  %v6528_v12 = vsub.f32 %v3309_v51, %v3399_v36 }
 0xa24   : > { %v6530_v28 = vsub.f32 %v3314_v53, %v3399_v36  ;;  %v6532_v61 = vsub.f32 %v3317_v55, %v3399_v36  ;;  %v6534_v30 = vsub.f32 %v3322_v33, %v3399_v36  ;;  %v6536_v44 = vsub.f32 %v3325_v54, %v3399_v36 }
 0xa25   : > { %v6539_v13 = vsub.f32 %v6427_v18, %v3399_v36  ;;  %v6542_v57 = vsub.f32 %v6430_v26, %v3399_v36  ;;  %v6545_v10 = vsub.f32 %v6433_v9, %v3399_v36  ;;  %v6552_v8 = vsub.f32 %v6438_v14, %v3399_v36 }
 0xa26   : > { %v6555_v48 = vsub.f32 %v6442_v45, %v3399_v36  ;;  %v6560_v51 = vsub.f32 %v6447_v6, %v3399_v36  ;;  %v6565_v58 = vsub.f32 %v6450_v11, %v3399_v36  ;;  %v6570_v45 = vsub.f32 %v6454_v52, %v3399_v36 }
 0xa27   : > { %v3432_v3 = vmul.f32 %v6539_v13, %v6539_v13  ;;  %v3433_v20 = vmul.f32 %v6542_v57, %v6542_v57  ;;  %v3434_v18 = vmul.f32 %v6545_v10, %v6545_v10  ;;  %v3435_v9 = vmul.f32 %v6552_v8, %v6552_v8 }
 0xa28   : > { %v3436_v14 = vmul.f32 %v6555_v48, %v6555_v48  ;;  %v3437_v33 = vmul.f32 %v6560_v51, %v6560_v51  ;;  %v6575_v6 = vsub.f32 %v6458_v27, %v3399_v36  ;;  %v3438_v34 = vmul.f32 %v6565_v58, %v6565_v58 }
 0xa29   : > { %v3464_v26 = vadd.f32 %v3433_v20, %v3432_v3  ;;  %v6580_v11 = vsub.f32 %v6463_v35, %v3399_v36  ;;  %v3439_v41 = vmul.f32 %v6570_v45, %v6570_v45  ;;  %v6585_v52 = vsub.f32 %v6466_v59, %v3399_v36 }
 0xa2a   : > { %v3440_v3 = vmul.f32 %v6575_v6, %v6575_v6  ;;  %v6590_v27 = vsub.f32 %v6470_v50, %v3399_v36  ;;  %v6595_v35 = vsub.f32 %v6474_v38, %v3399_v36  ;;  %v6600_v59 = vsub.f32 %v6479_v56, %v3399_v36 }
 0xa2b   : > { %v3465_v53 = vadd.f32 %v3464_v26, %v3434_v18  ;;  %v3441_v18 = vmul.f32 %v6580_v11, %v6580_v11  ;;  %v6605_v50 = vsub.f32 %v6482_v39, %v3399_v36  ;;  %v6610_v38 = vsub.f32 %v6486_v32, %v3399_v36 }
 0xa2c   : > { %v3449_v32 = vmul.f32 %v6508_v63, %v6508_v63 }
 0xa2d   : > { %v3466_v55 = vadd.f32 %v3465_v53, %v3435_v9  ;;  %v3442_v9 = vmul.f32 %v6585_v52, %v6585_v52  ;;  %v3446_v56 = vmul.f32 %v6605_v50, %v6605_v50 }
 0xa2f   : > { %v3467_v54 = vadd.f32 %v3466_v55, %v3436_v14  ;;  %v3443_v14 = vmul.f32 %v6590_v27, %v6590_v27 }
 0xa31   : > { %v3468_v49 = vadd.f32 %v3467_v54, %v3437_v33  ;;  %v3444_v33 = vmul.f32 %v6595_v35, %v6595_v35 }
 0xa33   : > { %v3469_v29 = vadd.f32 %v3468_v49, %v3438_v34  ;;  %v3445_v34 = vmul.f32 %v6600_v59, %v6600_v59 }
 0xa35   : > { %v3470_v20 = vadd.f32 %v3469_v29, %v3439_v41  ;;  %v3447_v29 = vmul.f32 %v6610_v38, %v6610_v38 }
 0xa37   : > { %v3471_v26 = vadd.f32 %v3470_v20, %v3440_v3  ;;  %v3448_v3 = vmul.f32 %v6506_v0, %v6506_v0 }
 0xa39   : > { %v3472_v53 = vadd.f32 %v3471_v26, %v3441_v18  ;;  %v3450_v18 = vmul.f32 %v6510_v62, %v6510_v62 }
 0xa3b   : > { %v3473_v55 = vadd.f32 %v3472_v53, %v3442_v9  ;;  %v3451_v9 = vmul.f32 %v6512_v43, %v6512_v43 }
 0xa3d   : > { %v3474_v54 = vadd.f32 %v3473_v55, %v3443_v14  ;;  %v3452_v14 = vmul.f32 %v6514_v2, %v6514_v2 }
 0xa3f   : > { %v3475_v49 = vadd.f32 %v3474_v54, %v3444_v33  ;;  %v3453_v33 = vmul.f32 %v6516_v37, %v6516_v37 }
 0xa41   : > { %v3476_v41 = vadd.f32 %v3475_v49, %v3445_v34  ;;  %v3454_v34 = vmul.f32 %v6518_v17, %v6518_v17 }
 0xa43   : > { %v3477_v39 = vadd.f32 %v3476_v41, %v3446_v56  ;;  %v3455_v56 = vmul.f32 %v6520_v5, %v6520_v5 }
 0xa45   : > { %v3478_v20 = vadd.f32 %v3477_v39, %v3447_v29  ;;  %v3456_v29 = vmul.f32 %v6522_v24, %v6522_v24 }
 0xa47   : > { %v3479_v36 = vadd.f32 %v3478_v20, %v3448_v3  ;;  %v3457_v3 = vmul.f32 %v6524_v15, %v6524_v15 }
 0xa49   : > { %v3480_v26 = vadd.f32 %v3479_v36, %v3449_v32  ;;  %v3458_v32 = vmul.f32 %v6526_v7, %v6526_v7 }
 0xa4b   : > { %v3481_v53 = vadd.f32 %v3480_v26, %v3450_v18  ;;  %v3459_v18 = vmul.f32 %v6528_v12, %v6528_v12 }
 0xa4d   : > { %v3482_v55 = vadd.f32 %v3481_v53, %v3451_v9  ;;  %v3460_v9 = vmul.f32 %v6530_v28, %v6530_v28 }
 0xa4f   : > { %v3483_v54 = vadd.f32 %v3482_v55, %v3452_v14  ;;  %v3461_v14 = vmul.f32 %v6532_v61, %v6532_v61 }
 0xa51   : > { %v3484_v49 = vadd.f32 %v3483_v54, %v3453_v33  ;;  %v3462_v33 = vmul.f32 %v6534_v30, %v6534_v30 }
 0xa53   : > { %v3485_v41 = vadd.f32 %v3484_v49, %v3454_v34  ;;  %v3463_v34 = vmul.f32 %v6536_v44, %v6536_v44 }
 0xa55   : > { %v3486_v39 = vadd.f32 %v3485_v41, %v3455_v56 }
 0xa57   : > { %v3487_v20 = vadd.f32 %v3486_v39, %v3456_v29 }
 0xa59   : > { %v3488_v36 = vadd.f32 %v3487_v20, %v3457_v3 }
 0xa5b   : > { %v3489_v26 = vadd.f32 %v3488_v36, %v3458_v32 }
 0xa5d   : > { %v3490_v53 = vadd.f32 %v3489_v26, %v3459_v18  ;;  %v3360_v26 = vld [vmem:[%s460_s13] sm:$0x1] }
 0xa5f   : > { %v3491_v55 = vadd.f32 %v3490_v53, %v3460_v9 }
 0xa61   : > { %v3492_v54 = vadd.f32 %v3491_v55, %v3461_v14  ;;  %v6975_v14 = vsub.s32 0, %v5689_v25 }
 0xa63   : > { %v3493_v49 = vadd.f32 %v3492_v54, %v3462_v33 }
 0xa65   : > { %v3494_v56 = vadd.f32 %v3493_v49, %v3463_v34 }
 0xa67   : > { %v3495_v41 = vrot.slane %v3494_v56, 4 }
 0xa69   : > { %v3496_v29 = vadd.f32 %v3495_v41, %v3494_v56 }
 0xa6b   : > { %v3497_v39 = vrot.slane %v3496_v29, 2 }
 0xa6d   : > { %v3498_v3 = vadd.f32 %v3497_v39, %v3496_v29 }
 0xa6f   : > { %v3499_v20 = vrot.slane %v3498_v3, 1 }
 0xa71   : > { %v3500_v32 = vadd.f32 %v3499_v20, %v3498_v3 }
 0xa73   : > { %v3501_v36 = vmul.f32 0.00390625, %v3500_v32 }
 0xa75   : > { %v3502_v18 = vadd.f32 1e-05, %v3501_v36 }
 0xa77   : > { %4720 = vrsqrt.f32 %v3502_v18 }
 0xa81   : > { %v4721_v9 = vpop.eup %4720 }
 0xa82   : > { %v3504_v53 = vmul.f32 %v4721_v9, %v3360_v26 }
 0xa84   : > { %v3509_v55 = vrot.slane %v3504_v53, %v6975_v14 }
 0xa86   : > { %v6658_v33 = vmul.f32 %v3509_v55, %v6532_v61  ;;  %v3511_v54 = vmul.f32 %v3509_v55, %v6539_v13  ;;  %v3512_v34 = vmul.f32 %v3509_v55, %v6542_v57  ;;  %v3513_v49 = vmul.f32 %v3509_v55, %v6545_v10 }
 0xa87   : > { %v3514_v56 = vmul.f32 %v3509_v55, %v6552_v8  ;;  %v3515_v41 = vmul.f32 %v3509_v55, %v6555_v48  ;;  %v6666_v29 = vmul.f32 %v3509_v55, %v6560_v51  ;;  %v6669_v39 = vmul.f32 %v3509_v55, %v6565_v58 }
 0xa88   : > { %v6672_v25 = vmul.f32 %v3509_v55, %v6570_v45  ;;  %v6675_v61 = vmul.f32 %v3509_v55, %v6575_v6  ;;  %v6678_v13 = vmul.f32 %v3509_v55, %v6580_v11  ;;  %v6681_v57 = vmul.f32 %v3509_v55, %v6585_v52 }
 0xa89   : > { %v6684_v10 = vmul.f32 %v3509_v55, %v6590_v27  ;;  %v6687_v8 = vmul.f32 %v3509_v55, %v6595_v35  ;;  %v6690_v48 = vmul.f32 %v3509_v55, %v6600_v59  ;;  %v6693_v51 = vmul.f32 %v3509_v55, %v6605_v50  ;;  %v6710_v50 = vld [vmem:[%s463_s24] ss:$0 sm:$0xff]  ;;  %s6988_s24 = sand.u32 1, %s6987_s12  }
 0xa8a   : > { %v6696_v58 = vmul.f32 %v3509_v55, %v6610_v38  ;;  %v3527_v45 = vmul.f32 %v3509_v55, %v6506_v0  ;;  %v3528_v6 = vmul.f32 %v3509_v55, %v6508_v63  ;;  %v3529_v11 = vmul.f32 %v3509_v55, %v6510_v62  ;;  %s3775_s29 = scalar_lea.sflag [#allocation7], %s6988_s24 }
 0xa8b   : > { %v3530_v52 = vmul.f32 %v3509_v55, %v6512_v43  ;;  %v3531_v27 = vmul.f32 %v3509_v55, %v6514_v2  ;;  %v3532_v35 = vmul.f32 %v3509_v55, %v6516_v37  ;;  %v3533_v59 = vmul.f32 %v3509_v55, %v6518_v17 }
 0xa8c   : > { %v3534_v0 = vmul.f32 %v3509_v55, %v6520_v5  ;;  %v6714_v63 = vmul.f32 %v3509_v55, %v6522_v24  ;;  %v6717_v62 = vmul.f32 %v3509_v55, %v6524_v15  ;;  %v6720_v43 = vmul.f32 %v3509_v55, %v6526_v7 }
 0xa8d   : > { %v6723_v2 = vmul.f32 %v3509_v55, %v6528_v12  ;;  %v6726_v37 = vmul.f32 %v3509_v55, %v6530_v28  ;;  %v6729_v17 = vmul.f32 %v3509_v55, %v6534_v30  ;;  %v6732_v5 = vmul.f32 %v3509_v55, %v6536_v44 }
 0xa8e   : > { %v3565_v24 = vadd.f32 %v6710_v50, %v3527_v45  ;;  %v3549_v15 = vadd.f32 %v6710_v50, %v3511_v54  ;;  %v3566_v38 = vadd.f32 %v6710_v50, %v3528_v6  ;;  %v3550_v7 = vadd.f32 %v6710_v50, %v3512_v34 }
 0xa8f   : > { %v3567_v12 = vadd.f32 %v6710_v50, %v3529_v11  ;;  %v3551_v3 = vadd.f32 %v6710_v50, %v3513_v49  ;;  %v3568_v28 = vadd.f32 %v6710_v50, %v3530_v52  ;;  %v3552_v30 = vadd.f32 %v6710_v50, %v3514_v56  ;;  %v3334_v52 = vld [vmem:[#allocation2 + $0x30] sm:$0xff] }
 0xa90   : > { %v3597_v20 = vmax.f32 %v3565_v24, 0.0  ;;  %v3581_v32 = vmax.f32 %v3549_v15, 0.0  ;;  %v3598_v44 = vmax.f32 %v3566_v38, 0.0  ;;  %v3582_v36 = vmax.f32 %v3550_v7, 0.0  ;;  %v3335_v7 = vld [vmem:[#allocation2 + $0x38] sm:$0xff] }
 0xa91   : > { %v3599_v18 = vmax.f32 %v3567_v12, 0.0  ;;  %v3583_v26 = vmax.f32 %v3551_v3, 0.0  ;;  %v3600_v9 = vmax.f32 %v3568_v28, 0.0  ;;  %v3584_v53 = vmax.f32 %v3552_v30, 0.0  ;;  %v6976_v28 = vld [vmem:[#allocation21_spill] sm:$0xff] }
 0xa92   : > { %v3629_v14 = vadd.f32 %v3597_v20, %v6373_v60  ;;  %v3613_v55 = vadd.f32 %v3581_v32, %v6349_v22  ;;  %v3630_v54 = vadd.f32 %v3598_v44, %v6378_v46  ;;  %v3614_v34 = vadd.f32 %v3582_v36, %v6354_v4  ;;  %v3338_v36 = vld [vmem:[#allocation2 + $0x50] sm:$0xff] }
 0xa93   : > { %v3631_v49 = vadd.f32 %v3599_v18, %v6371_v1  ;;  %v3615_v56 = vadd.f32 %v3583_v26, %v6347_v31  ;;  %v6749_v45 = vadd.f32 %v3600_v9, %v6375_v47  ;;  %v6752_v6 = vadd.f32 %v3584_v53, %v6351_v40  ;;  %v3339_v53 = vld [vmem:[#allocation2 + $0x58] sm:$0xff] }
 0xa94   : > { %3725 = vxpose.xlu1.b32.start [1/16] %v3629_v14, 128  ;;  %3661 = vst [vmem:[#allocation2 + $0x80] sm:$0xff] %v3629_v14  ;;  %3677 = vxpose.xlu0.b32.start [1/16] %v3613_v55, 128  ;;  %3645 = vst [vmem:[#allocation2] sm:$0xff] %v3613_v55  ;;  %v3569_v22 = vadd.f32 %v6710_v50, %v3531_v27  ;;  %v3553_v4 = vadd.f32 %v6710_v50, %v3515_v41  ;;  %v6978_v55 = vld [vmem:[#allocation19_spill] sm:$0xff] }
 0xa95   : > { %3662 = vst [vmem:[#allocation2 + $0x88] sm:$0xff] %v3630_v54  ;;  %3646 = vst [vmem:[#allocation2 + $0x8] sm:$0xff] %v3614_v34  ;;  %v3570_v1 = vadd.f32 %v6710_v50, %v3532_v35  ;;  %v3554_v31 = vadd.f32 %v6710_v50, %v6666_v29  ;;  %v3571_v40 = vadd.f32 %v6710_v50, %v3533_v59 }
 0xa96   : > { %3663 = vst [vmem:[#allocation2 + $0x90] sm:$0xff] %v3631_v49  ;;  %3647 = vst [vmem:[#allocation2 + $0x10] sm:$0xff] %v3615_v56  ;;  %v3555_v60 = vadd.f32 %v6710_v50, %v6669_v39  ;;  %v3572_v47 = vadd.f32 %v6710_v50, %v3534_v0  ;;  %v3601_v46 = vmax.f32 %v3569_v22, 0.0  ;;  %v3585_v41 = vmax.f32 %v3553_v4, 0.0  ;;  %v6981_v4 = vld [vmem:[#allocation22_spill] sm:$0xff] }
 0xa97   : > { %3664 = vst [vmem:[#allocation2 + $0x98] sm:$0xff] %v6749_v45  ;;  %3648 = vst [vmem:[#allocation2 + $0x18] sm:$0xff] %v6752_v6  ;;  %v3602_v11 = vmax.f32 %v3570_v1, 0.0  ;;  %v3556_v27 = vadd.f32 %v6710_v50, %v6672_v25  ;;  %v3586_v35 = vmax.f32 %v3554_v31, 0.0  ;;  %v3603_v24 = vmax.f32 %v3571_v40, 0.0  ;;  %v6982_v40 = vld [vmem:[#allocation24_spill] sm:$0xff] }
 0xa98   : > { %v3587_v15 = vmax.f32 %v3555_v60, 0.0  ;;  %v3604_v38 = vmax.f32 %v3572_v47, 0.0  ;;  %3726 = vxpose.xlu1.b32.cont [2/16] %v3630_v54, 128  ;;  %3678 = vxpose.xlu0.b32.cont [2/16] %v3614_v34, 128  ;;  %v6768_v29 = vadd.f32 %v3601_v46, %v6385_v21  ;;  %v6771_v39 = vadd.f32 %v3585_v41, %v6359_v19  ;;  %v6979_v54 = vld [vmem:[#allocation25_spill] sm:$0xff]  ;;  %v3340_v41 = vld [vmem:[#allocation2 + $0x60] sm:$0xff] }
 0xa99   : > { %v6774_v59 = vadd.f32 %v3602_v11, %v6390_v23  ;;  %v3588_v0 = vmax.f32 %v3556_v27, 0.0  ;;  %v6777_v12 = vadd.f32 %v3586_v35, %v6361_v16  ;;  %v6780_v25 = vadd.f32 %v3603_v24, %v6383_v42  ;;  %v3341_v27 = vld [vmem:[#allocation2 + $0x68] sm:$0xff]  ;;  %v3342_v35 = vld [vmem:[#allocation2 + $0x70] sm:$0xff] }
 0xa9a   : > { %v6782_v3 = vadd.f32 %v3587_v15, %v3334_v52  ;;  %v6785_v30 = vadd.f32 %v3604_v38, %v6976_v28  ;;  %3665 = vst [vmem:[#allocation2 + $0xa0] sm:$0xff] %v6768_v29  ;;  %3649 = vst [vmem:[#allocation2 + $0x20] sm:$0xff] %v6771_v39  ;;  %v3573_v16 = vadd.f32 %v6710_v50, %v6714_v63 }
 0xa9b   : > { %3666 = vst [vmem:[#allocation2 + $0xa8] sm:$0xff] %v6774_v59  ;;  %v6790_v19 = vadd.f32 %v3588_v0, %v3335_v7  ;;  %v3557_v42 = vadd.f32 %v6710_v50, %v6675_v61  ;;  %v3574_v21 = vadd.f32 %v6710_v50, %v6717_v62  ;;  %3650 = vst [vmem:[#allocation2 + $0x28] sm:$0xff] %v6777_v12  ;;  %v3343_v0 = vld [vmem:[#allocation2 + $0x78] sm:$0xff] }
 0xa9c   : > { %3667 = vst [vmem:[#allocation2 + $0xb0] sm:$0xff] %v6780_v25  ;;  %3651 = vst [vmem:[#allocation2 + $0x30] sm:$0xff] %v6782_v3  ;;  %v3558_v23 = vadd.f32 %v6710_v50, %v6678_v13  ;;  %v3575_v63 = vadd.f32 %v6710_v50, %v6720_v43  ;;  %v3559_v61 = vadd.f32 %v6710_v50, %v6681_v57  ;;  %3727 = vxpose.xlu1.b32.cont [3/16] %v3631_v49, 128  ;;  %v6977_v57 = vld [vmem:[#allocation23_spill] sm:$0xff] }
 0xa9d   : > { %3668 = vst [vmem:[#allocation2 + $0xb8] sm:$0xff] %v6785_v30  ;;  %v3576_v62 = vadd.f32 %v6710_v50, %v6723_v2  ;;  %3679 = vxpose.xlu0.b32.cont [3/16] %v3615_v56, 128  ;;  %3652 = vst [vmem:[#allocation2 + $0x38] sm:$0xff] %v6790_v19  ;;  %v3605_v20 = vmax.f32 %v3573_v16, 0.0  ;;  %v3589_v32 = vmax.f32 %v3557_v42, 0.0  ;;  %v3606_v44 = vmax.f32 %v3574_v21, 0.0  ;;  %v6980_v56 = vld [vmem:[#allocation20_spill] sm:$0xff] }
 0xa9e   : > { %v3560_v13 = vadd.f32 %v6710_v50, %v6684_v10  ;;  %v3590_v18 = vmax.f32 %v3558_v23, 0.0  ;;  %v3607_v26 = vmax.f32 %v3575_v63, 0.0  ;;  %v3591_v43 = vmax.f32 %v3559_v61, 0.0  ;;  %v6984_v21 = vld [vmem:[#allocation29_spill] sm:$0xff]  ;;  %v6985_v63 = vld [vmem:[#allocation26_spill] sm:$0xff] }
 0xa9f   : > { %v3608_v9 = vmax.f32 %v3576_v62, 0.0  ;;  %v3637_v14 = vadd.f32 %v3605_v20, %v6977_v57  ;;  %v3621_v2 = vadd.f32 %v3589_v32, %v6978_v55  ;;  %v3638_v34 = vadd.f32 %v3606_v44, %v6979_v54 }
 0xaa0   : > { %v3592_v49 = vmax.f32 %v3560_v13, 0.0  ;;  %v3622_v22 = vadd.f32 %v3590_v18, %v6980_v56  ;;  %v3639_v1 = vadd.f32 %v3607_v26, %v6981_v4  ;;  %v3623_v31 = vadd.f32 %v3591_v43, %v3338_v36  ;;  %3728 = vxpose.xlu1.b32.cont [4/16] %v6749_v45, 128 }
 0xaa1   : > { %v3640_v60 = vadd.f32 %v3608_v9, %v6982_v40  ;;  %3680 = vxpose.xlu0.b32.cont [4/16] %v6752_v6, 128  ;;  %3669 = vst [vmem:[#allocation2 + $0xc0] sm:$0xff] %v3637_v14  ;;  %3653 = vst [vmem:[#allocation2 + $0x40] sm:$0xff] %v3621_v2  ;;  %v3577_v47 = vadd.f32 %v6710_v50, %v6726_v37  ;;  %v3561_v46 = vadd.f32 %v6710_v50, %v6687_v8 }
 0xaa2   : > { %3670 = vst [vmem:[#allocation2 + $0xc8] sm:$0xff] %v3638_v34  ;;  %v3624_v10 = vadd.f32 %v3592_v49, %v3339_v53  ;;  %3654 = vst [vmem:[#allocation2 + $0x48] sm:$0xff] %v3622_v22  ;;  %v3578_v45 = vadd.f32 %v6710_v50, %v6658_v33  ;;  %v3562_v6 = vadd.f32 %v6710_v50, %v6690_v48 }
 0xaa3   : > { %3671 = vst [vmem:[#allocation2 + $0xd0] sm:$0xff] %v3639_v1  ;;  %3655 = vst [vmem:[#allocation2 + $0x50] sm:$0xff] %v3623_v31  ;;  %v3579_v11 = vadd.f32 %v6710_v50, %v6729_v17  ;;  %v3563_v37 = vadd.f32 %v6710_v50, %v6693_v51  ;;  %v3609_v52 = vmax.f32 %v3577_v47, 0.0  ;;  %v3593_v8 = vmax.f32 %v3561_v46, 0.0  ;;  %v6983_v51 = vld [vmem:[#allocation27_spill] sm:$0xff] }
 0xaa4   : > { %3672 = vst [vmem:[#allocation2 + $0xd8] sm:$0xff] %v3640_v60  ;;  %3656 = vst [vmem:[#allocation2 + $0x58] sm:$0xff] %v3624_v10  ;;  %v3580_v24 = vadd.f32 %v6710_v50, %v6732_v5  ;;  %v3564_v33 = vadd.f32 %v6710_v50, %v6696_v58  ;;  %v3610_v15 = vmax.f32 %v3578_v45, 0.0  ;;  %v3594_v38 = vmax.f32 %v3562_v6, 0.0  ;;  %3729 = vxpose.xlu1.b32.cont [5/16] %v6768_v29, 128  ;;  %v6986_v50 = vld [vmem:[#allocation28_spill] sm:$0xff] }
 0xaa5   : > { %v3611_v48 = vmax.f32 %v3579_v11, 0.0  ;;  %v3595_v7 = vmax.f32 %v3563_v37, 0.0  ;;  %3681 = vxpose.xlu0.b32.cont [5/16] %v6771_v39, 128  ;;  %v3641_v17 = vadd.f32 %v3609_v52, %v6983_v51  ;;  %v3625_v28 = vadd.f32 %v3593_v8, %v3340_v41 }
 0xaa6   : > { %v3612_v16 = vmax.f32 %v3580_v24, 0.0  ;;  %v3596_v42 = vmax.f32 %v3564_v33, 0.0  ;;  %v3642_v23 = vadd.f32 %v3610_v15, %v6984_v21  ;;  %v3626_v5 = vadd.f32 %v3594_v38, %v3341_v27 }
 0xaa7   : > { %v3643_v61 = vadd.f32 %v3611_v48, %v6985_v63  ;;  %v3627_v58 = vadd.f32 %v3595_v7, %v3342_v35  ;;  %3673 = vst [vmem:[#allocation2 + $0xe0] sm:$0xff] %v3641_v17  ;;  %3657 = vst [vmem:[#allocation2 + $0x60] sm:$0xff] %v3625_v28 }
 0xaa8   : > { %v3644_v62 = vadd.f32 %v3612_v16, %v6986_v50  ;;  %v3628_v20 = vadd.f32 %v3596_v42, %v3343_v0  ;;  %3674 = vst [vmem:[#allocation2 + $0xe8] sm:$0xff] %v3642_v23  ;;  %3658 = vst [vmem:[#allocation2 + $0x68] sm:$0xff] %v3626_v5  ;;  %3730 = vxpose.xlu1.b32.cont [6/16] %v6774_v59, 128 }
 0xaa9   : > { %3675 = vst [vmem:[#allocation2 + $0xf0] sm:$0xff] %v3643_v61  ;;  %3659 = vst [vmem:[#allocation2 + $0x70] sm:$0xff] %v3627_v58  ;;  %3682 = vxpose.xlu0.b32.cont [6/16] %v6777_v12, 128 }
 0xaaa   : > { %3676 = vst [vmem:[#allocation2 + $0xf8] sm:$0xff] %v3644_v62  ;;  %3660 = vst [vmem:[#allocation2 + $0x78] sm:$0xff] %v3628_v20 }
 0xaac   : > { %3731 = vxpose.xlu1.b32.cont [7/16] %v6780_v25, 128 }
 0xaad   : > { %3683 = vxpose.xlu0.b32.cont [7/16] %v6782_v3, 128 }
 0xab0   : > { %3732 = vxpose.xlu1.b32.cont [8/16] %v6785_v30, 128 }
 0xab1   : > { %3684 = vxpose.xlu0.b32.cont [8/16] %v6790_v19, 128 }
 0xab4   : > { %3733 = vxpose.xlu1.b32.cont [9/16] %v3637_v14, 128 }
 0xab5   : > { %3685 = vxpose.xlu0.b32.cont [9/16] %v3621_v2, 128 }
 0xab8   : > { %3734 = vxpose.xlu1.b32.cont [10/16] %v3638_v34, 128 }
 0xab9   : > { %3686 = vxpose.xlu0.b32.cont [10/16] %v3622_v22, 128 }
 0xabc   : > { %3735 = vxpose.xlu1.b32.cont [11/16] %v3639_v1, 128 }
 0xabd   : > { %3687 = vxpose.xlu0.b32.cont [11/16] %v3623_v31, 128 }
 0xac0   : > { %3736 = vxpose.xlu1.b32.cont [12/16] %v3640_v60, 128 }
 0xac1   : > { %3688 = vxpose.xlu0.b32.cont [12/16] %v3624_v10, 128 }
 0xac4   : > { %3737 = vxpose.xlu1.b32.cont [13/16] %v3641_v17, 128 }
 0xac5   : > { %3689 = vxpose.xlu0.b32.cont [13/16] %v3625_v28, 128 }
 0xac8   : > { %3738 = vxpose.xlu1.b32.cont [14/16] %v3642_v23, 128 }
 0xac9   : > { %3690 = vxpose.xlu0.b32.cont [14/16] %v3626_v5, 128 }
 0xacc   : > { %3739 = vxpose.xlu1.b32.cont [15/16] %v3643_v61, 128 }
 0xacd   : > { %3691 = vxpose.xlu0.b32.cont [15/16] %v3627_v58, 128 }
 0xad0   : > { %3740 = vxpose.xlu1.b32.end [16/16] %v3644_v62, 128 }
 0xad1   : > { %3692 = vxpose.xlu0.b32.end [16/16] %v3628_v20, 128 }
 0xb14   : > { %v3741_v29 = vpop.trf.xlu1 }
 0xb15   : > { %v3693_v39 = vpop.trf.xlu0  ;;  %4019 = vst [vmem:[%s4911_s14 + $0x80] sm:$0xff] %v3741_v29 }
 0xb16   : > { %3709 = vst [vmem:[%s4911_s14] sm:$0xff] %v3693_v39 }
 0xb18   : > { %v3742_v59 = vpop.trf.xlu1 }
 0xb19   : > { %v3694_v12 = vpop.trf.xlu0  ;;  %4020 = vst [vmem:[%s4911_s14 + $0x88] sm:$0xff] %v3742_v59 }
 0xb1a   : > { %3710 = vst [vmem:[%s4911_s14 + $0x8] sm:$0xff] %v3694_v12 }
 0xb1c   : > { %v3743_v25 = vpop.trf.xlu1 }
 0xb1d   : > { %v3695_v3 = vpop.trf.xlu0  ;;  %4021 = vst [vmem:[%s4911_s14 + $0x90] sm:$0xff] %v3743_v25 }
 0xb1e   : > { %3711 = vst [vmem:[%s4911_s14 + $0x10] sm:$0xff] %v3695_v3 }
 0xb20   : > { %v3744_v30 = vpop.trf.xlu1 }
 0xb21   : > { %v3696_v19 = vpop.trf.xlu0  ;;  %4022 = vst [vmem:[%s4911_s14 + $0x98] sm:$0xff] %v3744_v30 }
 0xb22   : > { %3712 = vst [vmem:[%s4911_s14 + $0x18] sm:$0xff] %v3696_v19 }
 0xb24   : > { %v3745_v32 = vpop.trf.xlu1 }
 0xb25   : > { %v3697_v44 = vpop.trf.xlu0  ;;  %4023 = vst [vmem:[%s4911_s14 + $0xa0] sm:$0xff] %v3745_v32 }
 0xb26   : > { %3713 = vst [vmem:[%s4911_s14 + $0x20] sm:$0xff] %v3697_v44 }
 0xb28   : > { %v3746_v36 = vpop.trf.xlu1 }
 0xb29   : > { %v3698_v13 = vpop.trf.xlu0  ;;  %4024 = vst [vmem:[%s4911_s14 + $0xa8] sm:$0xff] %v3746_v36 }
 0xb2a   : > { %3714 = vst [vmem:[%s4911_s14 + $0x28] sm:$0xff] %v3698_v13 }
 0xb2c   : > { %v3747_v18 = vpop.trf.xlu1 }
 0xb2d   : > { %v3699_v26 = vpop.trf.xlu0  ;;  %4025 = vst [vmem:[%s4911_s14 + $0xb0] sm:$0xff] %v3747_v18 }
 0xb2e   : > { %3715 = vst [vmem:[%s4911_s14 + $0x30] sm:$0xff] %v3699_v26 }
 0xb30   : > { %v3748_v43 = vpop.trf.xlu1 }
 0xb31   : > { %v3700_v9 = vpop.trf.xlu0  ;;  %4026 = vst [vmem:[%s4911_s14 + $0xb8] sm:$0xff] %v3748_v43 }
 0xb32   : > { %3716 = vst [vmem:[%s4911_s14 + $0x38] sm:$0xff] %v3700_v9 }
 0xb34   : > { %v3749_v53 = vpop.trf.xlu1 }
 0xb35   : > { %v3701_v57 = vpop.trf.xlu0  ;;  %4027 = vst [vmem:[%s4911_s14 + $0xc0] sm:$0xff] %v3749_v53 }
 0xb36   : > { %3717 = vst [vmem:[%s4911_s14 + $0x40] sm:$0xff] %v3701_v57 }
 0xb38   : > { %v3750_v14 = vpop.trf.xlu1 }
 0xb39   : > { %v3702_v55 = vpop.trf.xlu0  ;;  %4028 = vst [vmem:[%s4911_s14 + $0xc8] sm:$0xff] %v3750_v14 }
 0xb3a   : > { %3718 = vst [vmem:[%s4911_s14 + $0x48] sm:$0xff] %v3702_v55 }
 0xb3c   : > { %v3751_v2 = vpop.trf.xlu1 }
 0xb3d   : > { %v3703_v54 = vpop.trf.xlu0  ;;  %4029 = vst [vmem:[%s4911_s14 + $0xd0] sm:$0xff] %v3751_v2 }
 0xb3e   : > { %3719 = vst [vmem:[%s4911_s14 + $0x50] sm:$0xff] %v3703_v54 }
 0xb40   : > { %v3752_v34 = vpop.trf.xlu1 }
 0xb41   : > { %v3704_v49 = vpop.trf.xlu0  ;;  %4030 = vst [vmem:[%s4911_s14 + $0xd8] sm:$0xff] %v3752_v34 }
 0xb42   : > { %3720 = vst [vmem:[%s4911_s14 + $0x58] sm:$0xff] %v3704_v49 }
 0xb44   : > { %v3753_v56 = vpop.trf.xlu1 }
 0xb45   : > { %v3705_v22 = vpop.trf.xlu0  ;;  %4031 = vst [vmem:[%s4911_s14 + $0xe0] sm:$0xff] %v3753_v56 }
 0xb46   : > { %3721 = vst [vmem:[%s4911_s14 + $0x60] sm:$0xff] %v3705_v22 }
 0xb48   : > { %v3754_v4 = vpop.trf.xlu1 }
 0xb49   : > { %v3706_v1 = vpop.trf.xlu0  ;;  %4032 = vst [vmem:[%s4911_s14 + $0xe8] sm:$0xff] %v3754_v4 }
 0xb4a   : > { %3722 = vst [vmem:[%s4911_s14 + $0x68] sm:$0xff] %v3706_v1 }
 0xb4c   : > { %v3755_v31 = vpop.trf.xlu1 }
 0xb4d   : > { %v3707_v40 = vpop.trf.xlu0  ;;  %4033 = vst [vmem:[%s4911_s14 + $0xf0] sm:$0xff] %v3755_v31 }
 0xb4e   : > { %3723 = vst [vmem:[%s4911_s14 + $0x70] sm:$0xff] %v3707_v40 }
 0xb50   : > { %v3756_v60 = vpop.trf.xlu1 }
 0xb51   : > { %v3708_v10 = vpop.trf.xlu0  ;;  %4034 = vst [vmem:[%s4911_s14 + $0xf8] sm:$0xff] %v3756_v60 }
 0xb52   : > { %3724 = vst [vmem:[%s4911_s14 + $0x78] sm:$0xff] %v3708_v10 }
 0xb53   : > { %s4042_s25 = sshll.u32 %s4847_s21, 11  ;;  %s3804_s15 = sshll.u32 %s4911_s14, 4  ;;  %s3805_s15 = int_to_ptr.vmem [resolvable:$true] %s3804_s15 }
 0xb54   : > { %s6990_s23 = sld [smem:[#allocation30_spill]]  ;;  %s4759_s20 = smov 2048  }
 0xb55   : > { %4483 = sst [smem:[#allocation9]] (%p4864_p5), %s4759_s20  ;;  %s4760_s18 = smov 8192  }
 0xb56   : > { %4484 = sst [smem:[#allocation9 + $0x1]] (%p4864_p5), %s4760_s18  ;;  %s4761_s11 = smov 16  }
 0xb57   : > { %4485 = sst [smem:[#allocation9 + $0x2]] (%p4864_p5), %s4761_s11  ;;  %s4762_s26 = smov 128  }
 0xb58   : > { %4486 = sst [smem:[#allocation9 + $0x3]] (%p4864_p5), %s4762_s26  ;;  %s4763_s21 = smov 8  }
 0xb59   : > { %4487 = sst [smem:[#allocation9 + $0x4]] (%p4864_p5), %s4762_s26  ;;  %s4764_s14 = smov [#allocation8]  }
 0xb5a   : > { %s3787_s17 = scalar_lea.hbm %s6990_s23, %s4042_s25  ;;  %4488 = sst [smem:[#allocation9 + $0x5]] (%p4864_p5), %s4763_s21 }
 0xb5b   : > { %s4765_s28 = smov 0  }
 0xb5c   : > { %4489 = dma.general (%p4864_p5), %s3805_s15, 4096, %s3787_s17, %s3775_s29, %s4764_s14, [#allocation9], %s4765_s28, 0  }
 0xb5d PF: > { %s6991_s22 = sld [smem:[#allocation14_spill]]  ;;  %s6992_s13 = sld [smem:[#allocation11_spill]] }
 0xb63   : > { %p4495_p12 = scmp.ge.s32.totalorder %s6991_s22, 2  ;;  %s3832_s12 = sand.u32 1, %s6992_s13  }
 0xb64   : > { %s3833_s24 = scalar_lea.sflag [#allocation7], %s3832_s12 }
 0xb65   : > { %p4492_p13 = pnand %p4495_p12, %p4868_p6 }
 0xb67   : > { %4739 = dma.done.wait (!%p4492_p13), %s3833_s24, 4096  }
 0xb68   : > { %4741 = vsyncadd (!%p4492_p13), %s3833_s24, 4294963200  ;;  %s6994_s20 = sld [smem:[#allocation15_spill]]  ;;  %s6995_s17 = sld [smem:[#allocation12_spill]] }
 0xb69   : > { %s6996_s18 = sld [smem:[#allocation13_spill]]  ;;  %s6997_s19 = sld [smem:[#allocation16_spill]] }
 0xb6e   : > { %p21_p0 = scmp.ge.s32.totalorder %s6994_s20, 6  }
 0xb70   :  { %23 = sbr.rel (!%p21_p0) target bundleno = 5 (0x5), region = 131 }
 0xb77   :  { %3838 = vsyncpa [#allocation7], 1 }
 0xb78   :  { %3840 = vsyncpa [#allocation7 + $0x1], 1 }

</bundles_post_ra>
